<compile_context>
chip_gen: v5e
topology: v5e:2x2
jax: 0.10.0
libtpu: 0.0.40
codegen_flags: <defaults>
</compile_context>

<pallas_src>
import functools

import jax
import jax.numpy as jnp
from jax import lax
from jax.experimental import pallas as pl
from jax.experimental.pallas import tpu as pltpu


# ----------------------------------------------------------------------------
# VMEM budget / tile-size selection (generation aware: 128 MiB v5e/v6e, 64 MiB v7x)
# ----------------------------------------------------------------------------
def _vmem_budget_bytes():
    try:
        cap = int(getattr(pltpu.get_tpu_info(), "vmem_capacity_bytes",
                          64 * 1024 * 1024))
    except Exception:
        cap = 64 * 1024 * 1024
    # Stay at ~half of physical VMEM, never above 64 MiB.
    return max(16 * 1024 * 1024, min(cap // 2, 64 * 1024 * 1024))


def _conv_vmem_estimate(th, w, cin, tc):
    """Rough per-grid-step VMEM bytes (bf16 activations/weights, f32 accumulate),
    counting double-buffering of the pipelined inputs/outputs."""
    halo_in = (th + 2) * (w + 2) * cin * 2
    weight = 9 * cin * tc * 2
    out_conv = th * w * tc * 2
    out_pool = (th // 2) * (w // 2) * tc * 2
    im2col = th * w * 9 * cin * 2
    acc = th * w * tc * 4
    return 2 * (halo_in + weight + out_conv + out_pool) + im2col + acc


def _choose_row_tile(h, w, cin, tc, budget, need_even):
    """Largest row tile (divisor of h, even if pooling) that fits the budget."""
    th = h
    while _conv_vmem_estimate(th, w, cin, tc) > budget:
        nxt = th // 2
        if th % 2 != 0 or nxt < 1 or (need_even and nxt % 2 != 0):
            break
        th = nxt
    # Cap the row tile: keeps the matmul M = th*W large enough for the MXU while
    # bounding VMEM and giving the pipeline several grid steps to overlap DMA.
    if th > 16 and th % 16 == 0:
        th = 16
    return th


# ----------------------------------------------------------------------------
# Fused 3x3 "same" conv + bias + ReLU (+ optional fused 2x2/s2 pool epilogue)
# ----------------------------------------------------------------------------
def _conv3x3_kernel(x_ref, w_ref, b_ref, *out_refs, pool):
    # x_ref: (1, 1, TH+2, W+2, Cin)  bf16 haloed input row-tile
    # w_ref: (9*Cin, TC)             bf16 im2col-packed weights for this Cout tile
    # b_ref: (1, TC)                 f32 bias
    # out_refs[0]: (1, TH, W, TC)    bf16 conv+ReLU output tile
    # out_refs[1]: (1, TH/2, W/2, TC) bf16 pooled output tile (only when pool set)
    _, _, thp, wp, cin = x_ref.shape
    th, tw = thp - 2, wp - 2
    tc = out_refs[0].shape[-1]

    x = x_ref[0, 0]                                         # (TH+2, W+2, Cin) bf16
    # im2col: 9 shifted windows stacked along channels -> (TH*W, 9*Cin).
    cols = [x[dy:dy + th, dx:dx + tw, :] for dy in range(3) for dx in range(3)]
    patches = jnp.concatenate(cols, axis=-1).reshape(th * tw, 9 * cin)
    # One MXU matmul with K = 9*Cin, f32 accumulation held in a local value
    # (single store, no scratch read-modify-write).
    acc = jnp.dot(patches, w_ref[...], preferred_element_type=jnp.float32)
    y = jnp.maximum(acc + b_ref[...], 0.0)                  # (TH*W, TC) f32

    conv_ref = out_refs[0]
    conv_ref[0] = y.reshape(th, tw, tc).astype(conv_ref.dtype)

    if pool is not None:
        pool_ref = out_refs[1]
        yw = y.reshape(th // 2, 2, tw // 2, 2, tc)
        if pool == "max":
            p = jnp.max(jnp.max(yw, axis=3), axis=1)
        else:  # 'avg'
            p = jnp.sum(jnp.sum(yw, axis=3), axis=1) * 0.25
        pool_ref[0] = p.astype(pool_ref.dtype)


def conv3x3_relu(x, w2d, b, *, pool=None):
    """x: (N, H, W, Cin) bf16; w2d: (9*Cin, Cout) bf16; b: (Cout,) f32.

    Returns the conv+ReLU output (bf16, NHWC). If `pool` is 'max' or 'avg',
    also returns the fused 2x2 stride-2 pooled output."""
    assert pool in (None, "max", "avg")
    n, h, wd, cin = x.shape
    cout = w2d.shape[-1]
    assert w2d.shape[0] == 9 * cin
    if pool is not None:
        assert h % 2 == 0 and wd % 2 == 0

    tc = min(cout, 256)                     # lane-dense Cout tile
    assert cout % tc == 0
    budget = _vmem_budget_bytes()
    th = _choose_row_tile(h, wd, cin, tc, budget, need_even=pool is not None)
    assert h % th == 0
    r = h // th

    # Build overlapping haloed row tiles host-side: (N, R, TH+2, W+2, Cin).
    # TODO(synk): replace with pl.Element-indexed halo BlockSpecs to avoid this
    # host-side halo/pad materialization (one extra activation copy per layer).
    xp = jnp.pad(x, ((0, 0), (1, 1), (1, 1), (0, 0)))
    if r == 1:
        xt = xp[:, None]
    else:
        xt = jnp.stack([xp[:, i * th:i * th + th + 2] for i in range(r)], axis=1)

    b2 = b.reshape(1, cout).astype(jnp.float32)

    grid = (n, r, cout // tc)
    in_specs = [
        pl.BlockSpec((1, 1, th + 2, wd + 2, cin), lambda i, j, k: (i, j, 0, 0, 0)),
        pl.BlockSpec((9 * cin, tc), lambda i, j, k: (0, k)),
        pl.BlockSpec((1, tc), lambda i, j, k: (0, k)),
    ]
    out_shapes = [jax.ShapeDtypeStruct((n, h, wd, cout), jnp.bfloat16)]
    out_specs = [pl.BlockSpec((1, th, wd, tc), lambda i, j, k: (i, j, 0, k))]
    if pool is not None:
        out_shapes.append(
            jax.ShapeDtypeStruct((n, h // 2, wd // 2, cout), jnp.bfloat16))
        out_specs.append(
            pl.BlockSpec((1, th // 2, wd // 2, tc), lambda i, j, k: (i, j, 0, k)))

    outs = pl.pallas_call(
        functools.partial(_conv3x3_kernel, pool=pool),
        out_shape=tuple(out_shapes),
        grid_spec=pltpu.PrefetchScalarGridSpec(
            num_scalar_prefetch=0,
            grid=grid,
            in_specs=in_specs,
            out_specs=tuple(out_specs),
        ),
        compiler_params=pltpu.CompilerParams(
            dimension_semantics=("parallel", "parallel", "parallel"),
            vmem_limit_bytes=budget,
        ),
    )(xt, w2d, b2)

    if pool is None:
        return outs[0]
    return outs[0], outs[1]


# ----------------------------------------------------------------------------
# VGG module (forward pass only)
# ----------------------------------------------------------------------------
class VGGPallas:
    LAYERS = {
        "conv1_1": (3, 64), "conv1_2": (64, 64),
        "conv2_1": (64, 128), "conv2_2": (128, 128),
        "conv3_1": (128, 256), "conv3_2": (256, 256),
        "conv3_3": (256, 256), "conv3_4": (256, 256),
        "conv4_1": (256, 512), "conv4_2": (512, 512),
        "conv4_3": (512, 512), "conv4_4": (512, 512),
        "conv5_1": (512, 512), "conv5_2": (512, 512),
        "conv5_3": (512, 512), "conv5_4": (512, 512),
    }

    def __init__(self, key, pool="max"):
        assert pool in ("max", "avg")
        self.pool = pool
        self.params = {}       # name -> (w (9*Cin, Cout) bf16, b (Cout,) f32)
        self.params_ref = {}   # name -> (w (3,3,Cin,Cout) f32, b f32) for checks
        for name, (cin, cout) in self.LAYERS.items():
            key, wk, bk = jax.random.split(key, 3)
            scale = 1.0 / (3.0 * (cin ** 0.5))
            w = jax.random.normal(wk, (3, 3, cin, cout), jnp.float32) * scale
            b = jax.random.normal(bk, (cout,), jnp.float32) * 0.01
            self.params_ref[name] = (w, b)
            self.params[name] = (w.astype(jnp.bfloat16).reshape(9 * cin, cout), b)

    def _conv(self, name, x, fuse_pool=False):
        w2d, b = self.params[name]
        return conv3x3_relu(x, w2d, b, pool=self.pool if fuse_pool else None)

    def forward(self, x_nchw, out_keys):
        x = jnp.transpose(x_nchw, (0, 2, 3, 1)).astype(jnp.bfloat16)  # NCHW->NHWC
        out = {}
        out["r11"] = self._conv("conv1_1", x)
        out["r12"], out["p1"] = self._conv("conv1_2", out["r11"], fuse_pool=True)
        out["r21"] = self._conv("conv2_1", out["p1"])
        out["r22"], out["p2"] = self._conv("conv2_2", out["r21"], fuse_pool=True)
        out["r31"] = self._conv("conv3_1", out["p2"])
        out["r32"] = self._conv("conv3_2", out["r31"])
        out["r33"] = self._conv("conv3_3", out["r32"])
        out["r34"], out["p3"] = self._conv("conv3_4", out["r33"], fuse_pool=True)
        out["r41"] = self._conv("conv4_1", out["p3"])
        out["r42"] = self._conv("conv4_2", out["r41"])
        out["r43"] = self._conv("conv4_3", out["r42"])
        out["r44"], out["p4"] = self._conv("conv4_4", out["r43"], fuse_pool=True)
        out["r51"] = self._conv("conv5_1", out["p4"])
        out["r52"] = self._conv("conv5_2", out["r51"])
        out["r53"] = self._conv("conv5_3", out["r52"])
        out["r54"], out["p5"] = self._conv("conv5_4", out["r53"], fuse_pool=True)
        # Back to NCHW f32 to match the PyTorch output convention.
        return [jnp.transpose(out[k], (0, 3, 1, 2)).astype(jnp.float32)
                for k in out_keys]


# ----------------------------------------------------------------------------
# Pure-JAX reference (mirrors the kernel's bf16 inputs / f32 accumulation)
# ----------------------------------------------------------------------------
def _ref_conv_relu(x_nhwc, w, b):
    xb = x_nhwc.astype(jnp.bfloat16).astype(jnp.float32)
    wb = w.astype(jnp.bfloat16).astype(jnp.float32)
    y = lax.conv_general_dilated(
        xb, wb, window_strides=(1, 1), padding="SAME",
        dimension_numbers=("NHWC", "HWIO", "NHWC"))
    return jnp.maximum(y + b, 0.0)


def _ref_maxpool(x_nhwc):
    return lax.reduce_window(
        x_nhwc, -jnp.inf, lax.max,
        window_dimensions=(1, 2, 2, 1), window_strides=(1, 2, 2, 1),
        padding="VALID")


if __name__ == "__main__":
    key = jax.random.PRNGKey(0)
    kp, kx = jax.random.split(key)
    model = VGGPallas(kp, pool="max")

    # NCHW input like PyTorch; spatial 32 so all 5 pools are valid (32 -> 1).
    x = jax.random.normal(kx, (2, 3, 32, 32), jnp.float32)

    out_keys = ["r11", "r12", "p1", "r31", "r42", "r54", "p5"]
    outs = model.forward(x, out_keys)
    outs = [jax.block_until_ready(o) for o in outs]

    expected = {
        "r11": (2, 64, 32, 32), "r12": (2, 64, 32, 32), "p1": (2, 64, 16, 16),
        "r31": (2, 256, 8, 8), "r42": (2, 512, 4, 4), "r54": (2, 512, 2, 2),
        "p5": (2, 512, 1, 1),
    }
    for k, o in zip(out_keys, outs):
        assert o.shape == expected[k], (k, o.shape, expected[k])
        assert bool(jnp.all(jnp.isfinite(o))), k

    # Numerical sanity check of the first block against pure JAX.
    x_nhwc = jnp.transpose(x, (0, 2, 3, 1))
    w11, b11 = model.params_ref["conv1_1"]
    w12, b12 = model.params_ref["conv1_2"]
    r11_ref = _ref_conv_relu(x_nhwc, w11, b11)
    r12_ref = _ref_conv_relu(r11_ref, w12, b12)
    p1_ref = _ref_maxpool(r12_ref)
    r11_got = jnp.transpose(outs[0], (0, 2, 3, 1))
    r12_got = jnp.transpose(outs[1], (0, 2, 3, 1))
    p1_got = jnp.transpose(outs[2], (0, 2, 3, 1))
    assert bool(jnp.allclose(r11_got, r11_ref, atol=5e-2, rtol=5e-2))
    assert bool(jnp.allclose(r12_got, r12_ref, atol=5e-2, rtol=5e-2))
    assert bool(jnp.allclose(p1_got, p1_ref, atol=5e-2, rtol=5e-2))

    print("KERNEL_OK")
</pallas_src>

<mosaic_0001>
module attributes {stable_mosaic.version = 11 : i64} {
  func.func @_conv3x3_kernel(%arg0: i32, %arg1: i32, %arg2: i32, %arg3: memref<1x1x18x34x3xbf16, #tpu.memory_space<vmem>>, %arg4: memref<27x64xbf16, #tpu.memory_space<vmem>>, %arg5: memref<1x64xf32, #tpu.memory_space<vmem>>, %arg6: memref<1x16x32x64xbf16, #tpu.memory_space<vmem>>) attributes {dimension_semantics = [#tpu.dimension_semantics<parallel>, #tpu.dimension_semantics<parallel>, #tpu.dimension_semantics<parallel>], iteration_bounds = array<i64: 2, 2, 1>, scalar_prefetch = 0 : i64, scratch_operands = 0 : i64, tpu.core_type = #tpu.core_type<tc>, window_params = [{transform_indices = @transform_0, window_bounds = array<i64: 1, 1, 18, 34, 3>}, {transform_indices = @transform_1, window_bounds = array<i64: 27, 64>}, {transform_indices = @transform_2, window_bounds = array<i64: 1, 64>}, {transform_indices = @transform_3, window_bounds = array<i64: 1, 16, 32, 64>}]} {
    %c0 = arith.constant 0 : index
    %c0_0 = arith.constant 0 : index
    %c0_1 = arith.constant 0 : index
    %c0_2 = arith.constant 0 : index
    %c0_3 = arith.constant 0 : index
    %0 = vector.load %arg3[%c0, %c0_0, %c0_1, %c0_2, %c0_3] : memref<1x1x18x34x3xbf16, #tpu.memory_space<vmem>>, vector<1x1x18x34x3xbf16>
    %1 = vector.shape_cast %0 : vector<1x1x18x34x3xbf16> to vector<18x34x3xbf16>
    %2 = vector.extract_strided_slice %1 {offsets = [0, 0, 0], sizes = [16, 32, 3], strides = [1, 1, 1]} : vector<18x34x3xbf16> to vector<16x32x3xbf16>
    %3 = vector.extract_strided_slice %1 {offsets = [0, 1, 0], sizes = [16, 32, 3], strides = [1, 1, 1]} : vector<18x34x3xbf16> to vector<16x32x3xbf16>
    %4 = vector.extract_strided_slice %1 {offsets = [0, 2, 0], sizes = [16, 32, 3], strides = [1, 1, 1]} : vector<18x34x3xbf16> to vector<16x32x3xbf16>
    %5 = vector.extract_strided_slice %1 {offsets = [1, 0, 0], sizes = [16, 32, 3], strides = [1, 1, 1]} : vector<18x34x3xbf16> to vector<16x32x3xbf16>
    %6 = vector.extract_strided_slice %1 {offsets = [1, 1, 0], sizes = [16, 32, 3], strides = [1, 1, 1]} : vector<18x34x3xbf16> to vector<16x32x3xbf16>
    %7 = vector.extract_strided_slice %1 {offsets = [1, 2, 0], sizes = [16, 32, 3], strides = [1, 1, 1]} : vector<18x34x3xbf16> to vector<16x32x3xbf16>
    %8 = vector.extract_strided_slice %1 {offsets = [2, 0, 0], sizes = [16, 32, 3], strides = [1, 1, 1]} : vector<18x34x3xbf16> to vector<16x32x3xbf16>
    %9 = vector.extract_strided_slice %1 {offsets = [2, 1, 0], sizes = [16, 32, 3], strides = [1, 1, 1]} : vector<18x34x3xbf16> to vector<16x32x3xbf16>
    %10 = vector.extract_strided_slice %1 {offsets = [2, 2, 0], sizes = [16, 32, 3], strides = [1, 1, 1]} : vector<18x34x3xbf16> to vector<16x32x3xbf16>
    %11 = tpu.concatenate %2, %3, %4, %5, %6, %7, %8, %9, %10 in 2 : vector<16x32x3xbf16>, vector<16x32x3xbf16>, vector<16x32x3xbf16>, vector<16x32x3xbf16>, vector<16x32x3xbf16>, vector<16x32x3xbf16>, vector<16x32x3xbf16>, vector<16x32x3xbf16>, vector<16x32x3xbf16> -> vector<16x32x27xbf16>
    %12 = vector.shape_cast %11 : vector<16x32x27xbf16> to vector<512x27xbf16>
    %c0_4 = arith.constant 0 : index
    %c0_5 = arith.constant 0 : index
    %13 = vector.load %arg4[%c0_4, %c0_5] : memref<27x64xbf16, #tpu.memory_space<vmem>>, vector<27x64xbf16>
    %cst = arith.constant dense<0.000000e+00> : vector<512x64xf32>
    %14 = tpu.matmul %12, %13, %cst {dimension_numbers = #tpu.dot_dimension_numbers<[1], [0], [0], [1], [0, 0, 1, 1], [], []>} : vector<512x27xbf16>, vector<27x64xbf16>, vector<512x64xf32> -> vector<512x64xf32>
    %c0_6 = arith.constant 0 : index
    %c0_7 = arith.constant 0 : index
    %15 = vector.load %arg5[%c0_6, %c0_7] : memref<1x64xf32, #tpu.memory_space<vmem>>, vector<1x64xf32>
    %16 = vector.broadcast %15 : vector<1x64xf32> to vector<512x64xf32>
    %17 = arith.addf %14, %16 : vector<512x64xf32>
    %cst_8 = arith.constant 0.000000e+00 : f32
    %18 = vector.broadcast %cst_8 : f32 to vector<512x64xf32>
    %19 = arith.maximumf %17, %18 : vector<512x64xf32>
    %20 = vector.shape_cast %19 : vector<512x64xf32> to vector<16x32x64xf32>
    %21 = arith.truncf %20 : vector<16x32x64xf32> to vector<16x32x64xbf16>
    %c0_9 = arith.constant 0 : index
    %c0_10 = arith.constant 0 : index
    %c0_11 = arith.constant 0 : index
    %c0_12 = arith.constant 0 : index
    %22 = vector.load %arg6[%c0_9, %c0_10, %c0_11, %c0_12] : memref<1x16x32x64xbf16, #tpu.memory_space<vmem>>, vector<1x16x32x64xbf16>
    %23 = vector.shape_cast %22 : vector<1x16x32x64xbf16> to vector<16x32x64xbf16>
    %24 = vector.shape_cast %21 : vector<16x32x64xbf16> to vector<1x16x32x64xbf16>
    tpu.vector_store %arg6[%c0_9, %c0_10, %c0_11, %c0_12], %24 {strides = array<i32>} : memref<1x16x32x64xbf16, #tpu.memory_space<vmem>>, vector<1x16x32x64xbf16>,
    return
  }
  func.func @transform_0(%arg0: i32, %arg1: i32, %arg2: i32) -> (i32, i32, i32, i32, i32) {
    %c0_i32 = arith.constant 0 : i32
    %c0_i32_0 = arith.constant 0 : i32
    %c0_i32_1 = arith.constant 0 : i32
    %c0_i32_2 = arith.constant 0 : i32
    return %arg0, %arg1, %c0_i32, %c0_i32_0, %c0_i32_1 : i32, i32, i32, i32, i32
  }
  func.func @transform_1(%arg0: i32, %arg1: i32, %arg2: i32) -> (i32, i32) {
    %c0_i32 = arith.constant 0 : i32
    %c0_i32_0 = arith.constant 0 : i32
    return %c0_i32, %arg2 : i32, i32
  }
  func.func @transform_2(%arg0: i32, %arg1: i32, %arg2: i32) -> (i32, i32) {
    %c0_i32 = arith.constant 0 : i32
    %c0_i32_0 = arith.constant 0 : i32
    return %c0_i32, %arg2 : i32, i32
  }
  func.func @transform_3(%arg0: i32, %arg1: i32, %arg2: i32) -> (i32, i32, i32, i32) {
    %c0_i32 = arith.constant 0 : i32
    %c0_i32_0 = arith.constant 0 : i32
    return %arg0, %arg1, %c0_i32, %arg2 : i32, i32, i32, i32
  }
}

</mosaic_0001>

<bundles_post_ra>
// kernel: tpu_custom_call.1
= control target key start
LH: loop header
LB: loop body
LE: loop exit
PB: predicated region body
PF: predicated region fallthrough
CT: control target
= control target key end

     0   :  { %8 = vsyncpa [#allocation3], 0  ;;  %s5327_s0 = inlined_call_operand.vmem [shape: bf16[2,2,18,34,3], index: 0, kind: input, shape index: {}]   ;;  %s5328_s1 = inlined_call_operand.vmem [shape: bf16[27,64], index: 1, kind: input, shape index: {}]   ;;  %s5329_s2 = inlined_call_operand.vmem [shape: f32[1,64], index: 2, kind: input, shape index: {}]   ;;  %s5330_s3 = inlined_call_operand.hbm [shape: bf16[2,32,32,64], index: 3, kind: output, shape index: {}]  }
   0x1   :  { %10 = vsyncpa [#allocation3 + $0x1], 0  ;;  %s3128_s12 = smov 0   ;;  %s3130_s13 = smov 0  }
   0x2   :  { %s3132_s14 = smov 0   ;;  %s3134_s15 = smov 0  }
   0x3   :  { %s3136_s16 = smov 0   ;;  %s3138_s17 = smov 0  }
   0x4   :  { %s3140_s18 = smov 0   ;;  %s3142_s19 = smov 0  }
   0x5 LB: > { %s2636_s20 = sadd.s32 4294967295, %s3095_s19   ;;  %s2637_s21 = sadd.s32 4294967294, %s3095_s19   ;;  %s3095_s19 = sphi %s3142_s19, %s16_s19   ;;  %s3091_s18 = sphi %s3140_s18, %s5757_s18   ;;  %s3087_s17 = sphi %s3138_s17, %s5756_s17   ;;  %s3083_s16 = sphi %s3136_s16, %s5755_s16   ;;  %s3079_s15 = sphi %s3134_s15, %s5754_s15   ;;  %s3075_s14 = sphi %s3132_s14, %s5753_s14   ;;  %s3071_s13 = sphi %s3130_s13, %s5752_s13   ;;  %s3067_s12 = sphi %s3128_s12, %s5751_s12  }
   0x6   : > { %s31_s22 = sadd.s32 1, %s3087_s17  ;;  %s35_s23 = sadd.s32 1, %s3091_s18 }
   0x7   : > { %p33_p0 = scmp.ge.s32.totalorder %s31_s22, 2  ;;  %p136_p1 = scmp.ne.s32.totalorder %s3075_s14, %s3071_s13 }
   0x8   : > { %p137_p2 = scmp.eq.s32.totalorder %s2636_s20, 3  ;;  %p142_p5 = scmp.ne.s32.totalorder %s3071_s13, %s3067_s12 }
   0x9   : > { %s5759_s22 = smov (%p33_p0, %s31_s22), 0  ;;  %s5761_s23 = smov (!%p33_p0, %s35_s23), %s3091_s18 }
   0xa   : > { %s120_s24 = ssub.s32 %s3087_s17, %s5759_s22  ;;  %p3179_p3 = por %p137_p2, %p136_p1 }
   0xb   : > { %p37_p4 = scmp.ge.s32.totalorder %s5761_s23, 2  ;;  %p143_p6 = scmp.eq.s32.totalorder %s2637_s21, 3 }
   0xc   : > { %p2642_p7 = scmp.ge.s32.totalorder %s3095_s19, 1  ;;  %p186_p9 = scmp.lt.s32.totalorder %s3095_s19, 5 }
   0xd   : > { %s5763_s23 = smov (%p37_p4, %s5761_s23), 0  ;;  %p3188_p8 = por %p143_p6, %p142_p5 }
   0xe   : > { %s119_s27 = ssub.s32 %s3091_s18, %s5763_s23  ;;  %s126_s28 = sadd.s32 1, %s3075_s14 }
   0xf   : > { %s121_s29 = sor.u32 %s120_s24, %s119_s27  ;;  %p187_p10 = pnand %p2642_p7, %p186_p9 }
  0x10   : > { %p124_p11 = scmp.eq.s32.totalorder %s121_s29, 0 }
  0x11   : > { %190 = sbr.rel (%p187_p10) target bundleno = 982 (0x3d6), region = 32 }
  0x12   : > { %s3197_s30 = scalar_select %p124_p11, %s3075_s14, %s126_s28  }
  0x16   : > { %p221_p12 = scmp.lt.s32.totalorder %s3083_s16, 1  ;;  %p223_p13 = scmp.lt.s32.totalorder %s3079_s15, 1  ;;  %vm537_vm0 = vsmask.f32 7424  ;;  %vm922_vm1 = vcmask 1046528   ;;  %vm1527_vm2 = vcmask 23552  }
  0x17   : > { %s3097_s21 = smov 3   ;;  %s3098_s24 = smov 6   ;;  %vm1592_vm3 = vcmask 48128   ;;  %vm1657_vm4 = vcmask 72704   ;;  %vm1722_vm5 = vcmask 97280   ;;  %vm1787_vm6 = vcmask 121856  }
  0x18   : > { %s222_s4 = scalar_select %p221_p12, %s3083_s16, 1  ;;  %vm2131_vm7 = vcmask 1044480   ;;  %vm2132_vm8 = vcmask 1045504   ;;  %vm1852_vm9 = vcmask 146432   ;;  %vm1917_vm10 = vcmask 171008  }
  0x19   : > { %s224_s5 = scalar_select %p223_p13, %s3079_s15, 1  ;;  %vm1982_vm11 = vcmask 195584   ;;  %vm2066_vm12 = vcmask 220160   ;;  %vm2435_vm13 = vcmask 519168  }
  0x1a   : > { %s2882_s6 = smul.u32 180, %s222_s4  ;;  %s3099_s27 = smov 9  }
  0x1b   : > { %s2881_s7 = smul.u32 90, %s224_s5  ;;  %s3100_s28 = smov 12  }
  0x1c   : > { %s3101_s29 = smov 15   ;;  %s3102_s4 = smov 21  }
  0x1d   : > { %s227_s8 = sadd.s32 %s2882_s6, %s2881_s7  ;;  %s3103_s5 = smov 18  }
  0x1e   : > { %s2644_s9 = sshll.u32 %s227_s8, 2  ;;  %s3104_s6 = smov 24  }
  0x1f   : > { %s3206_s20 = scalar_lea.vmem %s5327_s0, %s2644_s9 }
  0x20   : > { %v3209_v0 = vld [vmem:[%s3206_s20 + $0x28] sm:$0xff]  ;;  %v3212_v1 = vld [vmem:[%s3206_s20 + $0x30] sm:$0xff]  ;;  %v3218_v3 = vld [vmem:[%s3206_s20 + $0x1c] sm:$0xff] }
  0x21   : > { %v3215_v2 = vld [vmem:[%s3206_s20 + $0x14] sm:$0xff]  ;;  %v3221_v4 = vld [vmem:[%s3206_s20] sm:$0xff]  ;;  %v3224_v5 = vld [vmem:[%s3206_s20 + $0x8] sm:$0xff]  ;;  %v579_v6 = vshrl.u32 %v3209_v0, 16  ;;  %v581_v7 = vshll.u32 %v3209_v0, 16  ;;  %v586_v8 = vshll.u32 %v3212_v1, 16 }
  0x22   : > { %v559_v9 = vshrl.u32 %v3215_v2, 16  ;;  %v253_v10 = vld [vmem:[%s3206_s20 + $0x38] sm:$0x1]  ;;  %v561_v11 = vshll.u32 %v3215_v2, 16  ;;  %v566_v12 = vshll.u32 %v3218_v3, 16  ;;  %v539_v13 = vshrl.u32 %v3221_v4, 16 }
  0x23   : > { %v541_v14 = vshll.u32 %v3221_v4, 16  ;;  %v248_v15 = vld [vmem:[%s3206_s20 + $0x24] sm:$0x1]  ;;  %v583_v16 = vrot.slane %v581_v7, 1  ;;  %v588_v17 = vrot.slane %v586_v8, 1  ;;  %v546_v18 = vshll.u32 %v3224_v5, 16 }
  0x24   : > { %v507_v19 = vunpack.c.l.b16 %v253_v10  ;;  %v563_v20 = vrot.slane %v561_v11, 1  ;;  %v568_v21 = vrot.slane %v566_v12, 1  ;;  %v590_v23 = vshrl.u32 %v3212_v1, 16  ;;  %v243_v24 = vld [vmem:[%s3206_s20 + $0x10] sm:$0x1]  ;;  %v3252_v37 = vld [vmem:[%s3206_s20 + $0x58] sm:$0xff] }
  0x25   : > { %v543_v22 = vrot.slane %v541_v14, 1  ;;  %v584_v25 = vor.u32 %v583_v16, %v579_v6  ;;  %v548_v26 = vrot.slane %v546_v18, 1  ;;  %v506_v28 = vunpack.c.l.b16 %v248_v15  ;;  %v3243_v32 = vld [vmem:[%s3206_s20 + $0x50] sm:$0xff]  ;;  %v3255_v38 = vld [vmem:[%s3206_s20 + $0x44] sm:$0xff]  ;;  %v258_v39 = vld [vmem:[%s3206_s20 + $0x4c] sm:$0x1] }
  0x26   : > { %v3239_v27 = vpack.c.b16 %v507_v19, %v507_v19  ;;  %v564_v29 = vor.u32 %v563_v20, %v559_v9  ;;  %v570_v31 = vshrl.u32 %v3218_v3, 16  ;;  %v505_v36 = vunpack.c.l.b16 %v243_v24  ;;  %v3273_v51 = vld [vmem:[%s3206_s20 + $0x3c] sm:$0xff]  ;;  %v268_v56 = vld [vmem:[%s3206_s20 + $0x74] sm:$0x1]  ;;  %v3286_v61 = vld [vmem:[%s3206_s20 + $0x6c] sm:$0xff] }
  0x27   : > { %v544_v30 = vor.u32 %v543_v22, %v539_v13  ;;  %v3246_v33 = vsel %vm537_vm0, %v584_v25, %v588_v17  ;;  %v3249_v35 = vpack.c.b16 %v506_v28, %v506_v28  ;;  %v592_v42 = vor.u32 %v590_v23, %v588_v17  ;;  %v3293_v8 = vld [vmem:[%s3206_s20 + $0x64] sm:$0xff]  ;;  %v263_v13 = vld [vmem:[%s3206_s20 + $0x60] sm:$0x1] }
  0x28   : > { %5430 = vst [vmem:[#allocation5_spill] sm:$0xff] %v3246_v33  ;;  %v594_v34 = vshll.u32 %v3239_v27, 16  ;;  %866 = vrot.lane.b32.xlu2 %v3246_v33, %s3097_s21  ;;  %v3261_v40 = vsel %vm537_vm0, %v564_v29, %v568_v21  ;;  %v550_v43 = vshrl.u32 %v3224_v5, 16  ;;  %v572_v45 = vor.u32 %v570_v31, %v568_v21  ;;  %v3315_v31 = vld [vmem:[%s3206_s20 + $0x8c] sm:$0xff] }
  0x29   : > { %5431 = vst [vmem:[#allocation6_spill] sm:$0xff] %v3261_v40  ;;  %v549_v41 = vsel %vm537_vm0, %v544_v30, %v548_v26  ;;  %862 = vrot.lane.b32.xlu1 %v3261_v40, %s3097_s21  ;;  %v574_v46 = vshll.u32 %v3249_v35, 16  ;;  %v3269_v47 = vpack.c.b16 %v505_v36, %v505_v36  ;;  %v621_v49 = vshll.u32 %v3243_v32, 16 }
  0x2a   : > { %858 = vrot.lane.b32.xlu0 %v549_v41, %s3097_s21  ;;  %v596_v44 = vrot.slane %v594_v34, 1  ;;  %v552_v48 = vor.u32 %v550_v43, %v548_v26  ;;  %v508_v50 = vunpack.c.l.b16 %v258_v39  ;;  %v626_v54 = vshll.u32 %v3252_v37, 16  ;;  %v273_v26 = vld [vmem:[%s3206_s20 + $0x88] sm:$0x1] }
  0x2b   : > { %v576_v52 = vrot.slane %v574_v46, 1  ;;  %v554_v53 = vshll.u32 %v3269_v47, 16  ;;  %v606_v55 = vshll.u32 %v3255_v38, 16  ;;  %v619_v58 = vshrl.u32 %v3243_v32, 16 }
  0x2c   : > { %v3280_v57 = vsel %vm537_vm0, %v592_v42, %v596_v44  ;;  %v623_v59 = vrot.slane %v621_v49, 1  ;;  %v3283_v60 = vpack.c.b16 %v508_v50, %v508_v50  ;;  %v610_v7 = vshrl.u32 %v3255_v38, 16  ;;  %v3325_v42 = vld [vmem:[%s3206_s20 + $0x80] sm:$0xff] }
  0x2d   : > { %5432 = vst [vmem:[#allocation7_spill] sm:$0xff] %v3280_v57  ;;  %v3289_v62 = vsel %vm537_vm0, %v572_v45, %v576_v52  ;;  %v556_v63 = vrot.slane %v554_v53, 1  ;;  %v608_v6 = vrot.slane %v606_v55, 1  ;;  %v599_v10 = vshrl.u32 %v3273_v51, 16  ;;  %v3338_v52 = vld [vmem:[%s3206_s20 + $0x94] sm:$0xff] }
  0x2e   : > { %5433 = vst [vmem:[#allocation8_spill] sm:$0xff] %v3289_v62  ;;  %v614_v9 = vshll.u32 %v3283_v60, 16  ;;  %v601_v11 = vshll.u32 %v3273_v51, 16  ;;  %v510_v12 = vunpack.c.l.b16 %v268_v56  ;;  %v628_v15 = vrot.slane %v626_v54, 1  ;;  %v283_v56 = vld [vmem:[%s3206_s20 + $0xb0] sm:$0x1] }
  0x2f   : > { %v557_v14 = vsel %vm537_vm0, %v552_v48, %v556_v63  ;;  %v624_v16 = vor.u32 %v623_v59, %v619_v58  ;;  %v646_v19 = vshll.u32 %v3286_v61, 16  ;;  %v612_v20 = vor.u32 %v610_v7, %v608_v6  ;;  %v3333_v48 = vld [vmem:[%s3206_s20 + $0x78] sm:$0xff] }
  0x30   : > { %868 = vrot.lane.b32.xlu2 %v3280_v57, %s3097_s21  ;;  %v603_v17 = vrot.slane %v601_v11, 1  ;;  %v3302_v18 = vpack.c.b16 %v510_v12, %v510_v12  ;;  %v616_v21 = vrot.slane %v614_v9, 1  ;;  %v641_v22 = vshll.u32 %v3293_v8, 16  ;;  %v278_v9 = vld [vmem:[%s3206_s20 + $0x9c] sm:$0x1] }
  0x31   : > { %864 = vrot.lane.b32.xlu1 %v3289_v62, %s3097_s21  ;;  %v509_v23 = vunpack.c.l.b16 %v263_v13  ;;  %v648_v28 = vrot.slane %v646_v19, 1  ;;  %v650_v29 = vshrl.u32 %v3286_v61, 16  ;;  %v3318_v34 = vsel %vm537_vm0, %v624_v16, %v628_v15  ;;  %v3357_v13 = vld [vmem:[%s3206_s20 + $0xa8] sm:$0xff] }
  0x32   : > { %860 = vrot.lane.b32.xlu0 %v557_v14, %s3097_s21  ;;  %v604_v24 = vor.u32 %v603_v17, %v599_v10  ;;  %v654_v30 = vshll.u32 %v3302_v18, 16  ;;  %5434 = vst [vmem:[#allocation9_spill] sm:$0xff] %v3318_v34  ;;  %v3321_v36 = vsel %vm537_vm0, %v612_v20, %v616_v21  ;;  %v639_v39 = vshrl.u32 %v3293_v8, 16  ;;  %v3365_v20 = vld [vmem:[%s3206_s20 + $0xa0] sm:$0xff] }
  0x33   : > { %v3309_v25 = vpack.c.b16 %v509_v23, %v509_v23  ;;  %5435 = vst [vmem:[#allocation10_spill] sm:$0xff] %v3321_v36  ;;  %v643_v41 = vrot.slane %v641_v22, 1  ;;  %v630_v44 = vshrl.u32 %v3252_v37, 16  ;;  %v511_v46 = vunpack.c.l.b16 %v273_v26 }
  0x34   : > { %v3328_v43 = vsel %vm537_vm0, %v604_v24, %v608_v6  ;;  %v652_v49 = vor.u32 %v650_v29, %v648_v28  ;;  %v656_v50 = vrot.slane %v654_v30, 1  ;;  %v681_v53 = vshll.u32 %v3315_v31, 16 }
  0x35   : > { %5436 = vst [vmem:[#allocation11_spill] sm:$0xff] %v3328_v43  ;;  %v634_v45 = vshll.u32 %v3309_v25, 16  ;;  %v644_v54 = vor.u32 %v643_v41, %v639_v39  ;;  %v666_v55 = vshll.u32 %v3325_v42, 16  ;;  %v632_v58 = vor.u32 %v630_v44, %v628_v15 }
  0x36   : > { %v3347_v63 = vpack.c.b16 %v511_v46, %v511_v46  ;;  %v661_v6 = vshll.u32 %v3333_v48, 16  ;;  %v679_v7 = vshrl.u32 %v3315_v31, 16  ;;  %v3353_v10 = vsel %vm537_vm0, %v652_v49, %v656_v50  ;;  %v288_v49 = vld [vmem:[%s3206_s20 + $0xc4] sm:$0x1] }
  0x37   : > { %v636_v59 = vrot.slane %v634_v45, 1  ;;  %5437 = vst [vmem:[#allocation12_spill] sm:$0xff] %v3353_v10  ;;  %v683_v11 = vrot.slane %v681_v53, 1  ;;  %v686_v12 = vshll.u32 %v3338_v52, 16  ;;  %v513_v14 = vunpack.c.l.b16 %v283_v56 }
  0x38   : > { %874 = vrot.lane.b32.xlu2 %v3318_v34, %s3097_s21  ;;  %v3360_v16 = vsel %vm537_vm0, %v644_v54, %v648_v28  ;;  %v668_v15 = vrot.slane %v666_v55, 1  ;;  %v670_v17 = vshrl.u32 %v3325_v42, 16  ;;  %v659_v19 = vshrl.u32 %v3333_v48, 16 }
  0x39   : > { %872 = vrot.lane.b32.xlu1 %v3321_v36, %s3097_s21  ;;  %5438 = vst [vmem:[#allocation13_spill] sm:$0xff] %v3360_v16  ;;  %v3368_v21 = vsel %vm537_vm0, %v632_v58, %v636_v59  ;;  %v674_v22 = vshll.u32 %v3347_v63, 16  ;;  %v663_v23 = vrot.slane %v661_v6, 1  ;;  %v512_v24 = vunpack.c.l.b16 %v278_v9  ;;  %v3392_v6 = vld [vmem:[%s3206_s20 + $0xc8] sm:$0xff]  ;;  %v308_v36 = vld [vmem:[%s3206_s20 + $0x114] sm:$0x1] }
  0x3a   : > { %870 = vrot.lane.b32.xlu0 %v3328_v43, %s3097_s21  ;;  %5439 = vst [vmem:[#allocation14_spill] sm:$0xff] %v3368_v21  ;;  %v3373_v26 = vpack.c.b16 %v513_v14, %v513_v14  ;;  %v706_v28 = vshll.u32 %v3357_v13, 16  ;;  %v684_v29 = vor.u32 %v683_v11, %v679_v7  ;;  %v688_v30 = vrot.slane %v686_v12, 1  ;;  %v3395_v7 = vld [vmem:[%s3206_s20 + $0xbc] sm:$0xff] }
  0x3b   : > { %v701_v39 = vshll.u32 %v3365_v20, 16  ;;  %v672_v41 = vor.u32 %v670_v17, %v668_v15  ;;  %v676_v44 = vrot.slane %v674_v22, 1  ;;  %v664_v45 = vor.u32 %v663_v23, %v659_v19  ;;  %v3405_v17 = vld [vmem:[%s3206_s20 + $0xb4] sm:$0xff] }
  0x3c   : > { %v3381_v46 = vpack.c.b16 %v512_v24, %v512_v24  ;;  %v708_v50 = vrot.slane %v706_v28, 1  ;;  %v710_v53 = vshrl.u32 %v3357_v13, 16  ;;  %v714_v54 = vshll.u32 %v3373_v26, 16  ;;  %v3410_v23 = vld [vmem:[%s3206_s20 + $0xd0] sm:$0xff] }
  0x3d   : > { %v3387_v55 = vsel %vm537_vm0, %v684_v29, %v688_v30  ;;  %v699_v56 = vshrl.u32 %v3365_v20, 16  ;;  %v703_v58 = vrot.slane %v701_v39, 1  ;;  %v690_v59 = vshrl.u32 %v3338_v52, 16  ;;  %v298_v29 = vld [vmem:[%s3206_s20 + $0xec] sm:$0x1] }
  0x3e   : > { %5440 = vst [vmem:[#allocation15_spill] sm:$0xff] %v3387_v55  ;;  %v3398_v9 = vsel %vm537_vm0, %v672_v41, %v676_v44  ;;  %v3401_v11 = vsel %vm537_vm0, %v664_v45, %v668_v15  ;;  %v694_v12 = vshll.u32 %v3381_v46, 16  ;;  %v514_v14 = vunpack.c.l.b16 %v288_v49 }
  0x3f   : > { %5441 = vst [vmem:[#allocation16_spill] sm:$0xff] %v3398_v9  ;;  %v712_v19 = vor.u32 %v710_v53, %v708_v50  ;;  %v716_v22 = vrot.slane %v714_v54, 1  ;;  %v704_v15 = vor.u32 %v703_v58, %v699_v56  ;;  %v741_v24 = vshll.u32 %v3392_v6, 16  ;;  %v293_v53 = vld [vmem:[%s3206_s20 + $0xd8] sm:$0x1] }
  0x40   : > { %880 = vrot.lane.b32.xlu2 %v3353_v10, %s3097_s21  ;;  %5442 = vst [vmem:[#allocation17_spill] sm:$0xff] %v3401_v11  ;;  %v726_v28 = vshll.u32 %v3395_v7, 16  ;;  %v692_v39 = vor.u32 %v690_v59, %v688_v30  ;;  %v696_v41 = vrot.slane %v694_v12, 1  ;;  %v3419_v44 = vpack.c.b16 %v514_v14, %v514_v14 }
  0x41   : > { %878 = vrot.lane.b32.xlu1 %v3360_v16, %s3097_s21  ;;  %v721_v45 = vshll.u32 %v3405_v17, 16  ;;  %v739_v49 = vshrl.u32 %v3392_v6, 16  ;;  %v3425_v54 = vsel %vm537_vm0, %v712_v19, %v716_v22  ;;  %v746_v56 = vshll.u32 %v3410_v23, 16  ;;  %v3459_v16 = vld [vmem:[%s3206_s20 + $0x104] sm:$0xff] }
  0x42   : > { %876 = vrot.lane.b32.xlu0 %v3368_v21, %s3097_s21  ;;  %5443 = vst [vmem:[#allocation18_spill] sm:$0xff] %v3425_v54  ;;  %v730_v58 = vshrl.u32 %v3395_v7, 16  ;;  %v516_v10 = vunpack.c.l.b16 %v298_v29  ;;  %v3433_v30 = vsel %vm537_vm0, %v704_v15, %v708_v50  ;;  %v743_v59 = vrot.slane %v741_v24, 1 }
  0x43   : > { %5444 = vst [vmem:[#allocation19_spill] sm:$0xff] %v3433_v30  ;;  %v728_v12 = vrot.slane %v726_v28, 1  ;;  %v719_v14 = vshrl.u32 %v3405_v17, 16  ;;  %v734_v19 = vshll.u32 %v3419_v44, 16  ;;  %v723_v22 = vrot.slane %v721_v45, 1 }
  0x44   : > { %v515_v34 = vunpack.c.l.b16 %v293_v53  ;;  %v3445_v50 = vpack.c.b16 %v516_v10, %v516_v10  ;;  %v744_v24 = vor.u32 %v743_v59, %v739_v49  ;;  %v748_v28 = vrot.slane %v746_v56, 1  ;;  %v303_v10 = vld [vmem:[%s3206_s20 + $0x100] sm:$0x1]  ;;  %5446 = vst [vmem:[#allocation21_spill] sm:$0xff] %v3459_v16  ;;  %v3466_v59 = vld [vmem:[%s3206_s20 + $0xf8] sm:$0xff] }
  0x45   : > { %v724_v45 = vor.u32 %v723_v22, %v719_v14  ;;  %v517_v14 = vunpack.c.l.b16 %v303_v10  ;;  %v750_v22 = vshrl.u32 %v3410_v23, 16  ;;  %v3482_v10 = vld [vmem:[%s3206_s20 + $0x10c] sm:$0xff]  ;;  %v799_v43 = vshrl.u32 %v3459_v16, 16 }
  0x46   : > { %v3453_v53 = vpack.c.b16 %v515_v34, %v515_v34  ;;  %v3462_v49 = vsel %vm537_vm0, %v744_v24, %v748_v28  ;;  %v518_v33 = vunpack.c.l.b16 %v308_v36 }
  0x47   : > { %5447 = vst [vmem:[#allocation22_spill] sm:$0xff] %v3462_v49  ;;  %v752_v57 = vor.u32 %v750_v22, %v748_v28 }
  0x48   : > { %886 = vrot.lane.b32.xlu2 %v3387_v55, %s3097_s21  ;;  %v3430_v55 = vld [vmem:[%s3206_s20 + $0xe4] sm:$0xff] }
  0x49   : > { %884 = vrot.lane.b32.xlu1 %v3398_v9, %s3097_s21  ;;  %v3440_v9 = vsel %vm537_vm0, %v692_v39, %v696_v41  ;;  %v766_v15 = vshll.u32 %v3430_v55, 16  ;;  %v732_v39 = vor.u32 %v730_v58, %v728_v12  ;;  %v736_v41 = vrot.slane %v734_v19, 1 }
  0x4a   : > { %882 = vrot.lane.b32.xlu0 %v3401_v11, %s3097_s21  ;;  %v3437_v11 = vld [vmem:[%s3206_s20 + $0xdc] sm:$0xff]  ;;  %5445 = vst [vmem:[#allocation20_spill] sm:$0xff] %v3440_v9  ;;  %v770_v21 = vshrl.u32 %v3430_v55, 16  ;;  %v3472_v19 = vsel %vm537_vm0, %v724_v45, %v728_v12  ;;  %v786_v45 = vshll.u32 %v3466_v59, 16 }
  0x4b   : > { %v761_v29 = vshll.u32 %v3437_v11, 16  ;;  %v759_v56 = vshrl.u32 %v3437_v11, 16  ;;  %v3469_v34 = vsel %vm537_vm0, %v732_v39, %v736_v41  ;;  %5449 = vst [vmem:[#allocation24_spill] sm:$0xff] %v3472_v19  ;;  %v801_v39 = vshll.u32 %v3459_v16, 16 }
  0x4c   : > { %5448 = vst [vmem:[#allocation23_spill] sm:$0xff] %v3469_v34  ;;  %v3489_v41 = vpack.c.b16 %v517_v14, %v517_v14  ;;  %v788_v14 = vrot.slane %v786_v45, 1 }
  0x4d   : > { %v763_v58 = vrot.slane %v761_v29, 1 }
  0x4e   : > { %5450 = vst [vmem:[#allocation25_spill] sm:$0xff] %v3489_v41  ;;  %v794_v22 = vshll.u32 %v3489_v41, 16 }
  0x4f   : > { %v764_v12 = vor.u32 %v763_v58, %v759_v56  ;;  %v790_v56 = vshrl.u32 %v3466_v59, 16  ;;  %v3502_v58 = vld [vmem:[%s3206_s20 + $0x120] sm:$0xff] }
  0x50   : > { %892 = vrot.lane.b32.xlu2 %v3425_v54, %s3097_s21  ;;  %v768_v54 = vrot.slane %v766_v15, 1  ;;  %v754_v15 = vshll.u32 %v3453_v53, 16  ;;  %5452 = vst [vmem:[#allocation27_spill] sm:$0xff] %v3502_v58 }
  0x51   : > { %890 = vrot.lane.b32.xlu1 %v3433_v30, %s3097_s21  ;;  %v774_v30 = vshll.u32 %v3445_v50, 16 }
  0x52   : > { %888 = vrot.lane.b32.xlu0 %v3440_v9, %s3097_s21  ;;  %v3477_v9 = vld [vmem:[%s3206_s20 + $0xf0] sm:$0xff]  ;;  %v772_v24 = vor.u32 %v770_v21, %v768_v54  ;;  %v3505_v28 = vsel %vm537_vm0, %v764_v12, %v768_v54  ;;  %v826_v12 = vshll.u32 %v3502_v58, 16 }
  0x53   : > { %v776_v29 = vrot.slane %v774_v30, 1  ;;  %v781_v21 = vshll.u32 %v3477_v9, 16  ;;  %v313_v30 = vld [vmem:[%s3206_s20 + $0x128] sm:$0x1]  ;;  %5453 = vst [vmem:[#allocation28_spill] sm:$0xff] %v3505_v28 }
  0x55   : > { %v3497_v40 = vsel %vm537_vm0, %v772_v24, %v776_v29  ;;  %v779_v24 = vshrl.u32 %v3477_v9, 16  ;;  %v783_v29 = vrot.slane %v781_v21, 1 }
  0x56   : > { %5451 = vst [vmem:[#allocation26_spill] sm:$0xff] %v3497_v40 }
  0x57   : > { %v784_v21 = vor.u32 %v783_v29, %v779_v24  ;;  %v3539_v24 = vld [vmem:[%s3206_s20 + $0x134] sm:$0xff] }
  0x58   : > { %898 = vrot.lane.b32.xlu2 %v3462_v49, %s3097_s21  ;;  %v756_v49 = vrot.slane %v754_v15, 1  ;;  %v519_v15 = vunpack.c.l.b16 %v313_v30  ;;  %v3525_v30 = vpack.c.b16 %v518_v33, %v518_v33 }
  0x59   : > { %896 = vrot.lane.b32.xlu1 %v3469_v34, %s3097_s21  ;;  %v803_v34 = vrot.slane %v801_v39, 1  ;;  %v3513_v39 = vld [vmem:[%s3206_s20 + $0x118] sm:$0xff]  ;;  %v3542_v33 = vsel %vm537_vm0, %v784_v21, %v788_v14 }
  0x5a   : > { %894 = vrot.lane.b32.xlu0 %v3472_v19, %s3097_s21  ;;  %v806_v19 = vshll.u32 %v3482_v10, 16  ;;  %v3509_v62 = vsel %vm537_vm0, %v752_v57, %v756_v49  ;;  %5455 = vst [vmem:[#allocation30_spill] sm:$0xff] %v3513_v39  ;;  %v792_v57 = vor.u32 %v790_v56, %v788_v14  ;;  %v796_v49 = vrot.slane %v794_v22, 1 }
  0x5b   : > { %5454 = vst [vmem:[#allocation29_spill] sm:$0xff] %v3509_v62  ;;  %v804_v16 = vor.u32 %v803_v34, %v799_v43  ;;  %v3522_v45 = vpack.c.b16 %v519_v15, %v519_v15  ;;  %v821_v36 = vshll.u32 %v3513_v39, 16  ;;  %v318_v43 = vld [vmem:[%s3206_s20 + $0x13c] sm:$0x1]  ;;  %v819_v22 = vshrl.u32 %v3513_v39, 16 }
  0x5c   : > { %v808_v54 = vrot.slane %v806_v19, 1  ;;  %v828_v19 = vrot.slane %v826_v12, 1  ;;  %v810_v15 = vshrl.u32 %v3482_v10, 16  ;;  %5459 = vst [vmem:[#allocation34_spill] sm:$0xff] %v3542_v33  ;;  %v520_v12 = vunpack.c.l.b16 %v318_v43 }
  0x5d   : > { %5456 = vst [vmem:[#allocation31_spill] sm:$0xff] %v3522_v45  ;;  %v834_v56 = vshll.u32 %v3522_v45, 16  ;;  %v823_v29 = vrot.slane %v821_v36, 1  ;;  %v846_v14 = vshll.u32 %v3539_v24, 16 }
  0x5e   : > { %v3529_v34 = vsel %vm537_vm0, %v804_v16, %v808_v54  ;;  %v814_v16 = vshll.u32 %v3525_v30, 16  ;;  %v812_v39 = vor.u32 %v810_v15, %v808_v54  ;;  %v3555_v45 = vpack.c.b16 %v520_v12, %v520_v12 }
  0x5f   : > { %5457 = vst [vmem:[#allocation32_spill] sm:$0xff] %v3529_v34  ;;  %v824_v21 = vor.u32 %v823_v29, %v819_v22  ;;  %v923_v15 = vrot.slane %v3221_v4, 1  ;;  %v929_v4 = vrot.slane %v3218_v3, 1 }
  0x60   : > { %904 = vrot.lane.b32.xlu2 %v3497_v40, %s3097_s21  ;;  %v830_v40 = vshrl.u32 %v3502_v58, 16  ;;  %v816_v36 = vrot.slane %v814_v16, 1 }
  0x61   : > { %902 = vrot.lane.b32.xlu1 %v3505_v28, %s3097_s21  ;;  %v3533_v28 = vsel %vm537_vm0, %v792_v57, %v796_v49  ;;  %v836_v49 = vrot.slane %v834_v56, 1  ;;  %v854_v56 = vshll.u32 %v3555_v45, 16 }
  0x62   : > { %900 = vrot.lane.b32.xlu0 %v3509_v62, %s3097_s21  ;;  %5458 = vst [vmem:[#allocation33_spill] sm:$0xff] %v3533_v28  ;;  %v3546_v62 = vld [vmem:[%s3206_s20 + $0x12c] sm:$0xff]  ;;  %v832_v57 = vor.u32 %v830_v40, %v828_v19  ;;  %v3564_v40 = vsel %vm537_vm0, %v824_v21, %v828_v19  ;;  %v3567_v54 = vsel %vm537_vm0, %v812_v39, %v816_v36  ;;  %v924_v19 = vrot.slane %v3224_v5, 1 }
  0x63   : > { %v841_v43 = vshll.u32 %v3546_v62, 16  ;;  %v839_v41 = vshrl.u32 %v3546_v62, 16  ;;  %5460 = vst [vmem:[#allocation35_spill] sm:$0xff] %v3567_v54  ;;  %v856_v16 = vrot.slane %v854_v56, 1  ;;  %v931_v5 = vrot.slane %v3249_v35, 1 }
  0x64   : > { %v3559_v58 = vsel %vm537_vm0, %v832_v57, %v836_v49  ;;  %v925_v12 = vsel %vm922_vm1, %v923_v15, %v924_v19  ;;  %v938_v35 = vrot.slane %v3273_v51, 1  ;;  %v936_v56 = vrot.slane %v3239_v27, 1 }
  0x65   : > { %v843_v22 = vrot.slane %v841_v43, 1  ;;  %v934_v43 = vrot.slane %v3212_v1, 1  ;;  %v944_v27 = vrot.slane %v3252_v37, 1 }
  0x67   : > { %v844_v39 = vor.u32 %v843_v22, %v839_v41  ;;  %v928_v41 = vrot.slane %v3215_v2, 1  ;;  %v933_v22 = vrot.slane %v3209_v0, 1 }
  0x68   : > { %910 = vrot.lane.b32.xlu2 %v3529_v34, %s3097_s21  ;;  %v848_v34 = vrot.slane %v846_v14, 1 }
  0x69   : > { %908 = vrot.lane.b32.xlu1 %v3533_v28, %s3097_s21  ;;  %v850_v28 = vshrl.u32 %v3539_v24, 16  ;;  %v3598_v14 = vsel %vm922_vm1, %v928_v41, %v929_v4 }
  0x6a   : > { %906 = vrot.lane.b32.xlu0 %v3542_v33, %s3097_s21  ;;  %v3583_v49 = vsel %vm537_vm0, %v844_v39, %v848_v34 }
  0x6b   : > { %v852_v29 = vor.u32 %v850_v28, %v848_v34  ;;  %v926_v28 = vrot.slane %v3269_v47, 1  ;;  %v3595_v34 = vsel %vm922_vm1, %v929_v4, %v931_v5  ;;  %v939_v47 = vrot.slane %v3255_v38, 1 }
  0x6c   : > { %v941_v4 = vrot.slane %v3283_v60, 1  ;;  %v953_v60 = vrot.slane %v3333_v48, 1 }
  0x6d   : > { %v3580_v57 = vsel %vm537_vm0, %v852_v29, %v856_v16  ;;  %v927_v21 = vsel %vm922_vm1, %v924_v19, %v926_v28  ;;  %v3614_v15 = vsel %vm922_vm1, %v938_v35, %v939_v47  ;;  %v3617_v19 = vsel %vm922_vm1, %v934_v43, %v936_v56 }
  0x6e   : > { %v3620_v29 = vsel %vm922_vm1, %v933_v22, %v934_v43  ;;  %v946_v16 = vrot.slane %v3309_v25, 1  ;;  %v3641_v28 = vsel %vm922_vm1, %v939_v47, %v941_v4  ;;  %v954_v25 = vrot.slane %v3325_v42, 1 }
  0x6f   : > { %5465 = vst [vmem:[#allocation40_spill] sm:$0xff] %v3641_v28  ;;  %v949_v35 = vrot.slane %v3286_v61, 1  ;;  %v951_v47 = vrot.slane %v3302_v18, 1  ;;  %v948_v43 = vrot.slane %v3293_v8, 1  ;;  %v959_v18 = vrot.slane %v3338_v52, 1 }
  0x70   : > { %916 = vrot.lane.b32.xlu2 %v3559_v58, %s3097_s21  ;;  %v3635_v5 = vsel %vm922_vm1, %v944_v27, %v946_v16  ;;  %v3657_v56 = vsel %vm922_vm1, %v953_v60, %v954_v25  ;;  %v961_v16 = vrot.slane %v3381_v46, 1  ;;  %v958_v4 = vrot.slane %v3315_v31, 1 }
  0x71   : > { %914 = vrot.lane.b32.xlu1 %v3564_v40, %s3097_s21  ;;  %5463 = vst [vmem:[#allocation38_spill] sm:$0xff] %v3635_v5  ;;  %v3660_v22 = vsel %vm922_vm1, %v949_v35, %v951_v47  ;;  %v956_v60 = vrot.slane %v3347_v63, 1  ;;  %v968_v63 = vrot.slane %v3405_v17, 1  ;;  %v969_v46 = vrot.slane %v3395_v7, 1 }
  0x72   : > { %912 = vrot.lane.b32.xlu0 %v3567_v54, %s3097_s21  ;;  %5467 = vst [vmem:[#allocation42_spill] sm:$0xff] %v3660_v22 }
  0x78   : > { %1003 = vrot.lane.b32.xlu2 %v925_v12, %s3098_s24  ;;  %v943_v12 = vrot.slane %v3243_v32, 1 }
  0x79   : > { %920 = vrot.lane.b32.xlu1 %v3580_v57, %s3097_s21 }
  0x7a   : > { %918 = vrot.lane.b32.xlu0 %v3583_v49, %s3097_s21  ;;  %v3638_v41 = vsel %vm922_vm1, %v943_v12, %v944_v27  ;;  %v3663_v27 = vsel %vm922_vm1, %v948_v43, %v949_v35  ;;  %v3682_v43 = vsel %vm922_vm1, %v959_v18, %v961_v16 }
  0x7b   : > { %5464 = vst [vmem:[#allocation39_spill] sm:$0xff] %v3638_v41 }
  0x7c   : > { %5468 = vst [vmem:[#allocation43_spill] sm:$0xff] %v3663_v27 }
  0x7d   : > { %5472 = vst [vmem:[#allocation47_spill] sm:$0xff] %v3682_v43 }
  0x80   : > { %1009 = vrot.lane.b32.xlu2 %v3595_v34, %s3098_s24 }
  0x81   : > { %1007 = vrot.lane.b32.xlu1 %v3598_v14, %s3098_s24 }
  0x82   : > { %1005 = vrot.lane.b32.xlu0 %v927_v21, %s3098_s24  ;;  %v3608_v36 = vpop.permute.xlu2 %866 }
  0x83   : > { %5461 = vst [vmem:[#allocation36_spill] sm:$0xff] %v3608_v36  ;;  %v3688_v36 = vsel %vm922_vm1, %v954_v25, %v956_v60  ;;  %v966_v25 = vrot.slane %v3373_v26, 1  ;;  %v974_v26 = vrot.slane %v3410_v23, 1 }
  0x88   : > { %1015 = vrot.lane.b32.xlu2 %v3614_v15, %s3098_s24 }
  0x89   : > { %1013 = vrot.lane.b32.xlu1 %v3617_v19, %s3098_s24 }
  0x8a   : > { %1011 = vrot.lane.b32.xlu0 %v3620_v29, %s3098_s24  ;;  %v3630_v39 = vpop.permute.xlu2 %868 }
  0x8b   : > { %5462 = vst [vmem:[#allocation37_spill] sm:$0xff] %v3630_v39  ;;  %v3685_v39 = vsel %vm922_vm1, %v958_v4, %v959_v18  ;;  %v964_v18 = vrot.slane %v3357_v13, 1  ;;  %v963_v4 = vrot.slane %v3365_v20, 1 }
  0x90   : > { %1021 = vrot.lane.b32.xlu2 %v3635_v5, %s3098_s24 }
  0x91   : > { %1019 = vrot.lane.b32.xlu1 %v3638_v41, %s3098_s24 }
  0x92   : > { %1017 = vrot.lane.b32.xlu0 %v3641_v28, %s3098_s24  ;;  %v3651_v21 = vpop.permute.xlu2 %874 }
  0x93   : > { %5466 = vst [vmem:[#allocation41_spill] sm:$0xff] %v3651_v21  ;;  %v3711_v21 = vsel %vm922_vm1, %v964_v18, %v966_v25  ;;  %v973_v25 = vrot.slane %v3392_v6, 1 }
  0x94   : > { %5477 = vst [vmem:[#allocation52_spill] sm:$0xff] %v3711_v21 }
  0x98   : > { %1027 = vrot.lane.b32.xlu2 %v3657_v56, %s3098_s24 }
  0x99   : > { %1025 = vrot.lane.b32.xlu1 %v3660_v22, %s3098_s24 }
  0x9a   : > { %1023 = vrot.lane.b32.xlu0 %v3663_v27, %s3098_s24  ;;  %v3673_v12 = vpop.permute.xlu2 %880 }
  0x9b   : > { %5469 = vst [vmem:[#allocation44_spill] sm:$0xff] %v3673_v12  ;;  %v3677_v35 = vpop.permute.xlu1 %862 }
  0x9c   : > { %5470 = vst [vmem:[#allocation45_spill] sm:$0xff] %v3677_v35  ;;  %v3679_v47 = vpop.permute.xlu0 %858  ;;  %v3708_v35 = vsel %vm922_vm1, %v968_v63, %v969_v46  ;;  %v976_v63 = vrot.slane %v3453_v53, 1  ;;  %v984_v53 = vrot.slane %v3466_v59, 1 }
  0x9d   : > { %5471 = vst [vmem:[#allocation46_spill] sm:$0xff] %v3679_v47  ;;  %v3714_v47 = vsel %vm922_vm1, %v963_v4, %v964_v18  ;;  %v971_v18 = vrot.slane %v3419_v44, 1  ;;  %v983_v44 = vrot.slane %v3477_v9, 1 }
  0x9e   : > { %5476 = vst [vmem:[#allocation51_spill] sm:$0xff] %v3708_v35 }
  0x9f   : > { %5478 = vst [vmem:[#allocation53_spill] sm:$0xff] %v3714_v47 }
  0xa0   : > { %1033 = vrot.lane.b32.xlu2 %v3682_v43, %s3098_s24  ;;  %v3739_v43 = vsel %vm922_vm1, %v969_v46, %v971_v18  ;;  %v981_v46 = vrot.slane %v3445_v50, 1  ;;  %v989_v50 = vrot.slane %v3482_v10, 1 }
  0xa1   : > { %1031 = vrot.lane.b32.xlu1 %v3685_v39, %s3098_s24  ;;  %5484 = vst [vmem:[#allocation59_spill] sm:$0xff] %v3739_v43 }
  0xa2   : > { %1029 = vrot.lane.b32.xlu0 %v3688_v36, %s3098_s24  ;;  %v3698_v16 = vpop.permute.xlu2 %886 }
  0xa3   : > { %5473 = vst [vmem:[#allocation48_spill] sm:$0xff] %v3698_v16  ;;  %v3703_v60 = vpop.permute.xlu1 %864  ;;  %v3733_v16 = vsel %vm922_vm1, %v974_v26, %v976_v63 }
  0xa4   : > { %5474 = vst [vmem:[#allocation49_spill] sm:$0xff] %v3703_v60  ;;  %v3705_v12 = vpop.permute.xlu0 %860 }
  0xa5   : > { %5475 = vst [vmem:[#allocation50_spill] sm:$0xff] %v3705_v12 }
  0xa6   : > { %5482 = vst [vmem:[#allocation57_spill] sm:$0xff] %v3733_v16 }
  0xa8   : > { %1039 = vrot.lane.b32.xlu2 %v3708_v35, %s3098_s24  ;;  %v3736_v35 = vsel %vm922_vm1, %v973_v25, %v974_v26  ;;  %v979_v26 = vrot.slane %v3430_v55, 1  ;;  %v978_v25 = vrot.slane %v3437_v11, 1 }
  0xa9   : > { %1037 = vrot.lane.b32.xlu1 %v3711_v21, %s3098_s24  ;;  %5483 = vst [vmem:[#allocation58_spill] sm:$0xff] %v3736_v35 }
  0xaa   : > { %1035 = vrot.lane.b32.xlu0 %v3714_v47, %s3098_s24  ;;  %v3724_v60 = vpop.permute.xlu2 %892 }
  0xab   : > { %5479 = vst [vmem:[#allocation54_spill] sm:$0xff] %v3724_v60  ;;  %v3728_v4 = vpop.permute.xlu1 %872  ;;  %v3762_v60 = vsel %vm922_vm1, %v979_v26, %v981_v46  ;;  %v5492_v46 = vld [vmem:[#allocation21_spill] sm:$0xff] }
  0xac   : > { %5480 = vst [vmem:[#allocation55_spill] sm:$0xff] %v3728_v4  ;;  %v3730_v12 = vpop.permute.xlu0 %870 }
  0xad   : > { %5481 = vst [vmem:[#allocation56_spill] sm:$0xff] %v3730_v12  ;;  %v3759_v12 = vsel %vm922_vm1, %v983_v44, %v984_v53  ;;  %v991_v44 = vrot.slane %v3525_v30, 1  ;;  %v998_v30 = vrot.slane %v3546_v62, 1 }
  0xae   : > { %5488 = vst [vmem:[#allocation63_spill] sm:$0xff] %v3759_v12 }
  0xaf   : > { %5489 = vst [vmem:[#allocation64_spill] sm:$0xff] %v3762_v60 }
  0xb0   : > { %1045 = vrot.lane.b32.xlu2 %v3733_v16, %s3098_s24  ;;  %v3765_v16 = vsel %vm922_vm1, %v978_v25, %v979_v26 }
  0xb1   : > { %1043 = vrot.lane.b32.xlu1 %v3736_v35, %s3098_s24  ;;  %5490 = vst [vmem:[#allocation65_spill] sm:$0xff] %v3765_v16 }
  0xb2   : > { %1041 = vrot.lane.b32.xlu0 %v3739_v43, %s3098_s24  ;;  %v3749_v63 = vpop.permute.xlu2 %898 }
  0xb3   : > { %5485 = vst [vmem:[#allocation60_spill] sm:$0xff] %v3749_v63  ;;  %v3754_v18 = vpop.permute.xlu1 %878  ;;  %v5493_v63 = vld [vmem:[#allocation25_spill] sm:$0xff] }
  0xb4   : > { %5486 = vst [vmem:[#allocation61_spill] sm:$0xff] %v3754_v18  ;;  %v3756_v4 = vpop.permute.xlu0 %876  ;;  %v986_v26 = vrot.slane %v5493_v63, 1  ;;  %v999_v63 = vrot.slane %v3539_v24, 1 }
  0xb5   : > { %5487 = vst [vmem:[#allocation62_spill] sm:$0xff] %v3756_v4  ;;  %v988_v4 = vrot.slane %v5492_v46, 1 }
  0xb8   : > { %1051 = vrot.lane.b32.xlu2 %v3759_v12, %s3098_s24  ;;  %v3784_v12 = vsel %vm922_vm1, %v989_v50, %v991_v44 }
  0xb9   : > { %1049 = vrot.lane.b32.xlu1 %v3762_v60, %s3098_s24  ;;  %5496 = vst [vmem:[#allocation67_spill] sm:$0xff] %v3784_v12  ;;  %v3787_v60 = vsel %vm922_vm1, %v988_v4, %v989_v50  ;;  %v5500_v4 = vld [vmem:[#allocation27_spill] sm:$0xff] }
  0xba   : > { %1047 = vrot.lane.b32.xlu0 %v3765_v16, %s3098_s24  ;;  %v3775_v18 = vpop.permute.xlu2 %904  ;;  %5497 = vst [vmem:[#allocation68_spill] sm:$0xff] %v3787_v60  ;;  %v3790_v16 = vsel %vm922_vm1, %v984_v53, %v986_v26  ;;  %v994_v50 = vrot.slane %v5500_v4, 1  ;;  %v5502_v26 = vld [vmem:[#allocation30_spill] sm:$0xff] }
  0xbb   : > { %5491 = vst [vmem:[#allocation66_spill] sm:$0xff] %v3775_v18  ;;  %v3779_v25 = vpop.permute.xlu1 %884  ;;  %v993_v18 = vrot.slane %v5502_v26, 1 }
  0xbc   : > { %5494 = vst [vmem:[#allocation21_spill] sm:$0xff] %v3779_v25  ;;  %v3781_v43 = vpop.permute.xlu0 %882 }
  0xbd   : > { %5495 = vst [vmem:[#allocation25_spill] sm:$0xff] %v3781_v43  ;;  %v5501_v43 = vld [vmem:[#allocation31_spill] sm:$0xff]  ;;  %v3816_v35 = vsel %vm922_vm1, %v993_v18, %v994_v50 }
  0xbe   : > { %5498 = vst [vmem:[#allocation69_spill] sm:$0xff] %v3790_v16  ;;  %v996_v53 = vrot.slane %v5501_v43, 1 }
  0xc0   : > { %1057 = vrot.lane.b32.xlu2 %v3784_v12, %s3098_s24 }
  0xc1   : > { %1055 = vrot.lane.b32.xlu1 %v3787_v60, %s3098_s24  ;;  %v3810_v60 = vsel %vm922_vm1, %v998_v30, %v999_v63  ;;  %v1001_v30 = vrot.slane %v3555_v45, 1 }
  0xc2   : > { %1053 = vrot.lane.b32.xlu0 %v3790_v16, %s3098_s24  ;;  %v3800_v44 = vpop.permute.xlu2 %910  ;;  %v3813_v16 = vsel %vm922_vm1, %v994_v50, %v996_v53 }
  0xc3   : > { %5499 = vst [vmem:[#allocation70_spill] sm:$0xff] %v3800_v44  ;;  %v3805_v25 = vpop.permute.xlu1 %890  ;;  %v3832_v18 = vsel %vm922_vm1, %v999_v63, %v1001_v30 }
  0xc4   : > { %5503 = vst [vmem:[#allocation27_spill] sm:$0xff] %v3805_v25  ;;  %v3807_v12 = vpop.permute.xlu0 %888 }
  0xc5   : > { %5505 = vst [vmem:[#allocation30_spill] sm:$0xff] %v3832_v18 }
  0xc8   : > { %1063 = vrot.lane.b32.xlu2 %v3810_v60, %s3098_s24 }
  0xc9   : > { %1061 = vrot.lane.b32.xlu1 %v3813_v16, %s3098_s24 }
  0xca   : > { %1059 = vrot.lane.b32.xlu0 %v3816_v35, %s3098_s24  ;;  %v3824_v43 = vpop.permute.xlu2 %916 }
  0xcb   : > { %5504 = vst [vmem:[#allocation31_spill] sm:$0xff] %v3824_v43  ;;  %v3827_v25 = vpop.permute.xlu1 %896 }
  0xcc   : > { %v3829_v53 = vpop.permute.xlu0 %894 }
  0xd0   : > { %1079 = vrot.lane.b32.xlu2 %v3218_v3, %s3099_s27 }
  0xd1   : > { %1077 = vrot.lane.b32.xlu1 %v3215_v2, %s3099_s27 }
  0xd2   : > { %1065 = vrot.lane.b32.xlu0 %v3832_v18, %s3098_s24  ;;  %v3840_v50 = vpop.permute.xlu2 %1003 }
  0xd3   : > { %5506 = vst [vmem:[#allocation71_spill] sm:$0xff] %v3840_v50  ;;  %v3842_v45 = vpop.permute.xlu1 %902 }
  0xd4   : > { %5507 = vst [vmem:[#allocation72_spill] sm:$0xff] %v3842_v45  ;;  %v3844_v43 = vpop.permute.xlu0 %900  ;;  %v323_v45 = vld [vmem:[%s3206_s20 + $0x150] sm:$0x1] }
  0xd8   : > { %1085 = vrot.lane.b32.xlu2 %v3273_v51, %s3099_s27 }
  0xd9   : > { %1083 = vrot.lane.b32.xlu1 %v3212_v1, %s3099_s27 }
  0xda   : > { %1081 = vrot.lane.b32.xlu0 %v3209_v0, %s3099_s27  ;;  %v3852_v3 = vpop.permute.xlu2 %1009 }
  0xdb   : > { %5508 = vst [vmem:[#allocation73_spill] sm:$0xff] %v3852_v3  ;;  %v3854_v2 = vpop.permute.xlu1 %908 }
  0xdc   : > { %5509 = vst [vmem:[#allocation74_spill] sm:$0xff] %v3854_v2  ;;  %v3856_v63 = vpop.permute.xlu0 %906  ;;  %v5544_v2 = vld [vmem:[#allocation14_spill] sm:$0xff] }
  0xdd   : > { %5510 = vst [vmem:[#allocation75_spill] sm:$0xff] %v3856_v63 }
  0xe0   : > { %1091 = vrot.lane.b32.xlu2 %v3252_v37, %s3099_s27 }
  0xe1   : > { %1089 = vrot.lane.b32.xlu1 %v3243_v32, %s3099_s27 }
  0xe2   : > { %1087 = vrot.lane.b32.xlu0 %v3255_v38, %s3099_s27  ;;  %v3864_v51 = vpop.permute.xlu2 %1015 }
  0xe3   : > { %5511 = vst [vmem:[#allocation76_spill] sm:$0xff] %v3864_v51  ;;  %v3866_v1 = vpop.permute.xlu1 %914  ;;  %v3958_v51 = vld [vmem:[%s3206_s20 + $0x140] sm:$0xff] }
  0xe4   : > { %5512 = vst [vmem:[#allocation77_spill] sm:$0xff] %v3866_v1  ;;  %v3868_v0 = vpop.permute.xlu0 %912  ;;  %v5532_v1 = vld [vmem:[#allocation8_spill] sm:$0xff] }
  0xe5   : > { %5528 = vst [vmem:[#allocation93_spill] sm:$0xff] %v3958_v51 }
  0xe8   : > { %1097 = vrot.lane.b32.xlu2 %v3333_v48, %s3099_s27 }
  0xe9   : > { %1095 = vrot.lane.b32.xlu1 %v3286_v61, %s3099_s27 }
  0xea   : > { %1093 = vrot.lane.b32.xlu0 %v3293_v8, %s3099_s27  ;;  %v3876_v37 = vpop.permute.xlu2 %1021 }
  0xeb   : > { %5513 = vst [vmem:[#allocation78_spill] sm:$0xff] %v3876_v37  ;;  %v3878_v32 = vpop.permute.xlu1 %920  ;;  %v5539_v37 = vld [vmem:[#allocation7_spill] sm:$0xff] }
  0xec   : > { %5514 = vst [vmem:[#allocation79_spill] sm:$0xff] %v3878_v32  ;;  %v3880_v38 = vpop.permute.xlu0 %918 }
  0xed   : > { %5515 = vst [vmem:[#allocation80_spill] sm:$0xff] %v3880_v38 }
  0xf0   : > { %1103 = vrot.lane.b32.xlu2 %v3338_v52, %s3099_s27 }
  0xf1   : > { %1101 = vrot.lane.b32.xlu1 %v3315_v31, %s3099_s27 }
  0xf2   : > { %1099 = vrot.lane.b32.xlu0 %v3325_v42, %s3099_s27  ;;  %v3888_v48 = vpop.permute.xlu2 %1027 }
  0xf3   : > { %5516 = vst [vmem:[#allocation81_spill] sm:$0xff] %v3888_v48  ;;  %v3890_v61 = vpop.permute.xlu1 %1007 }
  0xf4   : > { %5517 = vst [vmem:[#allocation82_spill] sm:$0xff] %v3890_v61  ;;  %v3892_v8 = vpop.permute.xlu0 %1005  ;;  %v5538_v61 = vld [vmem:[#allocation11_spill] sm:$0xff] }
  0xf5   : > { %5518 = vst [vmem:[#allocation83_spill] sm:$0xff] %v3892_v8 }
  0xf8   : > { %1109 = vrot.lane.b32.xlu2 %v3405_v17, %s3099_s27 }
  0xf9   : > { %1107 = vrot.lane.b32.xlu1 %v3357_v13, %s3099_s27 }
  0xfa   : > { %1105 = vrot.lane.b32.xlu0 %v3365_v20, %s3099_s27  ;;  %v3900_v52 = vpop.permute.xlu2 %1033 }
  0xfb   : > { %v3902_v31 = vpop.permute.xlu1 %1013 }
  0xfc   : > { %5519 = vst [vmem:[#allocation84_spill] sm:$0xff] %v3902_v31  ;;  %v3904_v42 = vpop.permute.xlu0 %1011 }
  0xfd   : > { %5520 = vst [vmem:[#allocation85_spill] sm:$0xff] %v3904_v42  ;;  %v5531_v42 = vld [vmem:[#allocation5_spill] sm:$0xff] }
 0x100   : > { %1115 = vrot.lane.b32.xlu2 %v3410_v23, %s3099_s27 }
 0x101   : > { %1113 = vrot.lane.b32.xlu1 %v3392_v6, %s3099_s27 }
 0x102   : > { %1111 = vrot.lane.b32.xlu0 %v3395_v7, %s3099_s27  ;;  %v3912_v17 = vpop.permute.xlu2 %1039 }
 0x103   : > { %v3914_v13 = vpop.permute.xlu1 %1019 }
 0x104   : > { %5521 = vst [vmem:[#allocation86_spill] sm:$0xff] %v3914_v13  ;;  %v3916_v20 = vpop.permute.xlu0 %1017  ;;  %v5545_v13 = vld [vmem:[#allocation9_spill] sm:$0xff] }
 0x105   : > { %5522 = vst [vmem:[#allocation87_spill] sm:$0xff] %v3916_v20  ;;  %v3955_v20 = vld [vmem:[%s3206_s20 + $0x148] sm:$0xff] }
 0x106   : > { %5527 = vst [vmem:[#allocation92_spill] sm:$0xff] %v3955_v20 }
 0x108   : > { %1121 = vrot.lane.b32.xlu2 %v3477_v9, %s3099_s27 }
 0x109   : > { %1119 = vrot.lane.b32.xlu1 %v3430_v55, %s3099_s27 }
 0x10a   : > { %1117 = vrot.lane.b32.xlu0 %v3437_v11, %s3099_s27  ;;  %v3924_v30 = vpop.permute.xlu2 %1045 }
 0x10b   : > { %v3926_v7 = vpop.permute.xlu1 %1025 }
 0x10c   : > { %5523 = vst [vmem:[#allocation88_spill] sm:$0xff] %v3926_v7  ;;  %v3928_v32 = vpop.permute.xlu0 %1023  ;;  %v5533_v7 = vld [vmem:[#allocation6_spill] sm:$0xff] }
 0x10d   : > { %5524 = vst [vmem:[#allocation89_spill] sm:$0xff] %v3928_v32 }
 0x110   : > { %1127 = vrot.lane.b32.xlu2 %v3482_v10, %s3099_s27 }
 0x111   : > { %1125 = vrot.lane.b32.xlu1 %v5492_v46, %s3099_s27 }
 0x112   : > { %1123 = vrot.lane.b32.xlu0 %v3466_v59, %s3099_s27  ;;  %v3936_v55 = vpop.permute.xlu2 %1051 }
 0x113   : > { %5525 = vst [vmem:[#allocation90_spill] sm:$0xff] %v3936_v55  ;;  %v3938_v9 = vpop.permute.xlu1 %1031 }
 0x114   : > { %v3940_v11 = vpop.permute.xlu0 %1029 }
 0x118   : > { %1133 = vrot.lane.b32.xlu2 %v3546_v62, %s3099_s27 }
 0x119   : > { %1131 = vrot.lane.b32.xlu1 %v5500_v4, %s3099_s27 }
 0x11a   : > { %1129 = vrot.lane.b32.xlu0 %v5502_v26, %s3099_s27  ;;  %v3948_v10 = vpop.permute.xlu2 %1057 }
 0x11b   : > { %v3950_v46 = vpop.permute.xlu1 %1037 }
 0x11c   : > { %v3952_v59 = vpop.permute.xlu0 %1035 }
 0x11d   : > { %5526 = vst [vmem:[#allocation91_spill] sm:$0xff] %v3952_v59 }
 0x120   : > { %1139 = vrot.lane.b32.xlu2 %v3955_v20, %s3099_s27 }
 0x121   : > { %1137 = vrot.lane.b32.xlu1 %v3958_v51, %s3099_s27 }
 0x122   : > { %1135 = vrot.lane.b32.xlu0 %v3539_v24, %s3099_s27  ;;  %v3966_v38 = vpop.permute.xlu2 %1063 }
 0x123   : > { %5529 = vst [vmem:[#allocation94_spill] sm:$0xff] %v3966_v38  ;;  %v3968_v31 = vpop.permute.xlu1 %1043  ;;  %v5537_v38 = vld [vmem:[#allocation10_spill] sm:$0xff] }
 0x124   : > { %v3970_v48 = vpop.permute.xlu0 %1041 }
 0x125   : > { %5530 = vst [vmem:[#allocation95_spill] sm:$0xff] %v3970_v48 }
 0x128   : > { %1168 = vrot.lane.b32.xlu2 %v5531_v42, %s3100_s28 }
 0x129   : > { %1166 = vrot.lane.b32.xlu1 %v5532_v1, %s3100_s28 }
 0x12a   : > { %1164 = vrot.lane.b32.xlu0 %v5533_v7, %s3100_s28  ;;  %v3978_v3 = vpop.permute.xlu2 %1079 }
 0x12b   : > { %5534 = vst [vmem:[#allocation5_spill] sm:$0xff] %v3978_v3  ;;  %v3980_v32 = vpop.permute.xlu1 %1049  ;;  %v5543_v3 = vld [vmem:[#allocation13_spill] sm:$0xff] }
 0x12c   : > { %5535 = vst [vmem:[#allocation8_spill] sm:$0xff] %v3980_v32  ;;  %v3982_v24 = vpop.permute.xlu0 %1047 }
 0x12d   : > { %5536 = vst [vmem:[#allocation6_spill] sm:$0xff] %v3982_v24 }
 0x130   : > { %1174 = vrot.lane.b32.xlu2 %v5537_v38, %s3100_s28 }
 0x131   : > { %1172 = vrot.lane.b32.xlu1 %v5538_v61, %s3100_s28 }
 0x132   : > { %1170 = vrot.lane.b32.xlu0 %v5539_v37, %s3100_s28  ;;  %v3990_v8 = vpop.permute.xlu2 %1085 }
 0x133   : > { %5540 = vst [vmem:[#allocation11_spill] sm:$0xff] %v3990_v8  ;;  %v3992_v1 = vpop.permute.xlu1 %1055  ;;  %v5549_v8 = vld [vmem:[#allocation16_spill] sm:$0xff] }
 0x134   : > { %5541 = vst [vmem:[#allocation7_spill] sm:$0xff] %v3992_v1  ;;  %v3994_v7 = vpop.permute.xlu0 %1053 }
 0x135   : > { %5542 = vst [vmem:[#allocation96_spill] sm:$0xff] %v3994_v7  ;;  %v5550_v7 = vld [vmem:[#allocation17_spill] sm:$0xff] }
 0x138   : > { %1180 = vrot.lane.b32.xlu2 %v5543_v3, %s3100_s28  ;;  %v5551_v3 = vld [vmem:[#allocation12_spill] sm:$0xff] }
 0x139   : > { %1178 = vrot.lane.b32.xlu1 %v5544_v2, %s3100_s28 }
 0x13a   : > { %1176 = vrot.lane.b32.xlu0 %v5545_v13, %s3100_s28  ;;  %v4002_v50 = vpop.permute.xlu2 %1091 }
 0x13b   : > { %5546 = vst [vmem:[#allocation97_spill] sm:$0xff] %v4002_v50  ;;  %v4004_v55 = vpop.permute.xlu1 %1061  ;;  %v5555_v50 = vld [vmem:[#allocation19_spill] sm:$0xff] }
 0x13c   : > { %5547 = vst [vmem:[#allocation98_spill] sm:$0xff] %v4004_v55  ;;  %v4006_v63 = vpop.permute.xlu0 %1059  ;;  %v5556_v55 = vld [vmem:[#allocation20_spill] sm:$0xff] }
 0x13d   : > { %5548 = vst [vmem:[#allocation99_spill] sm:$0xff] %v4006_v63  ;;  %v5557_v63 = vld [vmem:[#allocation15_spill] sm:$0xff] }
 0x140   : > { %1186 = vrot.lane.b32.xlu2 %v5549_v8, %s3100_s28 }
 0x141   : > { %1184 = vrot.lane.b32.xlu1 %v5550_v7, %s3100_s28 }
 0x142   : > { %1182 = vrot.lane.b32.xlu0 %v5551_v3, %s3100_s28  ;;  %v4014_v59 = vpop.permute.xlu2 %1097 }
 0x143   : > { %5552 = vst [vmem:[#allocation16_spill] sm:$0xff] %v4014_v59  ;;  %v4016_v2 = vpop.permute.xlu1 %1077  ;;  %v5560_v59 = vld [vmem:[#allocation23_spill] sm:$0xff] }
 0x144   : > { %5553 = vst [vmem:[#allocation17_spill] sm:$0xff] %v4016_v2  ;;  %v4018_v13 = vpop.permute.xlu0 %1065 }
 0x145   : > { %5554 = vst [vmem:[#allocation100_spill] sm:$0xff] %v4018_v13  ;;  %v5561_v13 = vld [vmem:[#allocation24_spill] sm:$0xff] }
 0x148   : > { %1192 = vrot.lane.b32.xlu2 %v5555_v50, %s3100_s28  ;;  %v5562_v50 = vld [vmem:[#allocation18_spill] sm:$0xff] }
 0x149   : > { %1190 = vrot.lane.b32.xlu1 %v5556_v55, %s3100_s28 }
 0x14a   : > { %1188 = vrot.lane.b32.xlu0 %v5557_v63, %s3100_s28  ;;  %v4026_v38 = vpop.permute.xlu2 %1103  ;;  %v1145_v63 = vshrl.u32 %v3958_v51, 16 }
 0x14b   : > { %v4028_v1 = vpop.permute.xlu1 %1083 }
 0x14c   : > { %5558 = vst [vmem:[#allocation101_spill] sm:$0xff] %v4028_v1  ;;  %v4030_v3 = vpop.permute.xlu0 %1081  ;;  %v5566_v1 = vld [vmem:[#allocation28_spill] sm:$0xff] }
 0x14d   : > { %5559 = vst [vmem:[#allocation102_spill] sm:$0xff] %v4030_v3  ;;  %v5567_v3 = vld [vmem:[#allocation29_spill] sm:$0xff] }
 0x150   : > { %1198 = vrot.lane.b32.xlu2 %v5560_v59, %s3100_s28  ;;  %v5568_v59 = vld [vmem:[#allocation22_spill] sm:$0xff] }
 0x151   : > { %1196 = vrot.lane.b32.xlu1 %v5561_v13, %s3100_s28 }
 0x152   : > { %1194 = vrot.lane.b32.xlu0 %v5562_v50, %s3100_s28  ;;  %v4038_v2 = vpop.permute.xlu2 %1109 }
 0x153   : > { %5563 = vst [vmem:[#allocation103_spill] sm:$0xff] %v4038_v2  ;;  %v4040_v55 = vpop.permute.xlu1 %1089  ;;  %v5572_v2 = vld [vmem:[#allocation33_spill] sm:$0xff] }
 0x154   : > { %5564 = vst [vmem:[#allocation104_spill] sm:$0xff] %v4040_v55  ;;  %v4042_v18 = vpop.permute.xlu0 %1087  ;;  %v5573_v55 = vld [vmem:[#allocation26_spill] sm:$0xff] }
 0x155   : > { %5565 = vst [vmem:[#allocation105_spill] sm:$0xff] %v4042_v18 }
 0x158   : > { %1204 = vrot.lane.b32.xlu2 %v5566_v1, %s3100_s28 }
 0x159   : > { %1202 = vrot.lane.b32.xlu1 %v5567_v3, %s3100_s28 }
 0x15a   : > { %1200 = vrot.lane.b32.xlu0 %v5568_v59, %s3100_s28  ;;  %v4050_v13 = vpop.permute.xlu2 %1115 }
 0x15b   : > { %5569 = vst [vmem:[#allocation28_spill] sm:$0xff] %v4050_v13  ;;  %v4052_v44 = vpop.permute.xlu1 %1095  ;;  %v1142_v13 = vunpack.c.l.b16 %v323_v45 }
 0x15c   : > { %5570 = vst [vmem:[#allocation29_spill] sm:$0xff] %v4052_v44  ;;  %v4054_v50 = vpop.permute.xlu0 %1093  ;;  %v1152_v44 = vshll.u32 %v3955_v20, 16 }
 0x15d   : > { %5571 = vst [vmem:[#allocation22_spill] sm:$0xff] %v4054_v50  ;;  %v4078_v50 = vpack.c.b16 %v1142_v13, %v1142_v13 }
 0x15f   : > { %5579 = vst [vmem:[#allocation110_spill] sm:$0xff] %v4078_v50 }
 0x160   : > { %1210 = vrot.lane.b32.xlu2 %v5572_v2, %s3100_s28  ;;  %v5577_v2 = vld [vmem:[#allocation32_spill] sm:$0xff] }
 0x161   : > { %1208 = vrot.lane.b32.xlu1 %v3542_v33, %s3100_s28 }
 0x162   : > { %1206 = vrot.lane.b32.xlu0 %v5573_v55, %s3100_s28  ;;  %v4062_v18 = vpop.permute.xlu2 %1121  ;;  %v1156_v55 = vshrl.u32 %v3955_v20, 16 }
 0x163   : > { %5574 = vst [vmem:[#allocation106_spill] sm:$0xff] %v4062_v18  ;;  %v4064_v24 = vpop.permute.xlu1 %1101  ;;  %v1154_v18 = vrot.slane %v1152_v44, 1 }
 0x164   : > { %5575 = vst [vmem:[#allocation107_spill] sm:$0xff] %v4064_v24  ;;  %v4066_v32 = vpop.permute.xlu0 %1099  ;;  %v1147_v24 = vshll.u32 %v3958_v51, 16 }
 0x165   : > { %5576 = vst [vmem:[#allocation108_spill] sm:$0xff] %v4066_v32 }
 0x168   : > { %1216 = vrot.lane.b32.xlu2 %v3564_v40, %s3100_s28 }
 0x169   : > { %1214 = vrot.lane.b32.xlu1 %v3567_v54, %s3100_s28  ;;  %v1160_v54 = vshll.u32 %v4078_v50, 16 }
 0x16a   : > { %1212 = vrot.lane.b32.xlu0 %v5577_v2, %s3100_s28  ;;  %v4076_v33 = vpop.permute.xlu2 %1127  ;;  %v1149_v2 = vrot.slane %v1147_v24, 1 }
 0x16b   : > { %5578 = vst [vmem:[#allocation109_spill] sm:$0xff] %v4076_v33  ;;  %v4081_v32 = vpop.permute.xlu1 %1107  ;;  %v1158_v33 = vor.u32 %v1156_v55, %v1154_v18  ;;  %v1162_v44 = vrot.slane %v1160_v54, 1 }
 0x16c   : > { %v4083_v45 = vpop.permute.xlu0 %1105  ;;  %v1150_v48 = vor.u32 %v1149_v2, %v1145_v63 }
 0x16d   : > { %v4101_v24 = vsel %vm537_vm0, %v1158_v33, %v1162_v44 }
 0x16e   : > { %5581 = vst [vmem:[#allocation112_spill] sm:$0xff] %v4101_v24  ;;  %v4104_v51 = vsel %vm537_vm0, %v1150_v48, %v1154_v18 }
 0x16f   : > { %5582 = vst [vmem:[#allocation113_spill] sm:$0xff] %v4104_v51 }
 0x170   : > { %1222 = vrot.lane.b32.xlu2 %v3580_v57, %s3100_s28 }
 0x171   : > { %1220 = vrot.lane.b32.xlu1 %v3583_v49, %s3100_s28 }
 0x172   : > { %1218 = vrot.lane.b32.xlu0 %v3559_v58, %s3100_s28  ;;  %v4094_v13 = vpop.permute.xlu2 %1133 }
 0x173   : > { %5580 = vst [vmem:[#allocation111_spill] sm:$0xff] %v4094_v13  ;;  %v4096_v20 = vpop.permute.xlu1 %1113 }
 0x174   : > { %v4098_v50 = vpop.permute.xlu0 %1111 }
 0x178   : > { %1233 = vrot.lane.b32.xlu2 %v3598_v14, %s3101_s29 }
 0x179   : > { %1226 = vrot.lane.b32.xlu1 %v4101_v24, %s3100_s28  ;;  %v5597_v24 = vld [vmem:[#allocation59_spill] sm:$0xff] }
 0x17a   : > { %1224 = vrot.lane.b32.xlu0 %v4104_v51, %s3100_s28  ;;  %v4112_v54 = vpop.permute.xlu2 %1139  ;;  %v5601_v51 = vld [vmem:[#allocation64_spill] sm:$0xff]  ;;  %s218_s28 = sand.u32 1, %s3071_s13  }
 0x17b   : > { %5583 = vst [vmem:[#allocation114_spill] sm:$0xff] %v4112_v54  ;;  %v4114_v2 = vpop.permute.xlu1 %1119  ;;  %s2501_s11 = scalar_lea.sflag [#allocation3], %s218_s28 }
 0x17c   : > { %v4116_v63 = vpop.permute.xlu0 %1117 }
 0x180   : > { %1239 = vrot.lane.b32.xlu2 %v3617_v19, %s3101_s29 }
 0x181   : > { %1237 = vrot.lane.b32.xlu1 %v3620_v29, %s3101_s29 }
 0x182   : > { %1235 = vrot.lane.b32.xlu0 %v3595_v34, %s3101_s29  ;;  %v4124_v33 = vpop.permute.xlu2 %1168 }
 0x183   : > { %5584 = vst [vmem:[#allocation115_spill] sm:$0xff] %v4124_v33  ;;  %v4126_v14 = vpop.permute.xlu1 %1125 }
 0x184   : > { %5585 = vst [vmem:[#allocation116_spill] sm:$0xff] %v4126_v14  ;;  %v4128_v18 = vpop.permute.xlu0 %1123 }
 0x188   : > { %1245 = vrot.lane.b32.xlu2 %v3638_v41, %s3101_s29 }
 0x189   : > { %1243 = vrot.lane.b32.xlu1 %v3641_v28, %s3101_s29 }
 0x18a   : > { %1241 = vrot.lane.b32.xlu0 %v3614_v15, %s3101_s29  ;;  %v4136_v48 = vpop.permute.xlu2 %1174 }
 0x18b   : > { %5586 = vst [vmem:[#allocation117_spill] sm:$0xff] %v4136_v48  ;;  %v4138_v55 = vpop.permute.xlu1 %1131 }
 0x18c   : > { %v4140_v34 = vpop.permute.xlu0 %1129 }
 0x190   : > { %1251 = vrot.lane.b32.xlu2 %v3660_v22, %s3101_s29 }
 0x191   : > { %1249 = vrot.lane.b32.xlu1 %v3663_v27, %s3101_s29 }
 0x192   : > { %1247 = vrot.lane.b32.xlu0 %v3635_v5, %s3101_s29  ;;  %v4148_v44 = vpop.permute.xlu2 %1180 }
 0x193   : > { %5587 = vst [vmem:[#allocation118_spill] sm:$0xff] %v4148_v44  ;;  %v4150_v54 = vpop.permute.xlu1 %1137 }
 0x194   : > { %5588 = vst [vmem:[#allocation119_spill] sm:$0xff] %v4150_v54  ;;  %v4152_v13 = vpop.permute.xlu0 %1135  ;;  %v5593_v54 = vld [vmem:[#allocation47_spill] sm:$0xff] }
 0x195   : > { %5589 = vst [vmem:[#allocation120_spill] sm:$0xff] %v4152_v13 }
 0x198   : > { %1257 = vrot.lane.b32.xlu2 %v3685_v39, %s3101_s29 }
 0x199   : > { %1255 = vrot.lane.b32.xlu1 %v3688_v36, %s3101_s29 }
 0x19a   : > { %1253 = vrot.lane.b32.xlu0 %v3657_v56, %s3101_s29  ;;  %v4160_v48 = vpop.permute.xlu2 %1186 }
 0x19b   : > { %5590 = vst [vmem:[#allocation121_spill] sm:$0xff] %v4160_v48  ;;  %v4162_v22 = vpop.permute.xlu1 %1166  ;;  %v5596_v48 = vld [vmem:[#allocation58_spill] sm:$0xff] }
 0x19c   : > { %5591 = vst [vmem:[#allocation122_spill] sm:$0xff] %v4162_v22  ;;  %v4164_v27 = vpop.permute.xlu0 %1164 }
 0x19d   : > { %5592 = vst [vmem:[#allocation123_spill] sm:$0xff] %v4164_v27  ;;  %v5606_v27 = vld [vmem:[#allocation68_spill] sm:$0xff] }
 0x1a0   : > { %1263 = vrot.lane.b32.xlu2 %v3711_v21, %s3101_s29  ;;  %v5598_v21 = vld [vmem:[#allocation51_spill] sm:$0xff] }
 0x1a1   : > { %1261 = vrot.lane.b32.xlu1 %v3714_v47, %s3101_s29 }
 0x1a2   : > { %1259 = vrot.lane.b32.xlu0 %v5593_v54, %s3101_s29  ;;  %v4172_v13 = vpop.permute.xlu2 %1192 }
 0x1a3   : > { %v4174_v33 = vpop.permute.xlu1 %1172 }
 0x1a4   : > { %5594 = vst [vmem:[#allocation124_spill] sm:$0xff] %v4174_v33  ;;  %v4176_v5 = vpop.permute.xlu0 %1170  ;;  %v5602_v33 = vld [vmem:[#allocation65_spill] sm:$0xff] }
 0x1a5   : > { %5595 = vst [vmem:[#allocation125_spill] sm:$0xff] %v4176_v5  ;;  %v5603_v5 = vld [vmem:[#allocation57_spill] sm:$0xff] }
 0x1a8   : > { %1269 = vrot.lane.b32.xlu2 %v5596_v48, %s3101_s29 }
 0x1a9   : > { %1267 = vrot.lane.b32.xlu1 %v5597_v24, %s3101_s29 }
 0x1aa   : > { %1265 = vrot.lane.b32.xlu0 %v5598_v21, %s3101_s29  ;;  %v4184_v22 = vpop.permute.xlu2 %1198 }
 0x1ab   : > { %v4186_v47 = vpop.permute.xlu1 %1178 }
 0x1ac   : > { %5599 = vst [vmem:[#allocation58_spill] sm:$0xff] %v4186_v47  ;;  %v4188_v41 = vpop.permute.xlu0 %1176  ;;  %v5607_v47 = vld [vmem:[#allocation69_spill] sm:$0xff] }
 0x1ad   : > { %5600 = vst [vmem:[#allocation126_spill] sm:$0xff] %v4188_v41  ;;  %v5608_v41 = vld [vmem:[#allocation63_spill] sm:$0xff] }
 0x1b0   : > { %1275 = vrot.lane.b32.xlu2 %v5601_v51, %s3101_s29 }
 0x1b1   : > { %1273 = vrot.lane.b32.xlu1 %v5602_v33, %s3101_s29 }
 0x1b2   : > { %1271 = vrot.lane.b32.xlu0 %v5603_v5, %s3101_s29  ;;  %v4196_v44 = vpop.permute.xlu2 %1204 }
 0x1b3   : > { %v4198_v24 = vpop.permute.xlu1 %1184 }
 0x1b4   : > { %5604 = vst [vmem:[#allocation64_spill] sm:$0xff] %v4198_v24  ;;  %v4200_v21 = vpop.permute.xlu0 %1182 }
 0x1b5   : > { %5605 = vst [vmem:[#allocation65_spill] sm:$0xff] %v4200_v21 }
 0x1b8   : > { %1281 = vrot.lane.b32.xlu2 %v5606_v27, %s3101_s29  ;;  %v5610_v27 = vld [vmem:[#allocation67_spill] sm:$0xff] }
 0x1b9   : > { %1279 = vrot.lane.b32.xlu1 %v5607_v47, %s3101_s29 }
 0x1ba   : > { %1277 = vrot.lane.b32.xlu0 %v5608_v41, %s3101_s29  ;;  %v4208_v28 = vpop.permute.xlu2 %1210 }
 0x1bb   : > { %v4210_v54 = vpop.permute.xlu1 %1190 }
 0x1bc   : > { %v4212_v14 = vpop.permute.xlu0 %1188 }
 0x1bd   : > { %5609 = vst [vmem:[#allocation57_spill] sm:$0xff] %v4212_v14 }
 0x1c0   : > { %1287 = vrot.lane.b32.xlu2 %v3813_v16, %s3101_s29 }
 0x1c1   : > { %1285 = vrot.lane.b32.xlu1 %v3816_v35, %s3101_s29 }
 0x1c2   : > { %1283 = vrot.lane.b32.xlu0 %v5610_v27, %s3101_s29  ;;  %v4220_v24 = vpop.permute.xlu2 %1216 }
 0x1c3   : > { %v4222_v47 = vpop.permute.xlu1 %1196 }
 0x1c4   : > { %v1195_v21 = vpop.permute.xlu0 %1194 }
 0x1c8   : > { %1426 = vrot.lane.b32.xlu2 %v5568_v59, %s3102_s4 }
 0x1c9   : > { %1355 = vrot.lane.b32.xlu1 %v5502_v26, %s3103_s5 }
 0x1ca   : > { %1339 = vrot.lane.b32.xlu0 %v3392_v6, %s3103_s5  ;;  %v4230_v14 = vpop.permute.xlu2 %1222 }
 0x1cb   : > { %5611 = vst [vmem:[#allocation127_spill] sm:$0xff] %v4230_v14  ;;  %v4232_v27 = vpop.permute.xlu1 %1202  ;;  %v4249_v14 = vld [vmem:[%s3206_s20 + $0x78] sm:$0xff] }
 0x1cc   : > { %v1201_v41 = vpop.permute.xlu0 %1200  ;;  %5613 = vst [vmem:[#allocation129_spill] sm:$0xff] %v4249_v14 }
 0x1d0   : > { %1511 = vrot.lane.b32.xlu2 %v3816_v35, %s3104_s6  ;;  %v4254_v35 = vld [vmem:[%s3206_s20 + $0x28] sm:$0xff] }
 0x1d1   : > { %1495 = vrot.lane.b32.xlu1 %v5596_v48, %s3104_s6  ;;  %5614 = vst [vmem:[#allocation130_spill] sm:$0xff] %v4254_v35 }
 0x1d2   : > { %1442 = vrot.lane.b32.xlu0 %v3564_v40, %s3102_s4  ;;  %v4240_v59 = vpop.permute.xlu2 %1233 }
 0x1d3   : > { %5612 = vst [vmem:[#allocation128_spill] sm:$0xff] %v4240_v59  ;;  %v4242_v26 = vpop.permute.xlu1 %1208 }
 0x1d4   : > { %v4244_v6 = vpop.permute.xlu0 %1206 }
 0x1d8   : > { %1394 = vrot.lane.b32.xlu2 %v5531_v42, %s3102_s4 }
 0x1d9   : > { %1323 = vrot.lane.b32.xlu1 %v4249_v14, %s3103_s5 }
 0x1da   : > { %1307 = vrot.lane.b32.xlu0 %v4254_v35, %s3103_s5  ;;  %v4258_v40 = vpop.permute.xlu2 %1239 }
 0x1db   : > { %v4260_v48 = vpop.permute.xlu1 %1214 }
 0x1dc   : > { %v4262_v59 = vpop.permute.xlu0 %1212 }
 0x1e0   : > { %1479 = vrot.lane.b32.xlu2 %v3657_v56, %s3104_s6 }
 0x1e1   : > { %1463 = vrot.lane.b32.xlu1 %v3620_v29, %s3104_s6 }
 0x1e2   : > { %1410 = vrot.lane.b32.xlu0 %v5550_v7, %s3102_s4  ;;  %v4270_v42 = vpop.permute.xlu2 %1245 }
 0x1e3   : > { %5615 = vst [vmem:[#allocation131_spill] sm:$0xff] %v4270_v42  ;;  %v4272_v14 = vpop.permute.xlu1 %1220  ;;  %v2969_v42 = vld [vmem:[%s3206_s20 + $0x80] sm:$0xff] }
 0x1e4   : > { %v4274_v35 = vpop.permute.xlu0 %1218 }
 0x1e8   : > { %1428 = vrot.lane.b32.xlu2 %v5567_v3, %s3102_s4 }
 0x1e9   : > { %1357 = vrot.lane.b32.xlu1 %v5500_v4, %s3103_s5 }
 0x1ea   : > { %1341 = vrot.lane.b32.xlu0 %v3410_v23, %s3103_s5  ;;  %v4282_v29 = vpop.permute.xlu2 %1251 }
 0x1eb   : > { %v4284_v56 = vpop.permute.xlu1 %1226 }
 0x1ec   : > { %5616 = vst [vmem:[#allocation132_spill] sm:$0xff] %v4284_v56  ;;  %v4286_v7 = vpop.permute.xlu0 %1224  ;;  %v4301_v56 = vld [vmem:[%s3206_s20 + $0x94] sm:$0xff] }
 0x1ed   : > { %5617 = vst [vmem:[#allocation133_spill] sm:$0xff] %v4286_v7  ;;  %v4315_v7 = vld [vmem:[%s3206_s20 + $0x30] sm:$0xff] }
 0x1ee   : > { %5619 = vst [vmem:[#allocation135_spill] sm:$0xff] %v4315_v7 }
 0x1f0   : > { %1513 = vrot.lane.b32.xlu2 %v3813_v16, %s3104_s6  ;;  %v1559_v16 = vsel %vm1527_vm2, %v4301_v56, %v3807_v12 }
 0x1f1   : > { %1497 = vrot.lane.b32.xlu1 %v5603_v5, %s3104_s6  ;;  %v1624_v5 = vsel %vm1592_vm3, %v1559_v16, %v3900_v52 }
 0x1f2   : > { %1444 = vrot.lane.b32.xlu0 %v3559_v58, %s3102_s4  ;;  %v4294_v4 = vpop.permute.xlu2 %1257  ;;  %v1689_v58 = vsel %vm1657_vm4, %v1624_v5, %v4081_v32  ;;  %v4328_v5 = vld [vmem:[%s3206_s20 + $0xb4] sm:$0xff] }
 0x1f3   : > { %5618 = vst [vmem:[#allocation134_spill] sm:$0xff] %v4294_v4  ;;  %v4296_v23 = vpop.permute.xlu1 %1237  ;;  %v1754_v12 = vsel %vm1722_vm5, %v1689_v58, %v1195_v21  ;;  %v1565_v4 = vsel %vm1527_vm2, %v4328_v5, %v3829_v53 }
 0x1f4   : > { %v4298_v3 = vpop.permute.xlu0 %1235 }
 0x1f8   : > { %1396 = vrot.lane.b32.xlu2 %v5539_v37, %s3102_s4 }
 0x1f9   : > { %1325 = vrot.lane.b32.xlu1 %v2969_v42, %s3103_s5 }
 0x1fa   : > { %1309 = vrot.lane.b32.xlu0 %v4315_v7, %s3103_s5  ;;  %v1264_v52 = vpop.permute.xlu2 %1263  ;;  %v1630_v7 = vsel %vm1592_vm3, %v1565_v4, %v3912_v17 }
 0x1fb   : > { %v4320_v16 = vpop.permute.xlu1 %1243  ;;  %v4323_v37 = vsel %vm1787_vm6, %v1754_v12, %v1264_v52  ;;  %v1695_v21 = vsel %vm1657_vm4, %v1630_v7, %v4096_v20 }
 0x1fc   : > { %v4325_v32 = vpop.permute.xlu0 %1241  ;;  %v1760_v58 = vsel %vm1722_vm5, %v1695_v21, %v1201_v41  ;;  %v5620_v21 = vld [vmem:[#allocation48_spill] sm:$0xff] }
 0x200   : > { %1481 = vrot.lane.b32.xlu2 %v3688_v36, %s3104_s6  ;;  %v2972_v36 = vld [vmem:[%s3206_s20 + $0xd0] sm:$0xff] }
 0x201   : > { %1465 = vrot.lane.b32.xlu1 %v3617_v19, %s3104_s6  ;;  %v1571_v20 = vsel %vm1527_vm2, %v2972_v36, %v3844_v43 }
 0x202   : > { %1412 = vrot.lane.b32.xlu0 %v5549_v8, %s3102_s4  ;;  %v1270_v12 = vpop.permute.xlu2 %1269  ;;  %v1636_v19 = vsel %vm1592_vm3, %v1571_v20, %v3924_v30  ;;  %v4363_v8 = vld [vmem:[%s3206_s20 + $0xdc] sm:$0xff] }
 0x203   : > { %v4344_v53 = vpop.permute.xlu1 %1249  ;;  %v4347_v17 = vsel %vm1787_vm6, %v1760_v58, %v1270_v12  ;;  %v1701_v41 = vsel %vm1657_vm4, %v1636_v19, %v4114_v2  ;;  %v2974_v2 = vld [vmem:[%s3206_s20 + $0x8c] sm:$0xff]  ;;  %v5621_v58 = vld [vmem:[#allocation21_spill] sm:$0xff] }
 0x204   : > { %v4349_v4 = vpop.permute.xlu0 %1247  ;;  %v1766_v43 = vsel %vm1722_vm5, %v1701_v41, %v4244_v6  ;;  %v1555_v12 = vsel %vm1527_vm2, %v2969_v42, %v5621_v58 }
 0x205   : > { %v1620_v36 = vsel %vm1592_vm3, %v1555_v12, %v3940_v11 }
 0x206   : > { %v1685_v20 = vsel %vm1657_vm4, %v1620_v36, %v4026_v38  ;;  %v4408_v38 = vld [vmem:[%s3206_s20 + $0xa8] sm:$0xff] }
 0x207   : > { %v1750_v11 = vsel %vm1722_vm5, %v1685_v20, %v4210_v54 }
 0x208   : > { %1430 = vrot.lane.b32.xlu2 %v5566_v1, %s3102_s4 }
 0x209   : > { %1359 = vrot.lane.b32.xlu1 %v3546_v62, %s3103_s5  ;;  %v1557_v62 = vsel %vm1527_vm2, %v2974_v2, %v5620_v21  ;;  %v4414_v21 = vld [vmem:[%s3206_s20 + $0x10c] sm:$0xff] }
 0x20a   : > { %1343 = vrot.lane.b32.xlu0 %v4363_v8, %s3103_s5  ;;  %v1276_v7 = vpop.permute.xlu2 %1275  ;;  %v1622_v6 = vsel %vm1592_vm3, %v1557_v62, %v3938_v9 }
 0x20b   : > { %v4369_v52 = vpop.permute.xlu1 %1255  ;;  %v4372_v30 = vsel %vm1787_vm6, %v1766_v43, %v1276_v7  ;;  %v1687_v42 = vsel %vm1657_vm4, %v1622_v6, %v4083_v45  ;;  %v5622_v45 = vld [vmem:[#allocation54_spill] sm:$0xff]  ;;  %v2977_v6 = vld [vmem:[%s3206_s20 + $0x3c] sm:$0xff] }
 0x20c   : > { %v4374_v1 = vpop.permute.xlu0 %1253  ;;  %v1752_v9 = vsel %vm1722_vm5, %v1687_v42, %v4172_v13  ;;  %v1563_v7 = vsel %vm1527_vm2, %v4408_v38, %v5622_v45  ;;  %v1583_v13 = vsel %vm1527_vm2, %v4414_v21, %v3868_v0  ;;  %v2795_v0 = vld [vmem:[%s5328_s1 + $0x8] sm:$0xf]  ;;  %v3105_v42 = vmov 65535   ;;  %v5623_v45 = vld [vmem:[#allocation60_spill] sm:$0xff] }
 0x20d   : > { %v1628_v54 = vsel %vm1592_vm3, %v1563_v7, %v3950_v46  ;;  %v1648_v62 = vsel %vm1592_vm3, %v1583_v13, %v3948_v10  ;;  %v2873_v10 = vld [vmem:[%s5328_s1 + $0x8] sm:$0x30] }
 0x20e   : > { %v1693_v58 = vsel %vm1657_vm4, %v1628_v54, %v4098_v50  ;;  %v1713_v12 = vsel %vm1657_vm4, %v1648_v62, %v4138_v55  ;;  %v2796_v46 = vor.u32 %v2873_v10, %v2795_v0  ;;  %v2872_v54 = vld [vmem:[%s5328_s1] sm:$0xff] }
 0x20f   : > { %v1778_v50 = vsel %vm1722_vm5, %v1713_v12, %v4274_v35  ;;  %v1758_v55 = vsel %vm1722_vm5, %v1693_v58, %v4184_v22  ;;  %v4454_v22 = vld [vmem:[%s3206_s20 + $0xbc] sm:$0xff]  ;;  %v5624_v58 = vld [vmem:[#allocation95_spill] sm:$0xff] }
 0x210   : > { %1515 = vrot.lane.b32.xlu2 %v3810_v60, %s3104_s6  ;;  %v1567_v13 = vsel %vm1527_vm2, %v4454_v22, %v3827_v25  ;;  %v5626_v25 = vld [vmem:[#allocation28_spill] sm:$0xff] }
 0x211   : > { %1499 = vrot.lane.b32.xlu1 %v5602_v33, %s3104_s6  ;;  %v1632_v12 = vsel %vm1592_vm3, %v1567_v13, %v5624_v58  ;;  %v5632_v13 = vld [vmem:[#allocation106_spill] sm:$0xff] }
 0x212   : > { %1446 = vrot.lane.b32.xlu0 %v3583_v49, %s3102_s4  ;;  %v4395_v19 = vpop.permute.xlu2 %1281 }
 0x213   : > { %v1262_v41 = vpop.permute.xlu1 %1261 }
 0x214   : > { %v1260_v33 = vpop.permute.xlu0 %1259  ;;  %v4402_v43 = vsel %vm1787_vm6, %v1752_v9, %v1262_v41  ;;  %v2133_v9 = vsel %vm2131_vm7, 4294967295, %v3105_v42  ;;  %v5628_v42 = vld [vmem:[#allocation72_spill] sm:$0xff] }
 0x215   : > { %v4405_v49 = vsel %vm1787_vm6, %v1750_v11, %v1260_v33  ;;  %v2134_v41 = vsel %vm2132_vm8, %v2133_v9, 0  ;;  %v2978_v33 = vld [vmem:[%s3206_s20 + $0xc8] sm:$0xff] }
 0x216   : > { %v2136_v35 = vand.u32 %v2796_v46, %v2134_v41  ;;  %v1569_v7 = vsel %vm1527_vm2, %v2978_v33, %v5623_v45  ;;  %v5629_v9 = vld [vmem:[#allocation26_spill] sm:$0xff]  ;;  %v5630_v41 = vld [vmem:[#allocation8_spill] sm:$0xff] }
 0x217   : > { %v1634_v62 = vsel %vm1592_vm3, %v1569_v7, %v3968_v31  ;;  %v5631_v33 = vld [vmem:[#allocation6_spill] sm:$0xff]  ;;  %v2981_v7 = vld [vmem:[%s3206_s20 + $0x134] sm:$0xff] }
 0x218   : > { %1398 = vrot.lane.b32.xlu2 %v5538_v61, %s3102_s4  ;;  %2876 = vmatpush.bf16.msra.mxu2 %v2136_v35  ;;  %v1699_v0 = vsel %vm1657_vm4, %v1634_v62, %v4116_v63  ;;  %v2980_v63 = vld [vmem:[%s3206_s20 + $0xe4] sm:$0xff] }
 0x219   : > { %1327 = vrot.lane.b32.xlu1 %v2974_v2, %s3103_s5  ;;  %2877 = vmatpush.bf16.msra.mxu3 %v2136_v35  ;;  %v1764_v31 = vsel %vm1722_vm5, %v1699_v0, %v4196_v44 }
 0x21a   : > { %1311 = vrot.lane.b32.xlu0 %v2977_v6, %s3103_s5  ;;  %v1288_v61 = vpop.permute.xlu2 %1287  ;;  %2144 = vmatpush.bf16.msra.mxu0 %v2136_v35  ;;  %v5625_v6 = vld [vmem:[#allocation15_spill] sm:$0xff] }
 0x21b   : > { %v1268_v2 = vpop.permute.xlu1 %1267  ;;  %v4443_v36 = vsel %vm1787_vm6, %v1778_v50, %v1288_v61  ;;  %2875 = vmatpush.bf16.msra.mxu1 %v2136_v35 }
 0x21c   : > { %v4445_v20 = vpop.permute.xlu0 %1265  ;;  %v4448_v11 = vsel %vm1787_vm6, %v1758_v55, %v1268_v2  ;;  %2879 = vmatpush.bf16.msra.mxu2 %v2872_v54  ;;  %v5627_v2 = vld [vmem:[#allocation66_spill] sm:$0xff] }
 0x21d   : > { %2880 = vmatpush.bf16.msra.mxu3 %v2872_v54  ;;  %v1575_v44 = vsel %vm1527_vm2, %v2980_v63, %v5627_v2 }
 0x21e   : > { %2145 = vmatpush.bf16.msra.mxu0 %v2872_v54  ;;  %v1640_v35 = vsel %vm1592_vm3, %v1575_v44, %v5630_v41 }
 0x21f   : > { %2878 = vmatpush.bf16.msra.mxu1 %v2872_v54 }
 0x220   : > { %1483 = vrot.lane.b32.xlu2 %v3685_v39, %s3104_s6  ;;  %v1697_v39 = vsel %vm1657_vm4, %v1632_v12, %v5626_v25 }
 0x221   : > { %1467 = vrot.lane.b32.xlu1 %v3614_v15, %s3104_s6  ;;  %v1762_v15 = vsel %vm1722_vm5, %v1697_v39, %v4232_v27  ;;  %v1573_v27 = vsel %vm1527_vm2, %v4363_v8, %v5628_v42  ;;  %v1705_v8 = vsel %vm1657_vm4, %v1640_v35, %v4128_v18 }
 0x222   : > { %1414 = vrot.lane.b32.xlu0 %v5625_v6, %s3102_s4  ;;  %v4476_v10 = vpop.permute.xlu2 %1426  ;;  %v1638_v45 = vsel %vm1592_vm3, %v1573_v27, %v5631_v33  ;;  %v1770_v58 = vsel %vm1722_vm5, %v1705_v8, %v4208_v28  ;;  %v5634_v28 = vld [vmem:[#allocation30_spill] sm:$0xff]  ;;  %v5640_v8 = vld [vmem:[#allocation75_spill] sm:$0xff] }
 0x223   : > { %v1274_v50 = vpop.permute.xlu1 %1273  ;;  %v1703_v54 = vsel %vm1657_vm4, %v1638_v45, %v5632_v13  ;;  %v5638_v45 = vld [vmem:[#allocation91_spill] sm:$0xff] }
 0x224   : > { %v1272_v61 = vpop.permute.xlu0 %1271  ;;  %v4483_v46 = vsel %vm1787_vm6, %v1764_v31, %v1274_v50  ;;  %v1768_v12 = vsel %vm1722_vm5, %v1703_v54, %v4242_v26  ;;  %v4518_v31 = vld [vmem:[%s3206_s20 + $0x104] sm:$0xff]  ;;  %v5635_v26 = vld [vmem:[#allocation7_spill] sm:$0xff] }
 0x225   : > { %v4486_v55 = vsel %vm1787_vm6, %v1762_v15, %v1272_v61  ;;  %v5633_v15 = vld [vmem:[#allocation70_spill] sm:$0xff]  ;;  %v5639_v13 = vld [vmem:[#allocation103_spill] sm:$0xff] }
 0x226   : > { %v1581_v18 = vsel %vm1527_vm2, %v4518_v31, %v5633_v15 }
 0x227   : > { %v1646_v50 = vsel %vm1592_vm3, %v1581_v18, %v5635_v26  ;;  %v5642_v18 = vld [vmem:[#allocation116_spill] sm:$0xff] }
 0x228   : > { %1432 = vrot.lane.b32.xlu2 %v5629_v9, %s3102_s4  ;;  %v1711_v61 = vsel %vm1657_vm4, %v1646_v50, %v4140_v34  ;;  %v4551_v9 = vld [vmem:[%s3206_s20 + $0xa0] sm:$0xff] }
 0x229   : > { %1361 = vrot.lane.b32.xlu1 %v2981_v7, %s3103_s5  ;;  %v1776_v2 = vsel %vm1722_vm5, %v1711_v61, %v4220_v24  ;;  %v5637_v24 = vld [vmem:[#allocation27_spill] sm:$0xff] }
 0x22a   : > { %1345 = vrot.lane.b32.xlu0 %v2980_v63, %s3103_s5  ;;  %v1512_v62 = vpop.permute.xlu2 %1511  ;;  %v1561_v41 = vsel %vm1527_vm2, %v4551_v9, %v5637_v24  ;;  %v5643_v61 = vld [vmem:[#allocation47_spill] sm:$0xff] }
 0x22b   : > { %v1280_v6 = vpop.permute.xlu1 %1279  ;;  %v1626_v7 = vsel %vm1592_vm3, %v1561_v41, %v5638_v45 }
 0x22c   : > { %v1278_v25 = vpop.permute.xlu0 %1277  ;;  %v4512_v39 = vsel %vm1787_vm6, %v1770_v58, %v1280_v6  ;;  %v1691_v54 = vsel %vm1657_vm4, %v1626_v7, %v5639_v13  ;;  %v5641_v6 = vld [vmem:[#allocation90_spill] sm:$0xff]  ;;  %v5646_v7 = vld [vmem:[#allocation93_spill] sm:$0xff] }
 0x22d   : > { %v4515_v0 = vsel %vm1787_vm6, %v1768_v12, %v1278_v25  ;;  %v1756_v12 = vsel %vm1722_vm5, %v1691_v54, %v4222_v47  ;;  %v5644_v47 = vld [vmem:[#allocation40_spill] sm:$0xff]  ;;  %v5647_v13 = vld [vmem:[#allocation46_spill] sm:$0xff] }
 0x22e   : > { %v1821_v15 = vsel %vm1787_vm6, %v1756_v12, %v4445_v20  ;;  %v5648_v12 = vld [vmem:[#allocation71_spill] sm:$0xff] }
 0x230   : > { %1517 = vrot.lane.b32.xlu2 %v5634_v28, %s3104_s6 }
 0x231   : > { %1501 = vrot.lane.b32.xlu1 %v5601_v51, %s3104_s6  ;;  %v5636_v51 = vld [vmem:[#allocation10_spill] sm:$0xff] }
 0x232   : > { %1448 = vrot.lane.b32.xlu0 %v3580_v57, %s3102_s4  ;;  %v4533_v63 = vpop.permute.xlu2 %1394  ;;  %v2983_v57 = vld [vmem:[%s3206_s20 + $0x44] sm:$0xff] }
 0x233   : > { %v1286_v44 = vpop.permute.xlu1 %1285 }
 0x234   : > { %v4537_v42 = vpop.permute.xlu0 %1283  ;;  %v4540_v27 = vsel %vm1787_vm6, %v1776_v2, %v1286_v44  ;;  %v5645_v44 = vld [vmem:[#allocation20_spill] sm:$0xff] }
 0x238   : > { %1400 = vrot.lane.b32.xlu2 %v5636_v51, %s3102_s4 }
 0x239   : > { %1329 = vrot.lane.b32.xlu1 %v4301_v56, %s3103_s5  ;;  %v2985_v56 = vld [vmem:[%s3206_s20 + $0xf0] sm:$0xff] }
 0x23a   : > { %1313 = vrot.lane.b32.xlu0 %v2983_v57, %s3103_s5  ;;  %v4548_v34 = vpop.permute.xlu2 %1479  ;;  %v1577_v58 = vsel %vm1527_vm2, %v2985_v56, %v5640_v8 }
 0x23b   : > { %v1356_v35 = vpop.permute.xlu1 %1355  ;;  %v1642_v25 = vsel %vm1592_vm3, %v1577_v58, %v5641_v6  ;;  %v5649_v6 = vld [vmem:[#allocation17_spill] sm:$0xff] }
 0x23c   : > { %v1340_v33 = vpop.permute.xlu0 %1339  ;;  %v1707_v26 = vsel %vm1657_vm4, %v1642_v25, %v5642_v18  ;;  %v5650_v18 = vld [vmem:[#allocation41_spill] sm:$0xff] }
 0x23d   : > { %v1886_v50 = vsel %vm1852_vm9, %v1821_v15, %v1340_v33  ;;  %v1772_v2 = vsel %vm1722_vm5, %v1707_v26, %v4262_v59  ;;  %v2987_v15 = vld [vmem:[%s3206_s20 + $0x50] sm:$0xff] }
 0x23e   : > { %v1837_v20 = vsel %vm1787_vm6, %v1772_v2, %v4395_v19  ;;  %v1951_v59 = vsel %vm1917_vm10, %v1886_v50, %v4476_v10  ;;  %v5651_v26 = vld [vmem:[#allocation123_spill] sm:$0xff]  ;;  %v5652_v50 = vld [vmem:[#allocation86_spill] sm:$0xff]  ;;  %v5653_v2 = vld [vmem:[#allocation128_spill] sm:$0xff] }
 0x23f   : > { %v1902_v57 = vsel %vm1852_vm9, %v1837_v20, %v1356_v35  ;;  %v2986_v35 = vld [vmem:[%s3206_s20] sm:$0xff] }
 0x240   : > { %1485 = vrot.lane.b32.xlu2 %v5643_v61, %s3104_s6  ;;  %v1529_v54 = vsel %vm1527_vm2, %v2986_v35, %v5647_v13  ;;  %v1228_v13 = vrot.slane %v5646_v7, 1 }
 0x241   : > { %1469 = vrot.lane.b32.xlu1 %v5644_v47, %s3104_s6 }
 0x242   : > { %1416 = vrot.lane.b32.xlu0 %v5645_v44, %s3102_s4  ;;  %v4582_v51 = vpop.permute.xlu2 %1428  ;;  %v5654_v44 = vld [vmem:[#allocation22_spill] sm:$0xff] }
 0x243   : > { %v1496_v24 = vpop.permute.xlu1 %1495 }
 0x244   : > { %v1443_v41 = vpop.permute.xlu0 %1442  ;;  %v2016_v45 = vsel %vm1982_vm11, %v1951_v59, %v1496_v24  ;;  %v5655_v24 = vld [vmem:[#allocation63_spill] sm:$0xff] }
 0x245   : > { %v1967_v33 = vsel %vm1917_vm10, %v1902_v57, %v1443_v41  ;;  %2813 = vmatmul.msk.bf16.vlgmr.msra.gmra.mxu2 %vm2066_vm12, %v2016_v45  ;;  %v5656_v41 = vld [vmem:[#allocation118_spill] sm:$0xff] }
 0x246   : > { %v2032_v19 = vsel %vm1982_vm11, %v1967_v33, %v1512_v62  ;;  %v1594_v62 = vsel %vm1592_vm3, %v1529_v54, %v5648_v12  ;;  %v5657_v33 = vld [vmem:[#allocation113_spill] sm:$0xff]  ;;  %v5658_v45 = vld [vmem:[#allocation34_spill] sm:$0xff]  ;;  %v5659_v54 = vld [vmem:[#allocation92_spill] sm:$0xff] }
 0x247   : > { %2821 = vmatmul.msk.bf16.vlgmr.msra.gmra.mxu3 %vm2066_vm12, %v2032_v19  ;;  %v1659_v25 = vsel %vm1657_vm4, %v1594_v62, %v5649_v6 }
 0x248   : > { %1363 = vrot.lane.b32.xlu2 %v5646_v7, %s3103_s5 }
 0x249   : > { %1347 = vrot.lane.b32.xlu1 %v2985_v56, %s3103_s5  ;;  %v1545_v56 = vsel %vm1527_vm2, %v2987_v15, %v5650_v18 }
 0x24a   : > { %1289 = vrot.lane.b32.xlu0 %v3810_v60, %s3101_s29  ;;  %v1514_v10 = vpop.permute.xlu2 %1513  ;;  %v1724_v60 = vsel %vm1722_vm5, %v1659_v25, %v5651_v26  ;;  %v1610_v61 = vsel %vm1592_vm3, %v1545_v56, %v5652_v50 }
 0x24b   : > { %v1324_v8 = vpop.permute.xlu1 %1323  ;;  %v1789_v47 = vsel %vm1787_vm6, %v1724_v60, %v5653_v2  ;;  %v1675_v20 = vsel %vm1657_vm4, %v1610_v61, %v5654_v44  ;;  %v2988_v60 = vld [vmem:[%s3206_s20 + $0xf8] sm:$0xff] }
 0x24c   : > { %v1308_v58 = vpop.permute.xlu0 %1307  ;;  %v1740_v59 = vsel %vm1722_vm5, %v1675_v20, %v5656_v41  ;;  %v5661_v61 = vld [vmem:[#allocation96_spill] sm:$0xff] }
 0x24d   : > { %v1854_v57 = vsel %vm1852_vm9, %v1789_v47, %v1308_v58  ;;  %v1805_v19 = vsel %vm1787_vm6, %v1740_v59, %v4344_v53  ;;  %v1229_v58 = vrot.slane %v5659_v54, 1  ;;  %v5662_v47 = vld [vmem:[#allocation109_spill] sm:$0xff] }
 0x24e   : > { %v1870_v12 = vsel %vm1852_vm9, %v1805_v19, %v1324_v8  ;;  %v1919_v25 = vsel %vm1917_vm10, %v1854_v57, %v4533_v63  ;;  %v5664_v57 = vld [vmem:[#allocation19_spill] sm:$0xff] }
 0x24f   : > { %v4642_v7 = vsel %vm922_vm1, %v1228_v13, %v1229_v58 }
 0x250   : > { %1503 = vrot.lane.b32.xlu2 %v5655_v24, %s3104_s6  ;;  %v5665_v24 = vld [vmem:[#allocation9_spill] sm:$0xff] }
 0x251   : > { %1450 = vrot.lane.b32.xlu1 %v5657_v33, %s3102_s4 }
 0x252   : > { %1434 = vrot.lane.b32.xlu0 %v5658_v45, %s3102_s4  ;;  %v4626_v35 = vpop.permute.xlu2 %1396 }
 0x253   : > { %v1464_v62 = vpop.permute.xlu1 %1463 }
 0x254   : > { %v1411_v6 = vpop.permute.xlu0 %1410  ;;  %v1984_v56 = vsel %vm1982_vm11, %v1919_v25, %v1464_v62  ;;  %v2989_v62 = vld [vmem:[%s3206_s20 + $0x8] sm:$0xff] }
 0x255   : > { %v1935_v18 = vsel %vm1917_vm10, %v1870_v12, %v1411_v6  ;;  %2797 = vmatmul.msk.bf16.vlgmr.msra.gmra.mxu0 %vm2066_vm12, %v1984_v56  ;;  %v5667_v6 = vld [vmem:[#allocation50_spill] sm:$0xff] }
 0x256   : > { %v2000_v53 = vsel %vm1982_vm11, %v1935_v18, %v4548_v34  ;;  %v5660_v34 = vld [vmem:[#allocation74_spill] sm:$0xff]  ;;  %v1531_v25 = vsel %vm1527_vm2, %v2989_v62, %v5667_v6 }
 0x257   : > { %2805 = vmatmul.msk.bf16.vlgmr.msra.gmra.mxu1 %vm2066_vm12, %v2000_v53  ;;  %v1579_v50 = vsel %vm1527_vm2, %v2988_v60, %v5660_v34  ;;  %v5668_v53 = vld [vmem:[#allocation83_spill] sm:$0xff]  ;;  %v5670_v34 = vld [vmem:[#allocation62_spill] sm:$0xff] }
 0x258   : > { %1331 = vrot.lane.b32.xlu2 %v4551_v9, %s3103_s5  ;;  %v1644_v2 = vsel %vm1592_vm3, %v1579_v50, %v5661_v61  ;;  %v5671_v50 = vld [vmem:[#allocation122_spill] sm:$0xff] }
 0x259   : > { %1315 = vrot.lane.b32.xlu1 %v2987_v15, %s3103_s5  ;;  %v1709_v44 = vsel %vm1657_vm4, %v1644_v2, %v5662_v47  ;;  %v5663_v15 = vld [vmem:[#allocation39_spill] sm:$0xff]  ;;  %v5672_v2 = vld [vmem:[#allocation78_spill] sm:$0xff] }
 0x25a   : > { %1519 = vrot.lane.b32.xlu0 %v4642_v7, %s3104_s6  ;;  %v1482_v63 = vpop.permute.xlu2 %1481  ;;  %v1774_v20 = vsel %vm1722_vm5, %v1709_v44, %v4260_v48 }
 0x25b   : > { %v1358_v8 = vpop.permute.xlu1 %1357  ;;  %v1839_v41 = vsel %vm1787_vm6, %v1774_v20, %v4537_v42  ;;  %v5666_v42 = vld [vmem:[#allocation53_spill] sm:$0xff] }
 0x25c   : > { %v1342_v26 = vpop.permute.xlu0 %1341  ;;  %v1904_v33 = vsel %vm1852_vm9, %v1839_v41, %v1358_v8  ;;  %v5669_v8 = vld [vmem:[#allocation5_spill] sm:$0xff] }
 0x25d   : > { %v1888_v9 = vsel %vm1852_vm9, %v4448_v11, %v1342_v26 }
 0x25e   : > { %v1953_v19 = vsel %vm1917_vm10, %v1888_v9, %v4582_v51  ;;  %v5673_v9 = vld [vmem:[#allocation29_spill] sm:$0xff] }
 0x260   : > { %1471 = vrot.lane.b32.xlu2 %v5663_v15, %s3104_s6 }
 0x261   : > { %1418 = vrot.lane.b32.xlu1 %v5664_v57, %s3102_s4  ;;  %v5674_v57 = vld [vmem:[#allocation112_spill] sm:$0xff] }
 0x262   : > { %1402 = vrot.lane.b32.xlu0 %v5665_v24, %s3102_s4  ;;  %v1431_v59 = vpop.permute.xlu2 %1430  ;;  %v5675_v24 = vld [vmem:[#allocation65_spill] sm:$0xff] }
 0x263   : > { %v1498_v11 = vpop.permute.xlu1 %1497 }
 0x264   : > { %v1445_v45 = vpop.permute.xlu0 %1444  ;;  %v2018_v13 = vsel %vm1982_vm11, %v1953_v19, %v1498_v11 }
 0x265   : > { %v1969_v48 = vsel %vm1917_vm10, %v1904_v33, %v1445_v45  ;;  %2814 = vmatmul.msk.bf16.gmra.mxu2 %vm2066_vm12, %v2018_v13  ;;  %v5676_v33 = vld [vmem:[#allocation33_spill] sm:$0xff]  ;;  %v5677_v45 = vld [vmem:[#allocation110_spill] sm:$0xff] }
 0x266   : > { %v2034_v12 = vsel %vm1982_vm11, %v1969_v48, %v1514_v10  ;;  %v1596_v10 = vsel %vm1592_vm3, %v1531_v25, %v5668_v53  ;;  %v1231_v19 = vrot.slane %v5677_v45, 1 }
 0x267   : > { %2822 = vmatmul.msk.bf16.gmra.mxu3 %vm2066_vm12, %v2034_v12  ;;  %v1661_v26 = vsel %vm1657_vm4, %v1596_v10, %v5669_v8 }
 0x268   : > { %1349 = vrot.lane.b32.xlu2 %v2988_v60, %s3103_s5  ;;  %v2990_v60 = vld [vmem:[%s3206_s20 + $0x58] sm:$0xff]  ;;  %v1726_v61 = vsel %vm1722_vm5, %v1661_v26, %v5671_v50 }
 0x269   : > { %1291 = vrot.lane.b32.xlu1 %v5634_v28, %s3101_s29  ;;  %v1547_v28 = vsel %vm1527_vm2, %v2990_v60, %v5670_v34  ;;  %v1791_v44 = vsel %vm1787_vm6, %v1726_v61, %v4298_v3  ;;  %v2870_v50 = vld [vmem:[%s3206_s20 + $0x154] sm:$0xff] }
 0x26a   : > { %1487 = vrot.lane.b32.xlu0 %v5666_v42, %s3104_s6  ;;  %v1516_v51 = vpop.permute.xlu2 %1515  ;;  %v1612_v47 = vsel %vm1592_vm3, %v1547_v28, %v5672_v2  ;;  %v4757_v2 = vld [vmem:[%s3206_s20 + $0x15c] sm:$0xff] }
 0x26b   : > { %v1326_v18 = vpop.permute.xlu1 %1325  ;;  %v1677_v15 = vsel %vm1657_vm4, %v1612_v47, %v5673_v9  ;;  %v1377_v47 = vshll.u32 %v2870_v50, 16  ;;  %v5683_v9 = vld [vmem:[#allocation45_spill] sm:$0xff] }
 0x26c   : > { %v1310_v56 = vpop.permute.xlu0 %1309  ;;  %v1742_v41 = vsel %vm1722_vm5, %v1677_v15, %v5675_v24 }
 0x26d   : > { %v1856_v20 = vsel %vm1852_vm9, %v1791_v44, %v1310_v56  ;;  %v1807_v3 = vsel %vm1787_vm6, %v1742_v41, %v4282_v29  ;;  %v4724_v29 = vsel %vm922_vm1, %v1229_v58, %v1231_v19  ;;  %v5680_v58 = vld [vmem:[#allocation14_spill] sm:$0xff]  ;;  %v2991_v44 = vld [vmem:[%s3206_s20 + $0x14] sm:$0xff]  ;;  %v5685_v41 = vld [vmem:[#allocation61_spill] sm:$0xff] }
 0x26e   : > { %v1872_v48 = vsel %vm1852_vm9, %v1807_v3, %v1326_v18  ;;  %v1921_v42 = vsel %vm1917_vm10, %v1856_v20, %v4626_v35  ;;  %v5678_v35 = vld [vmem:[#allocation69_spill] sm:$0xff]  ;;  %v5686_v3 = vld [vmem:[#allocation102_spill] sm:$0xff]  ;;  %v5687_v19 = vld [vmem:[#allocation115_spill] sm:$0xff] }
 0x270   : > { %1452 = vrot.lane.b32.xlu2 %v5674_v57, %s3102_s4  ;;  %v5684_v57 = vld [vmem:[#allocation82_spill] sm:$0xff] }
 0x271   : > { %1436 = vrot.lane.b32.xlu1 %v5676_v33, %s3102_s4 }
 0x272   : > { %1365 = vrot.lane.b32.xlu0 %v5659_v54, %s3103_s5  ;;  %v4710_v11 = vpop.permute.xlu2 %1398  ;;  %v5679_v54 = vld [vmem:[#allocation18_spill] sm:$0xff] }
 0x273   : > { %v1466_v13 = vpop.permute.xlu1 %1465 }
 0x274   : > { %v1413_v12 = vpop.permute.xlu0 %1412  ;;  %v1986_v6 = vsel %vm1982_vm11, %v1921_v42, %v1466_v13  ;;  %v1375_v13 = vshrl.u32 %v2870_v50, 16  ;;  %v1382_v42 = vshll.u32 %v4757_v2, 16 }
 0x275   : > { %v1937_v62 = vsel %vm1917_vm10, %v1872_v48, %v1413_v12  ;;  %2798 = vmatmul.msk.bf16.gmra.mxu0 %vm2066_vm12, %v1986_v6  ;;  %v1379_v12 = vrot.slane %v1377_v47, 1 }
 0x276   : > { %v2002_v25 = vsel %vm1982_vm11, %v1937_v62, %v1482_v63  ;;  %v5688_v62 = vld [vmem:[#allocation89_spill] sm:$0xff] }
 0x277   : > { %2806 = vmatmul.msk.bf16.gmra.mxu1 %vm2066_vm12, %v2002_v25 }
 0x278   : > { %1317 = vrot.lane.b32.xlu2 %v2990_v60, %s3103_s5 }
 0x279   : > { %1521 = vrot.lane.b32.xlu1 %v4724_v29, %s3104_s6 }
 0x27a   : > { %1505 = vrot.lane.b32.xlu0 %v5678_v35, %s3104_s6  ;;  %v1484_v18 = vpop.permute.xlu2 %1483  ;;  %v5689_v35 = vld [vmem:[#allocation16_spill] sm:$0xff] }
 0x27b   : > { %v1360_v56 = vpop.permute.xlu1 %1359 }
 0x27c   : > { %v1344_v53 = vpop.permute.xlu0 %1343  ;;  %v1906_v8 = vsel %vm1852_vm9, %v4540_v27, %v1360_v56  ;;  %v5681_v27 = vld [vmem:[#allocation52_spill] sm:$0xff] }
 0x27d   : > { %v1890_v63 = vsel %vm1852_vm9, %v4347_v17, %v1344_v53 }
 0x27e   : > { %v1955_v17 = vsel %vm1917_vm10, %v1890_v63, %v1431_v59  ;;  %v5682_v59 = vld [vmem:[#allocation38_spill] sm:$0xff]  ;;  %v5690_v63 = vld [vmem:[#allocation32_spill] sm:$0xff] }
 0x280   : > { %1420 = vrot.lane.b32.xlu2 %v5679_v54, %s3102_s4  ;;  %v5691_v54 = vld [vmem:[#allocation64_spill] sm:$0xff] }
 0x281   : > { %1404 = vrot.lane.b32.xlu1 %v5680_v58, %s3102_s4 }
 0x282   : > { %1333 = vrot.lane.b32.xlu0 %v4408_v38, %s3103_s5  ;;  %v4739_v10 = vpop.permute.xlu2 %1432 }
 0x283   : > { %v1500_v26 = vpop.permute.xlu1 %1499 }
 0x284   : > { %v1447_v60 = vpop.permute.xlu0 %1446  ;;  %v2020_v28 = vsel %vm1982_vm11, %v1955_v17, %v1500_v26  ;;  %v1459_v26 = vrot.slane %v4757_v2, 1  ;;  %v1380_v17 = vor.u32 %v1379_v12, %v1375_v13 }
 0x285   : > { %v1971_v34 = vsel %vm1917_vm10, %v1906_v8, %v1447_v60  ;;  %2815 = vmatmul.msk.bf16.gmra.mxu2 %vm2066_vm12, %v2020_v28  ;;  %v1458_v8 = vrot.slane %v2870_v50, 1 }
 0x286   : > { %v2036_v38 = vsel %vm1982_vm11, %v1971_v34, %v1516_v51  ;;  %v1533_v51 = vsel %vm1527_vm2, %v2991_v44, %v5683_v9  ;;  %v1384_v34 = vrot.slane %v1382_v42, 1  ;;  %v2993_v42 = vld [vmem:[%s3206_s20 + $0x1c] sm:$0xff] }
 0x287   : > { %2823 = vmatmul.msk.bf16.gmra.mxu3 %vm2066_vm12, %v2036_v38  ;;  %v1598_v24 = vsel %vm1592_vm3, %v1533_v51, %v5684_v57 }
 0x288   : > { %1293 = vrot.lane.b32.xlu2 %v4642_v7, %s3101_s29  ;;  %v2992_v7 = vld [vmem:[%s3206_s20 + $0x64] sm:$0xff]  ;;  %v1663_v45 = vsel %vm1657_vm4, %v1598_v24, %v5686_v3  ;;  %v1385_v44 = vsel %vm537_vm0, %v1380_v17, %v1384_v34 }
 0x289   : > { %1489 = vrot.lane.b32.xlu1 %v5681_v27, %s3104_s6  ;;  %v1549_v33 = vsel %vm1527_vm2, %v2992_v7, %v5685_v41  ;;  %v1728_v48 = vsel %vm1722_vm5, %v1663_v45, %v5687_v19 }
 0x28a   : > { %1473 = vrot.lane.b32.xlu0 %v5682_v59, %s3104_s6  ;;  %v1518_v61 = vpop.permute.xlu2 %1517  ;;  %v1614_v6 = vsel %vm1592_vm3, %v1549_v33, %v5688_v62  ;;  %v1793_v25 = vsel %vm1787_vm6, %v1728_v48, %v4296_v23  ;;  %v5695_v48 = vld [vmem:[#allocation43_spill] sm:$0xff]  ;;  %v5697_v62 = vld [vmem:[#allocation49_spill] sm:$0xff] }
 0x28b   : > { %v1328_v15 = vpop.permute.xlu1 %1327  ;;  %v1679_v56 = vsel %vm1657_vm4, %v1614_v6, %v5689_v35  ;;  %v1535_v6 = vsel %vm1527_vm2, %v2993_v42, %v5697_v62  ;;  %v5698_v35 = vld [vmem:[#allocation73_spill] sm:$0xff]  ;;  %v5708_v42 = vld [vmem:[#allocation99_spill] sm:$0xff] }
 0x28c   : > { %v1312_v20 = vpop.permute.xlu0 %1311  ;;  %v1744_v58 = vsel %vm1722_vm5, %v1679_v56, %v5691_v54  ;;  %v1600_v56 = vsel %vm1592_vm3, %v1535_v6, %v5698_v35  ;;  %v2994_v54 = vld [vmem:[%s3206_s20 + $0x6c] sm:$0xff]  ;;  %v4903_v35 = vld [vmem:[%s5329_s2] ss:$0 sm:$0xff] }
 0x28d   : > { %v1858_v53 = vsel %vm1852_vm9, %v1793_v25, %v1312_v20  ;;  %v1809_v23 = vsel %vm1787_vm6, %v1744_v58, %v4374_v1  ;;  %v1460_v1 = vsel %vm922_vm1, %v1458_v8, %v1459_v26  ;;  %v5693_v20 = vld [vmem:[#allocation13_spill] sm:$0xff]  ;;  %v5700_v58 = vld [vmem:[#allocation44_spill] sm:$0xff]  ;;  %v5709_v62 = vld [vmem:[#allocation111_spill] sm:$0xff] }
 0x28e   : > { %v1874_v28 = vsel %vm1852_vm9, %v1809_v23, %v1328_v15  ;;  %v1923_v59 = vsel %vm1917_vm10, %v1858_v53, %v4710_v11  ;;  %v5692_v11 = vld [vmem:[#allocation68_spill] sm:$0xff]  ;;  %v5699_v53 = vld [vmem:[#allocation101_spill] sm:$0xff]  ;;  %v1551_v8 = vsel %vm1527_vm2, %v2994_v54, %v5700_v58 }
 0x28f   : > { %v5701_v23 = vld [vmem:[#allocation125_spill] sm:$0xff]  ;;  %v5712_v58 = vld [vmem:[#allocation12_spill] sm:$0xff] }
 0x290   : > { %1438 = vrot.lane.b32.xlu2 %v5690_v63, %s3102_s4  ;;  %v1665_v63 = vsel %vm1657_vm4, %v1600_v56, %v5699_v53 }
 0x291   : > { %1367 = vrot.lane.b32.xlu1 %v2870_v50, %s3103_s5  ;;  %v1730_v17 = vsel %vm1722_vm5, %v1665_v63, %v5701_v23  ;;  %v5710_v63 = vld [vmem:[#allocation42_spill] sm:$0xff] }
 0x292   : > { %1351 = vrot.lane.b32.xlu0 %v4518_v31, %s3103_s5  ;;  %v4789_v60 = vpop.permute.xlu2 %1400 }
 0x293   : > { %v1468_v38 = vpop.permute.xlu1 %1467 }
 0x294   : > { %v1415_v27 = vpop.permute.xlu0 %1414  ;;  %v1988_v31 = vsel %vm1982_vm11, %v1923_v59, %v1468_v38 }
 0x295   : > { %v1939_v47 = vsel %vm1917_vm10, %v1874_v28, %v1415_v27  ;;  %2799 = vmatmul.msk.bf16.gmra.mxu0 %vm2066_vm12, %v1988_v31  ;;  %v1386_v28 = vshrl.u32 %v4757_v2, 16  ;;  %v5702_v27 = vld [vmem:[#allocation88_spill] sm:$0xff] }
 0x296   : > { %v2004_v50 = vsel %vm1982_vm11, %v1939_v47, %v1484_v18  ;;  %v1616_v59 = vsel %vm1592_vm3, %v1551_v8, %v5702_v27  ;;  %v1795_v47 = vsel %vm1787_vm6, %v1730_v17, %v4258_v40  ;;  %v5703_v31 = vld [vmem:[#allocation108_spill] sm:$0xff] }
 0x297   : > { %2807 = vmatmul.msk.bf16.gmra.mxu1 %vm2066_vm12, %v2004_v50  ;;  %v1681_v50 = vsel %vm1657_vm4, %v1616_v59, %v5703_v31 }
 0x298   : > { %1523 = vrot.lane.b32.xlu2 %v1460_v1, %s3104_s6 }
 0x299   : > { %1507 = vrot.lane.b32.xlu1 %v5692_v11, %s3104_s6 }
 0x29a   : > { %1454 = vrot.lane.b32.xlu0 %v1385_v44, %s3102_s4  ;;  %v1486_v9 = vpop.permute.xlu2 %1485  ;;  %v5704_v44 = vld [vmem:[#allocation121_spill] sm:$0xff] }
 0x29b   : > { %v1362_v51 = vpop.permute.xlu1 %1361  ;;  %v1746_v11 = vsel %vm1722_vm5, %v1681_v50, %v5704_v44  ;;  %v5714_v44 = vld [vmem:[#allocation130_spill] sm:$0xff] }
 0x29c   : > { %v1346_v15 = vpop.permute.xlu0 %1345  ;;  %v1908_v24 = vsel %vm1852_vm9, %v4443_v36, %v1362_v51  ;;  %v5694_v36 = vld [vmem:[#allocation51_spill] sm:$0xff]  ;;  %v1811_v40 = vsel %vm1787_vm6, %v1746_v11, %v4369_v52 }
 0x29d   : > { %v1892_v18 = vsel %vm1852_vm9, %v4486_v55, %v1346_v15  ;;  %v328_v55 = vld [vmem:[%s3206_s20 + $0x164] sm:$0x1]  ;;  %v1388_v15 = vor.u32 %v1386_v28, %v1384_v34  ;;  %v5705_v34 = vld [vmem:[#allocation67_spill] sm:$0xff] }
 0x29e   : > { %v1957_v3 = vsel %vm1917_vm10, %v1892_v18, %v4739_v10  ;;  %v5696_v10 = vld [vmem:[#allocation24_spill] sm:$0xff] }
 0x2a0   : > { %1406 = vrot.lane.b32.xlu2 %v5693_v20, %s3102_s4 }
 0x2a1   : > { %1335 = vrot.lane.b32.xlu1 %v4328_v5, %s3103_s5 }
 0x2a2   : > { %1319 = vrot.lane.b32.xlu0 %v2992_v7, %s3103_s5  ;;  %v4814_v57 = vpop.permute.xlu2 %1363  ;;  %v1372_v7 = vunpack.c.l.b16 %v328_v55 }
 0x2a3   : > { %v1502_v41 = vpop.permute.xlu1 %1501 }
 0x2a4   : > { %v1449_v33 = vpop.permute.xlu0 %1448  ;;  %v2022_v19 = vsel %vm1982_vm11, %v1957_v3, %v1502_v41  ;;  %v1373_v12 = vpack.c.b16 %v1372_v7, %v1372_v7  ;;  %v2995_v7 = vld [vmem:[%s3206_s20 + $0x118] sm:$0xff] }
 0x2a5   : > { %v1973_v45 = vsel %vm1917_vm10, %v1908_v24, %v1449_v33  ;;  %2816 = vmatmul.msk.bf16.gmra.mxu2 %vm2066_vm12, %v2022_v19 }
 0x2a6   : > { %v2038_v5 = vsel %vm1982_vm11, %v1973_v45, %v1518_v61  ;;  %v1390_v38 = vshll.u32 %v1373_v12, 16  ;;  %v1461_v45 = vrot.slane %v1373_v12, 1 }
 0x2a7   : > { %2824 = vmatmul.msk.bf16.gmra.mxu3 %vm2066_vm12, %v2038_v5 }
 0x2a8   : > { %1491 = vrot.lane.b32.xlu2 %v5694_v36, %s3104_s6  ;;  %v1392_v18 = vrot.slane %v1390_v38, 1  ;;  %v5707_v36 = vld [vmem:[#allocation77_spill] sm:$0xff] }
 0x2a9   : > { %1475 = vrot.lane.b32.xlu1 %v5695_v48, %s3104_s6  ;;  %v1585_v48 = vsel %vm1527_vm2, %v2995_v7, %v5707_v36 }
 0x2aa   : > { %1422 = vrot.lane.b32.xlu0 %v5696_v10, %s3102_s4  ;;  %v1504_v13 = vpop.permute.xlu2 %1503 }
 0x2ab   : > { %v1330_v25 = vpop.permute.xlu1 %1329 }
 0x2ac   : > { %v1314_v61 = vpop.permute.xlu0 %1313  ;;  %v1876_v20 = vsel %vm1852_vm9, %v1811_v40, %v1330_v25  ;;  %v5715_v40 = vld [vmem:[#allocation85_spill] sm:$0xff] }
 0x2ad   : > { %v1860_v1 = vsel %vm1852_vm9, %v1795_v47, %v1314_v61 }
 0x2ae   : > { %v1925_v33 = vsel %vm1917_vm10, %v1860_v1, %v4789_v60  ;;  %v5706_v60 = vld [vmem:[#allocation35_spill] sm:$0xff]  ;;  %v5713_v1 = vld [vmem:[#allocation36_spill] sm:$0xff] }
 0x2af   : > { %v1537_v11 = vsel %vm1527_vm2, %v5714_v44, %v5713_v1 }
 0x2b0   : > { %1369 = vrot.lane.b32.xlu2 %v4757_v2, %s3103_s5 }
 0x2b1   : > { %1353 = vrot.lane.b32.xlu1 %v4414_v21, %s3103_s5 }
 0x2b2   : > { %1295 = vrot.lane.b32.xlu0 %v4724_v29, %s3101_s29  ;;  %v4862_v51 = vpop.permute.xlu2 %1331  ;;  %v1393_v29 = vsel %vm537_vm0, %v1388_v15, %v1392_v18  ;;  %s2643_s29 = sshll.u32 %s218_s28, 8  ;;  %v1602_v15 = vsel %vm1592_vm3, %v1537_v11, %v5715_v40 }
 0x2b3   : > { %v1470_v24 = vpop.permute.xlu1 %1469 }
 0x2b4   : > { %v1417_v41 = vpop.permute.xlu0 %1416  ;;  %v1990_v21 = vsel %vm1982_vm11, %v1925_v33, %v1470_v24  ;;  %v5717_v33 = vld [vmem:[#allocation59_spill] sm:$0xff] }
 0x2b5   : > { %v1941_v3 = vsel %vm1917_vm10, %v1876_v20, %v1417_v41  ;;  %2800 = vmatmul.msk.bf16.gmra.mxu0 %vm2066_vm12, %v1990_v21  ;;  %v5716_v20 = vld [vmem:[#allocation11_spill] sm:$0xff]  ;;  %v5718_v21 = vld [vmem:[#allocation124_spill] sm:$0xff] }
 0x2b6   : > { %v2006_v52 = vsel %vm1982_vm11, %v1941_v3, %v1486_v9  ;;  %v1462_v9 = vsel %vm922_vm1, %v1459_v26, %v1461_v45  ;;  %v1650_v26 = vsel %vm1592_vm3, %v1585_v48, %v5708_v42  ;;  %v1667_v24 = vsel %vm1657_vm4, %v1602_v15, %v5716_v20 }
 0x2b7   : > { %2808 = vmatmul.msk.bf16.gmra.mxu1 %vm2066_vm12, %v2006_v52  ;;  %v1715_v6 = vsel %vm1657_vm4, %v1650_v26, %v5709_v62  ;;  %v1732_v52 = vsel %vm1722_vm5, %v1667_v24, %v5718_v21  ;;  %v5719_v26 = vld [vmem:[#allocation25_spill] sm:$0xff] }
 0x2b8   : > { %1509 = vrot.lane.b32.xlu2 %v5705_v34, %s3104_s6 }
 0x2b9   : > { %1456 = vrot.lane.b32.xlu1 %v1393_v29, %s3102_s4 }
 0x2ba   : > { %1440 = vrot.lane.b32.xlu0 %v5706_v60, %s3102_s4  ;;  %v4878_v55 = vpop.permute.xlu2 %1471  ;;  %v1797_v60 = vsel %vm1787_vm6, %v1732_v52, %v4325_v32  ;;  %v5720_v32 = vld [vmem:[#allocation129_spill] sm:$0xff]  ;;  %v5727_v52 = vld [vmem:[#allocation120_spill] sm:$0xff] }
 0x2bb   : > { %v1348_v19 = vpop.permute.xlu1 %1347 }
 0x2bc   : > { %v1290_v5 = vpop.permute.xlu0 %1289  ;;  %v1894_v10 = vsel %vm1852_vm9, %v4483_v46, %v1348_v19  ;;  %v1780_v46 = vsel %vm1722_vm5, %v1715_v6, %v4272_v14 }
 0x2bd   : > { %v1845_v56 = vsel %vm1787_vm6, %v1780_v46, %v1290_v5  ;;  %v5721_v46 = vld [vmem:[#allocation81_spill] sm:$0xff] }
 0x2be   : > { %v1910_v8 = vsel %vm1852_vm9, %v1845_v56, %v4814_v57 }
 0x2c0   : > { %1337 = vrot.lane.b32.xlu2 %v4454_v22, %s3103_s5 }
 0x2c1   : > { %1321 = vrot.lane.b32.xlu1 %v2994_v54, %s3103_s5  ;;  %v5711_v54 = vld [vmem:[#allocation23_spill] sm:$0xff]  ;;  %s2832_s5 = sshll.u32 %s3083_s16, 7 }
 0x2c2   : > { %1525 = vrot.lane.b32.xlu0 %v1462_v9, %s3104_s6  ;;  %v4897_v25 = vpop.permute.xlu2 %1349 }
 0x2c3   : > { %v1451_v12 = vpop.permute.xlu1 %1450 }
 0x2c4   : > { %v1435_v2 = vpop.permute.xlu0 %1434  ;;  %v1975_v17 = vsel %vm1917_vm10, %v1910_v8, %v1451_v12  ;;  %v5724_v8 = vld [vmem:[#allocation134_spill] sm:$0xff] }
 0x2c5   : > { %v1959_v22 = vsel %vm1917_vm10, %v1894_v10, %v1435_v2 }
 0x2c6   : > { %v2024_v61 = vsel %vm1982_vm11, %v1959_v22, %v1504_v13  ;;  %v1553_v22 = vsel %vm1527_vm2, %v5720_v32, %v5719_v26 }
 0x2c7   : > { %2817 = vmatmul.msk.bf16.gmra.mxu2 %vm2066_vm12, %v2024_v61  ;;  %v1618_v56 = vsel %vm1592_vm3, %v1553_v22, %v5721_v46 }
 0x2c8   : > { %v2227_v53 = vpop.f32.mrf.mxu2  ;;  %1477 = vrot.lane.b32.xlu2 %v5710_v63, %s3104_s6  ;;  %v5722_v63 = vld [vmem:[#allocation107_spill] sm:$0xff] }
 0x2c9   : > { %v2228_v13 = vadd.f32 %v4903_v35, %v2227_v53  ;;  %1424 = vrot.lane.b32.xlu1 %v5711_v54, %s3102_s4 }
 0x2ca   : > { %1408 = vrot.lane.b32.xlu0 %v5712_v58, %s3102_s4  ;;  %v2267_v14 = vpop.f32.mrf.mxu3  ;;  %s4928_s4 = scalar_lea.vmem [#allocation2], %s2643_s29  ;;  %v4932_v57 = vpop.permute.xlu2 %1452  ;;  %v5723_v58 = vld [vmem:[#allocation57_spill] sm:$0xff] }
 0x2cb   : > { %v2268_v23 = vadd.f32 %v4903_v35, %v2267_v14  ;;  %v2339_v28 = vmax.f32 %v2228_v13, 0.0  ;;  %v1316_v38 = vpop.permute.xlu1 %1315  ;;  %v1683_v13 = vsel %vm1657_vm4, %v1618_v56, %v5722_v63  ;;  %s2517_s9 = sshll.u32 %s4928_s4, 4  ;;  %s2518_s9 = int_to_ptr.vmem [resolvable:$true] %s2517_s9 }
 0x2cc   : > { %v1520_v27 = vpop.permute.xlu0 %1519  ;;  %v1862_v7 = vsel %vm1852_vm9, %v1797_v60, %v1316_v38  ;;  %v1748_v14 = vsel %vm1722_vm5, %v1683_v13, %v5723_v58 }
 0x2cd   : > { %v2355_v59 = vmax.f32 %v2268_v23, 0.0  ;;  %v2040_v47 = vsel %vm1982_vm11, %v1975_v17, %v1520_v27  ;;  %v2403_v31 = vpack.c.bf16 %v2339_v28, %v2339_v28  ;;  %v1813_v23 = vsel %vm1787_vm6, %v1748_v14, %v5724_v8 }
 0x2ce   : > { %2825 = vmatmul.msk.bf16.gmra.mxu3 %vm2066_vm12, %v2040_v47  ;;  %v1878_v28 = vsel %vm1852_vm9, %v1813_v23, %v4862_v51  ;;  %v2996_v51 = vld [vmem:[%s3206_s20 + $0x120] sm:$0xff] }
 0x2cf   : > { %v2419_v50 = vpack.c.bf16 %v2355_v59, %v2355_v59  ;;  %2468 = vst.msk [vmem:[%s4928_s4 + $0x80] sm:$0xf] %vm2435_vm13, %v2403_v31 }
 0x2d0   : > { %v2229_v18 = vpop.f32.mrf.mxu2 }
 0x2d1   : > { %2484 = vst.msk [vmem:[%s4928_s4 + $0xc0] sm:$0xf] %vm2435_vm13, %v2419_v50  ;;  %v2230_v41 = vadd.f32 %v4903_v35, %v2229_v18  ;;  %v5725_v18 = vld [vmem:[#allocation31_spill] sm:$0xff] }
 0x2d2   : > { %1493 = vrot.lane.b32.xlu0 %v5717_v33, %s3104_s6  ;;  %v2269_v3 = vpop.f32.mrf.mxu3  ;;  %v2147_v34 = vpop.f32.mrf.mxu0  ;;  %v1587_v20 = vsel %vm1527_vm2, %v2996_v51, %v5725_v18  ;;  %v5726_v33 = vld [vmem:[#allocation98_spill] sm:$0xff] }
 0x2d3   : > { %v2270_v29 = vadd.f32 %v4903_v35, %v2269_v3  ;;  %v2340_v45 = vmax.f32 %v2230_v41, 0.0  ;;  %v2148_v19 = vadd.f32 %v4903_v35, %v2147_v34  ;;  %v1419_v5 = vpop.permute.xlu1 %1418  ;;  %v1652_v3 = vsel %vm1592_vm3, %v1587_v20, %v5726_v33  ;;  %v5728_v34 = vld [vmem:[#allocation127_spill] sm:$0xff]  ;;  %v5733_v20 = vld [vmem:[#allocation117_spill] sm:$0xff] }
 0x2d4   : > { %v2187_v9 = vpop.f32.mrf.mxu1  ;;  %v1403_v10 = vpop.permute.xlu0 %1402  ;;  %v1943_v47 = vsel %vm1917_vm10, %v1878_v28, %v1419_v5 }
 0x2d5   : > { %v2356_v36 = vmax.f32 %v2270_v29, 0.0  ;;  %v2188_v48 = vadd.f32 %v4903_v35, %v2187_v9  ;;  %v2404_v12 = vpack.c.bf16 %v2340_v45, %v2340_v45  ;;  %v2307_v2 = vmax.f32 %v2148_v19, 0.0 }
 0x2d6   : > { %v1927_v42 = vsel %vm1917_vm10, %v1862_v7, %v1403_v10  ;;  %v1717_v29 = vsel %vm1657_vm4, %v1652_v3, %v5727_v52 }
 0x2d7   : > { %v2420_v62 = vpack.c.bf16 %v2356_v36, %v2356_v36  ;;  %v2323_v6 = vmax.f32 %v2188_v48, 0.0  ;;  %v1992_v61 = vsel %vm1982_vm11, %v1927_v42, %v4878_v55  ;;  %2469 = vst.msk [vmem:[%s4928_s4 + $0x84] sm:$0xf] %vm2435_vm13, %v2404_v12  ;;  %v2371_v53 = vpack.c.bf16 %v2307_v2, %v2307_v2  ;;  %v4970_v55 = vpop.permute.xlu2 %1317 }
 0x2d8   : > { %2801 = vmatmul.msk.bf16.gmra.mxu0 %vm2066_vm12, %v1992_v61  ;;  %v1782_v60 = vsel %vm1722_vm5, %v1717_v29, %v5728_v34  ;;  %v1896_v48 = vsel %vm1852_vm9, %v4372_v30, %v4897_v25 }
 0x2d9   : > { %2485 = vst.msk [vmem:[%s4928_s4 + $0xc4] sm:$0xf] %vm2435_vm13, %v2420_v62  ;;  %v2387_v54 = vpack.c.bf16 %v2323_v6, %v2323_v6 }
 0x2da   : > { %2436 = vst.msk [vmem:[%s4928_s4] sm:$0xf] %vm2435_vm13, %v2371_v53  ;;  %v2149_v17 = vpop.f32.mrf.mxu0 }
 0x2db   : > { %2452 = vst.msk [vmem:[%s4928_s4 + $0x40] sm:$0xf] %vm2435_vm13, %v2387_v54  ;;  %v2150_v38 = vadd.f32 %v4903_v35, %v2149_v17  ;;  %v1292_v27 = vpop.permute.xlu1 %1291 }
 0x2dc   : > { %v2189_v59 = vpop.f32.mrf.mxu1  ;;  %v1488_v50 = vpop.permute.xlu0 %1487  ;;  %v1847_v45 = vsel %vm1787_vm6, %v1782_v60, %v1292_v27  ;;  %v5730_v27 = vld [vmem:[#allocation135_spill] sm:$0xff] }
 0x2dd   : > { %v2190_v31 = vadd.f32 %v4903_v35, %v2189_v59  ;;  %v2308_v1 = vmax.f32 %v2150_v38, 0.0  ;;  %v2008_v44 = vsel %vm1982_vm11, %v1943_v47, %v1488_v50  ;;  %v5729_v38 = vld [vmem:[#allocation37_spill] sm:$0xff]  ;;  %v5731_v50 = vld [vmem:[#allocation84_spill] sm:$0xff] }
 0x2de   : > { %2809 = vmatmul.msk.bf16.gmra.mxu1 %vm2066_vm12, %v2008_v44  ;;  %v1539_v59 = vsel %vm1527_vm2, %v5730_v27, %v5729_v38 }
 0x2df   : > { %v2324_v11 = vmax.f32 %v2190_v31, 0.0  ;;  %v2372_v40 = vpack.c.bf16 %v2308_v1, %v2308_v1  ;;  %v4990_v24 = vpop.permute.xlu2 %1420  ;;  %v1604_v1 = vsel %vm1592_vm3, %v1539_v59, %v5731_v50 }
 0x2e1   : > { %v2388_v15 = vpack.c.bf16 %v2324_v11, %v2324_v11  ;;  %2437 = vst.msk [vmem:[%s4928_s4 + $0x4] sm:$0xf] %vm2435_vm13, %v2372_v40  ;;  %v5732_v40 = vld [vmem:[#allocation105_spill] sm:$0xff] }
 0x2e3   : > { %2453 = vst.msk [vmem:[%s4928_s4 + $0x44] sm:$0xf] %vm2435_vm13, %v2388_v15  ;;  %v1437_v41 = vpop.permute.xlu1 %1436  ;;  %v1669_v15 = vsel %vm1657_vm4, %v1604_v1, %v5732_v40 }
 0x2e4   : > { %v1366_v21 = vpop.permute.xlu0 %1365  ;;  %v1961_v42 = vsel %vm1917_vm10, %v1896_v48, %v1437_v41  ;;  %v1734_v41 = vsel %vm1722_vm5, %v1669_v15, %v5733_v20 }
 0x2e5   : > { %v1912_v19 = vsel %vm1852_vm9, %v1847_v45, %v1366_v21  ;;  %v1799_v33 = vsel %vm1787_vm6, %v1734_v41, %v4320_v16  ;;  %v5739_v41 = vld [vmem:[#allocation76_spill] sm:$0xff] }
 0x2e6   : > { %v1977_v2 = vsel %vm1917_vm10, %v1912_v19, %v4932_v57  ;;  %v1864_v21 = vsel %vm1852_vm9, %v1799_v33, %v4970_v55 }
 0x2e7   : > { %v5009_v62 = vpop.permute.xlu2 %1293 }
 0x2e8   : > { %v2232_v5 = vpop.f32.mrf.mxu2 }
 0x2e9   : > { %v2233_v9 = vadd.f32 %v4903_v35, %v2232_v5 }
 0x2ea   : > { %v2272_v7 = vpop.f32.mrf.mxu3 }
 0x2eb   : > { %v2273_v36 = vadd.f32 %v4903_v35, %v2272_v7  ;;  %v2341_v10 = vmax.f32 %v2233_v9, 0.0  ;;  %v1522_v12 = vpop.permute.xlu1 %1521 }
 0x2ec   : > { %v1506_v32 = vpop.permute.xlu0 %1505  ;;  %v2042_v22 = vsel %vm1982_vm11, %v1977_v2, %v1522_v12  ;;  %v2997_v12 = vld [vmem:[%s3206_s20 + $0x12c] sm:$0xff]  ;;  %v5734_v2 = vld [vmem:[#allocation80_spill] sm:$0xff] }
 0x2ed   : > { %v2357_v26 = vmax.f32 %v2273_v36, 0.0  ;;  %v2405_v6 = vpack.c.bf16 %v2341_v10, %v2341_v10  ;;  %v2026_v61 = vsel %vm1982_vm11, %v1961_v42, %v1506_v32  ;;  %2826 = vmatmul.msk.bf16.gmra.mxu3 %vm2066_vm12, %v2042_v22  ;;  %v1589_v42 = vsel %vm1527_vm2, %v2997_v12, %v5734_v2 }
 0x2ee   : > { %2818 = vmatmul.msk.bf16.gmra.mxu2 %vm2066_vm12, %v2026_v61  ;;  %v5736_v61 = vld [vmem:[#allocation119_spill] sm:$0xff] }
 0x2ef   : > { %v2421_v46 = vpack.c.bf16 %v2357_v26, %v2357_v26  ;;  %2470 = vst.msk [vmem:[%s4928_s4 + $0x88] sm:$0xf] %vm2435_vm13, %v2405_v6  ;;  %v1439_v44 = vpop.permute.xlu2 %1438  ;;  %v5735_v26 = vld [vmem:[#allocation94_spill] sm:$0xff] }
 0x2f0   : > { %v2234_v30 = vpop.f32.mrf.mxu2  ;;  %v1654_v32 = vsel %vm1592_vm3, %v1589_v42, %v5735_v26 }
 0x2f1   : > { %2486 = vst.msk [vmem:[%s4928_s4 + $0xc8] sm:$0xf] %vm2435_vm13, %v2421_v46  ;;  %v2235_v25 = vadd.f32 %v4903_v35, %v2234_v30  ;;  %v1719_v46 = vsel %vm1657_vm4, %v1654_v32, %v5736_v61 }
 0x2f2   : > { %v2274_v57 = vpop.f32.mrf.mxu3  ;;  %v2152_v53 = vpop.f32.mrf.mxu0 }
 0x2f3   : > { %v2275_v56 = vadd.f32 %v4903_v35, %v2274_v57  ;;  %v2342_v63 = vmax.f32 %v2235_v25, 0.0  ;;  %v2153_v13 = vadd.f32 %v4903_v35, %v2152_v53  ;;  %v1405_v54 = vpop.permute.xlu1 %1404  ;;  %v5737_v57 = vld [vmem:[#allocation133_spill] sm:$0xff] }
 0x2f4   : > { %v2192_v58 = vpop.f32.mrf.mxu1  ;;  %v1334_v23 = vpop.permute.xlu0 %1333  ;;  %v1929_v60 = vsel %vm1917_vm10, %v1864_v21, %v1405_v54 }
 0x2f5   : > { %v2358_v14 = vmax.f32 %v2275_v56, 0.0  ;;  %v2193_v8 = vadd.f32 %v4903_v35, %v2192_v58  ;;  %v2406_v17 = vpack.c.bf16 %v2342_v63, %v2342_v63  ;;  %v2309_v28 = vmax.f32 %v2153_v13, 0.0 }
 0x2f6   : > { %v1880_v18 = vsel %vm1852_vm9, %v4405_v49, %v1334_v23  ;;  %v1784_v56 = vsel %vm1722_vm5, %v1719_v46, %v5737_v57 }
 0x2f7   : > { %v2422_v47 = vpack.c.bf16 %v2358_v14, %v2358_v14  ;;  %v2325_v31 = vmax.f32 %v2193_v8, 0.0  ;;  %2471 = vst.msk [vmem:[%s4928_s4 + $0x8c] sm:$0xf] %vm2435_vm13, %v2406_v17  ;;  %v2373_v11 = vpack.c.bf16 %v2309_v28, %v2309_v28  ;;  %v1945_v34 = vsel %vm1917_vm10, %v1880_v18, %v4990_v24  ;;  %v1524_v48 = vpop.permute.xlu2 %1523 }
 0x2f8   : > { %v1849_v63 = vsel %vm1787_vm6, %v1784_v56, %v5009_v62 }
 0x2f9   : > { %2487 = vst.msk [vmem:[%s4928_s4 + $0xcc] sm:$0xf] %vm2435_vm13, %v2422_v47  ;;  %v2389_v51 = vpack.c.bf16 %v2325_v31, %v2325_v31 }
 0x2fa   : > { %2438 = vst.msk [vmem:[%s4928_s4 + $0x8] sm:$0xf] %vm2435_vm13, %v2373_v11  ;;  %v2154_v3 = vpop.f32.mrf.mxu0  ;;  %v5738_v11 = vld [vmem:[#allocation56_spill] sm:$0xff] }
 0x2fb   : > { %2454 = vst.msk [vmem:[%s4928_s4 + $0x48] sm:$0xf] %vm2435_vm13, %v2389_v51  ;;  %v2155_v52 = vadd.f32 %v4903_v35, %v2154_v3  ;;  %v1490_v29 = vpop.permute.xlu1 %1489 }
 0x2fc   : > { %v2194_v49 = vpop.f32.mrf.mxu1  ;;  %v1474_v45 = vpop.permute.xlu0 %1473  ;;  %v2010_v19 = vsel %vm1982_vm11, %v1945_v34, %v1490_v29  ;;  %v5740_v29 = vld [vmem:[#allocation104_spill] sm:$0xff] }
 0x2fd   : > { %v2195_v16 = vadd.f32 %v4903_v35, %v2194_v49  ;;  %v2310_v5 = vmax.f32 %v2155_v52, 0.0  ;;  %v1994_v55 = vsel %vm1982_vm11, %v1929_v60, %v1474_v45  ;;  %2810 = vmatmul.msk.bf16.gmra.mxu1 %vm2066_vm12, %v2010_v19  ;;  %v5741_v45 = vld [vmem:[#allocation126_spill] sm:$0xff] }
 0x2fe   : > { %2802 = vmatmul.msk.bf16.gmra.mxu0 %vm2066_vm12, %v1994_v55 }
 0x2ff   : > { %v2326_v9 = vmax.f32 %v2195_v16, 0.0  ;;  %v2374_v7 = vpack.c.bf16 %v2310_v5, %v2310_v5  ;;  %v1407_v13 = vpop.permute.xlu2 %1406 }
 0x301   : > { %v2390_v36 = vpack.c.bf16 %v2326_v9, %v2326_v9  ;;  %2439 = vst.msk [vmem:[%s4928_s4 + $0xc] sm:$0xf] %vm2435_vm13, %v2374_v7  ;;  %v5742_v9 = vld [vmem:[#allocation131_spill] sm:$0xff] }
 0x303   : > { %2455 = vst.msk [vmem:[%s4928_s4 + $0x4c] sm:$0xf] %vm2435_vm13, %v2390_v36  ;;  %v1368_v24 = vpop.permute.xlu1 %1367 }
 0x304   : > { %v1352_v10 = vpop.permute.xlu0 %1351  ;;  %v1914_v14 = vsel %vm1852_vm9, %v1849_v63, %v1368_v24 }
 0x305   : > { %v1898_v22 = vsel %vm1852_vm9, %v4515_v0, %v1352_v10 }
 0x306   : > { %v1963_v58 = vsel %vm1917_vm10, %v1898_v22, %v1439_v44  ;;  %v2998_v44 = vld [vmem:[%s3206_s20 + $0x3c] sm:$0xff] }
 0x307   : > { %v1541_v40 = vsel %vm1527_vm2, %v2998_v44, %v5738_v11  ;;  %v1492_v34 = vpop.permute.xlu2 %1491  ;;  %v5745_v11 = vld [vmem:[#allocation114_spill] sm:$0xff] }
 0x308   : > { %v2237_v6 = vpop.f32.mrf.mxu2  ;;  %v1606_v33 = vsel %vm1592_vm3, %v1541_v40, %v5739_v41 }
 0x309   : > { %v2238_v30 = vadd.f32 %v4903_v35, %v2237_v6  ;;  %v1671_v49 = vsel %vm1657_vm4, %v1606_v33, %v5740_v29 }
 0x30a   : > { %v2277_v25 = vpop.f32.mrf.mxu3  ;;  %v1736_v19 = vsel %vm1722_vm5, %v1671_v49, %v5741_v45 }
 0x30b   : > { %v2278_v53 = vadd.f32 %v4903_v35, %v2277_v25  ;;  %v2343_v54 = vmax.f32 %v2238_v30, 0.0  ;;  %v1508_v0 = vpop.permute.xlu1 %1507  ;;  %v1801_v7 = vsel %vm1787_vm6, %v1736_v19, %v5742_v9 }
 0x30c   : > { %v1455_v23 = vpop.permute.xlu0 %1454  ;;  %v2028_v17 = vsel %vm1982_vm11, %v1963_v58, %v1508_v0 }
 0x30d   : > { %v2359_v8 = vmax.f32 %v2278_v53, 0.0  ;;  %v2407_v28 = vpack.c.bf16 %v2343_v54, %v2343_v54  ;;  %v1979_v38 = vsel %vm1917_vm10, %v1914_v14, %v1455_v23  ;;  %2819 = vmatmul.msk.bf16.gmra.mxu2 %vm2066_vm12, %v2028_v17  ;;  %v2999_v17 = vld [vmem:[%s3206_s20 + $0x134] sm:$0xff] }
 0x30e   : > { %v2044_v62 = vsel %vm1982_vm11, %v1979_v38, %v1524_v48 }
 0x30f   : > { %v2423_v27 = vpack.c.bf16 %v2359_v8, %v2359_v8  ;;  %2472 = vst.msk [vmem:[%s4928_s4 + $0x90] sm:$0xf] %vm2435_vm13, %v2407_v28  ;;  %2827 = vmatmul.msk.bf16.gmra.mxu3 %vm2066_vm12, %v2044_v62  ;;  %v1370_v56 = vpop.permute.xlu2 %1369  ;;  %v5743_v28 = vld [vmem:[#allocation79_spill] sm:$0xff] }
 0x310   : > { %v2239_v59 = vpop.f32.mrf.mxu2  ;;  %v1591_v38 = vsel %vm1527_vm2, %v2999_v17, %v5743_v28 }
 0x311   : > { %2488 = vst.msk [vmem:[%s4928_s4 + $0xd0] sm:$0xf] %vm2435_vm13, %v2423_v27  ;;  %v2240_v47 = vadd.f32 %v4903_v35, %v2239_v59 }
 0x312   : > { %v2279_v31 = vpop.f32.mrf.mxu3  ;;  %v2157_v1 = vpop.f32.mrf.mxu0 }
 0x313   : > { %v2280_v50 = vadd.f32 %v4903_v35, %v2279_v31  ;;  %v2344_v15 = vmax.f32 %v2240_v47, 0.0  ;;  %v2158_v51 = vadd.f32 %v4903_v35, %v2157_v1  ;;  %v1336_v18 = vpop.permute.xlu1 %1335  ;;  %v5744_v47 = vld [vmem:[#allocation100_spill] sm:$0xff] }
 0x314   : > { %v2197_v20 = vpop.f32.mrf.mxu1  ;;  %v1320_v52 = vpop.permute.xlu0 %1319  ;;  %v1882_v32 = vsel %vm1852_vm9, %v4402_v43, %v1336_v18  ;;  %v1656_v31 = vsel %vm1592_vm3, %v1591_v38, %v5744_v47  ;;  %v5746_v18 = vld [vmem:[#allocation132_spill] sm:$0xff] }
 0x315   : > { %v2360_v3 = vmax.f32 %v2280_v50, 0.0  ;;  %v2198_v21 = vadd.f32 %v4903_v35, %v2197_v20  ;;  %v2408_v60 = vpack.c.bf16 %v2344_v15, %v2344_v15  ;;  %v2311_v16 = vmax.f32 %v2158_v51, 0.0 }
 0x316   : > { %v1866_v24 = vsel %vm1852_vm9, %v1801_v7, %v1320_v52  ;;  %v1721_v40 = vsel %vm1657_vm4, %v1656_v31, %v5745_v11 }
 0x317   : > { %v2424_v5 = vpack.c.bf16 %v2360_v3, %v2360_v3  ;;  %v2327_v55 = vmax.f32 %v2198_v21, 0.0  ;;  %2473 = vst.msk [vmem:[%s4928_s4 + $0x94] sm:$0xf] %vm2435_vm13, %v2408_v60  ;;  %v2375_v36 = vpack.c.bf16 %v2311_v16, %v2311_v16  ;;  %v1931_v26 = vsel %vm1917_vm10, %v1866_v24, %v1407_v13  ;;  %v1510_v0 = vpop.permute.xlu2 %1509 }
 0x318   : > { %v1786_v20 = vsel %vm1722_vm5, %v1721_v40, %v5746_v18 }
 0x319   : > { %2489 = vst.msk [vmem:[%s4928_s4 + $0xd4] sm:$0xf] %vm2435_vm13, %v2424_v5  ;;  %v2391_v48 = vpack.c.bf16 %v2327_v55, %v2327_v55 }
 0x31a   : > { %2440 = vst.msk [vmem:[%s4928_s4 + $0x10] sm:$0xf] %vm2435_vm13, %v2375_v36  ;;  %v2159_v10 = vpop.f32.mrf.mxu0 }
 0x31b   : > { %2456 = vst.msk [vmem:[%s4928_s4 + $0x50] sm:$0xf] %vm2435_vm13, %v2391_v48  ;;  %v2160_v12 = vadd.f32 %v4903_v35, %v2159_v10  ;;  %v1476_v2 = vpop.permute.xlu1 %1475  ;;  %v3000_v10 = vld [vmem:[%s3206_s20 + $0x44] sm:$0xff]  ;;  %s2874_s20 = sshll.u32 %s3079_s15, 6 }
 0x31c   : > { %v2199_v42 = vpop.f32.mrf.mxu1  ;;  %v1423_v6 = vpop.permute.xlu0 %1422  ;;  %v1996_v61 = vsel %vm1982_vm11, %v1931_v26, %v1476_v2  ;;  %s2514_s6 = sadd.s32 %s2874_s20, %s2832_s5  ;;  %s3021_s20 = scalar_lea.hbm %s5330_s3, 1024 }
 0x31d   : > { %v2200_v22 = vadd.f32 %v4903_v35, %v2199_v42  ;;  %v2312_v46 = vmax.f32 %v2160_v12, 0.0  ;;  %v1947_v30 = vsel %vm1917_vm10, %v1882_v32, %v1423_v6  ;;  %2803 = vmatmul.msk.bf16.gmra.mxu0 %vm2066_vm12, %v1996_v61  ;;  %v5747_v12 = vld [vmem:[#allocation55_spill] sm:$0xff]  ;;  %v5749_v61 = vld [vmem:[#allocation97_spill] sm:$0xff]  ;;  %s2833_s15 = sshll.u32 %s2514_s6, 2 }
 0x31e   : > { %v2012_v57 = vsel %vm1982_vm11, %v1947_v30, %v1492_v34  ;;  %v1543_v2 = vsel %vm1527_vm2, %v3000_v10, %v5747_v12  ;;  %v5748_v32 = vld [vmem:[#allocation87_spill] sm:$0xff]  ;;  %v5750_v30 = vld [vmem:[#allocation58_spill] sm:$0xff]  ;;  %s2516_s8 = scalar_lea.hbm %s5330_s3, %s2833_s15 }
 0x31f   : > { %v2328_v25 = vmax.f32 %v2200_v22, 0.0  ;;  %v2376_v53 = vpack.c.bf16 %v2312_v46, %v2312_v46  ;;  %2811 = vmatmul.msk.bf16.gmra.mxu1 %vm2066_vm12, %v2012_v57  ;;  %v1338_v29 = vpop.permute.xlu2 %1337  ;;  %v1608_v22 = vsel %vm1592_vm3, %v1543_v2, %v5748_v32  ;;  %s2519_s10 = sshll.u32 %s2516_s8, 4  ;;  %s2520_s10 = int_to_ptr.hbm [resolvable:$true] %s2519_s10 }
 0x320   : > { %v1673_v46 = vsel %vm1657_vm4, %v1608_v22, %v5749_v61  ;;  %v1884_v38 = vsel %vm1852_vm9, %v4323_v37, %v1338_v29  ;;  %s3015_s21 = sshra.s32 %s2520_s10, 4  ;;  %s3016_s21 = int_to_ptr.hbm [resolvable:$true] %s3015_s21 }
 0x321   : > { %v2392_v63 = vpack.c.bf16 %v2328_v25, %v2328_v25  ;;  %2441 = vst.msk [vmem:[%s4928_s4 + $0x14] sm:$0xf] %vm2435_vm13, %v2376_v53  ;;  %v1738_v25 = vsel %vm1722_vm5, %v1673_v46, %v5750_v30  ;;  %s3017_s24 = scalar_lea.hbm %s3016_s21, 256  ;;  %p3022_p4 = scmp.lt.s32.totalorder %s3016_s21, %s5330_s3 }
 0x322   : > { %p3018_p0 = scmp.ne.s32.totalorder %s3016_s21, %s3017_s24  ;;  %p3023_p5 = scmp.lt.s32.totalorder %s3021_s20, %s3017_s24 }
 0x323   : > { %2457 = vst.msk [vmem:[%s4928_s4 + $0x54] sm:$0xf] %vm2435_vm13, %v2392_v63  ;;  %v1354_v43 = vpop.permute.xlu1 %1353 }
 0x324   : > { %v1296_v13 = vpop.permute.xlu0 %1295  ;;  %v1900_v27 = vsel %vm1852_vm9, %v4512_v39, %v1354_v43  ;;  %p3019_p1 = pnand %p3018_p0, %p3179_p3  ;;  %p3024_p6 = por %p3023_p5, %p3022_p4 }
 0x325   : > { %v1851_v39 = vsel %vm1787_vm6, %v1786_v20, %v1296_v13 }
 0x326   : > { %v1916_v49 = vsel %vm1852_vm9, %v1851_v39, %v1370_v56  ;;  %v1803_v56 = vsel %vm1787_vm6, %v1738_v25, %v4349_v4  ;;  %p3020_p2 = pneg %p3019_p1 }
 0x327   : > { %v1478_v43 = vpop.permute.xlu2 %1477 }
 0x328   : > { %v2242_v54 = vpop.f32.mrf.mxu2  ;;  %p3025_p7 = pnand %p3024_p6, %p3020_p2 }
 0x329   : > { %v2243_v58 = vadd.f32 %v4903_v35, %v2242_v54 }
 0x32a   : > { %v2282_v14 = vpop.f32.mrf.mxu3 }
 0x32b   : > { %v2283_v8 = vadd.f32 %v4903_v35, %v2282_v14  ;;  %v2345_v23 = vmax.f32 %v2243_v58, 0.0  ;;  %v1457_v1 = vpop.permute.xlu1 %1456 }
 0x32c   : > { %v1441_v59 = vpop.permute.xlu0 %1440  ;;  %v1981_v45 = vsel %vm1917_vm10, %v1916_v49, %v1457_v1 }
 0x32d   : > { %v2361_v62 = vmax.f32 %v2283_v8, 0.0  ;;  %v2409_v50 = vpack.c.bf16 %v2345_v23, %v2345_v23  ;;  %v1965_v44 = vsel %vm1917_vm10, %v1900_v27, %v1441_v59 }
 0x32e   : > { %v2030_v51 = vsel %vm1982_vm11, %v1965_v44, %v1510_v0 }
 0x32f   : > { %v2425_v15 = vpack.c.bf16 %v2361_v62, %v2361_v62  ;;  %2474 = vst.msk [vmem:[%s4928_s4 + $0x98] sm:$0xf] %vm2435_vm13, %v2409_v50  ;;  %2820 = vmatmul.msk.bf16.gmra.mxu2 %vm2066_vm12, %v2030_v51 }
 0x330   : > { %v2244_v41 = vpop.f32.mrf.mxu2 }
 0x331   : > { %2490 = vst.msk [vmem:[%s4928_s4 + $0xd8] sm:$0xf] %vm2435_vm13, %v2425_v15  ;;  %v2245_v33 = vadd.f32 %v4903_v35, %v2244_v41 }
 0x332   : > { %v2284_v3 = vpop.f32.mrf.mxu3  ;;  %v2162_v52 = vpop.f32.mrf.mxu0 }
 0x333   : > { %v2285_v21 = vadd.f32 %v4903_v35, %v2284_v3  ;;  %v2346_v34 = vmax.f32 %v2245_v33, 0.0  ;;  %v2163_v60 = vadd.f32 %v4903_v35, %v2162_v52  ;;  %v1322_v26 = vpop.permute.xlu1 %1321 }
 0x334   : > { %v2202_v16 = vpop.f32.mrf.mxu1  ;;  %v1526_v55 = vpop.permute.xlu0 %1525  ;;  %v1868_v13 = vsel %vm1852_vm9, %v1803_v56, %v1322_v26 }
 0x335   : > { %v2362_v19 = vmax.f32 %v2285_v21, 0.0  ;;  %v2203_v5 = vadd.f32 %v4903_v35, %v2202_v16  ;;  %v2410_v9 = vpack.c.bf16 %v2346_v34, %v2346_v34  ;;  %v2313_v7 = vmax.f32 %v2163_v60, 0.0 }
 0x336   : > { %v2046_v36 = vsel %vm1982_vm11, %v1981_v45, %v1526_v55 }
 0x337   : > { %v2426_v48 = vpack.c.bf16 %v2362_v19, %v2362_v19  ;;  %v2329_v24 = vmax.f32 %v2203_v5, 0.0  ;;  %2828 = vmatmul.msk.bf16.gmra.mxu3 %vm2066_vm12, %v2046_v36  ;;  %2475 = vst.msk [vmem:[%s4928_s4 + $0x9c] sm:$0xf] %vm2435_vm13, %v2410_v9  ;;  %v2377_v42 = vpack.c.bf16 %v2313_v7, %v2313_v7 }
 0x339   : > { %2491 = vst.msk [vmem:[%s4928_s4 + $0xdc] sm:$0xf] %vm2435_vm13, %v2426_v48  ;;  %v2393_v6 = vpack.c.bf16 %v2329_v24, %v2329_v24 }
 0x33a   : > { %2442 = vst.msk [vmem:[%s4928_s4 + $0x18] sm:$0xf] %vm2435_vm13, %v2377_v42  ;;  %v2164_v57 = vpop.f32.mrf.mxu0 }
 0x33b   : > { %2458 = vst.msk [vmem:[%s4928_s4 + $0x58] sm:$0xf] %vm2435_vm13, %v2393_v6  ;;  %v2165_v53 = vadd.f32 %v4903_v35, %v2164_v57  ;;  %v1425_v28 = vpop.permute.xlu1 %1424 }
 0x33c   : > { %v2204_v63 = vpop.f32.mrf.mxu1  ;;  %v1409_v0 = vpop.permute.xlu0 %1408  ;;  %v1949_v27 = vsel %vm1917_vm10, %v1884_v38, %v1425_v28 }
 0x33d   : > { %v2205_v54 = vadd.f32 %v4903_v35, %v2204_v63  ;;  %v2314_v58 = vmax.f32 %v2165_v53, 0.0  ;;  %v1933_v14 = vsel %vm1917_vm10, %v1868_v13, %v1409_v0 }
 0x33e   : > { %v1998_v23 = vsel %vm1982_vm11, %v1933_v14, %v1478_v43 }
 0x33f   : > { %v2330_v8 = vmax.f32 %v2205_v54, 0.0  ;;  %v2378_v17 = vpack.c.bf16 %v2314_v58, %v2314_v58  ;;  %2804 = vmatmul.msk.bf16.gmra.mxu0 %vm2066_vm12, %v1998_v23 }
 0x341   : > { %v2394_v4 = vpack.c.bf16 %v2330_v8, %v2330_v8  ;;  %2443 = vst.msk [vmem:[%s4928_s4 + $0x1c] sm:$0xf] %vm2435_vm13, %v2378_v17 }
 0x343   : > { %2459 = vst.msk [vmem:[%s4928_s4 + $0x5c] sm:$0xf] %vm2435_vm13, %v2394_v4 }
 0x344   : > { %v1494_v62 = vpop.permute.xlu0 %1493 }
 0x345   : > { %v2014_v59 = vsel %vm1982_vm11, %v1949_v27, %v1494_v62 }
 0x346   : > { %2812 = vmatmul.msk.bf16.gmra.mxu1 %vm2066_vm12, %v2014_v59 }
 0x34a   : > { %v2247_v47 = vpop.f32.mrf.mxu2 }
 0x34b   : > { %v2248_v31 = vadd.f32 %v4903_v35, %v2247_v47 }
 0x34d   : > { %v2347_v50 = vmax.f32 %v2248_v31, 0.0 }
 0x34f   : > { %v2411_v1 = vpack.c.bf16 %v2347_v50, %v2347_v50 }
 0x351   : > { %2476 = vst.msk [vmem:[%s4928_s4 + $0xa0] sm:$0xf] %vm2435_vm13, %v2411_v1  ;;  %v2287_v44 = vpop.f32.mrf.mxu3 }
 0x352   : > { %v2288_v37 = vadd.f32 %v4903_v35, %v2287_v44  ;;  %v2249_v11 = vpop.f32.mrf.mxu2 }
 0x353   : > { %v2250_v40 = vadd.f32 %v4903_v35, %v2249_v11 }
 0x354   : > { %v2363_v15 = vmax.f32 %v2288_v37, 0.0 }
 0x355   : > { %v2348_v51 = vmax.f32 %v2250_v40, 0.0  ;;  %v2167_v18 = vpop.f32.mrf.mxu0 }
 0x356   : > { %v2427_v20 = vpack.c.bf16 %v2363_v15, %v2363_v15  ;;  %v2168_v39 = vadd.f32 %v4903_v35, %v2167_v18 }
 0x357   : > { %v2412_v41 = vpack.c.bf16 %v2348_v51, %v2348_v51 }
 0x358   : > { %2492 = vst.msk [vmem:[%s4928_s4 + $0xe0] sm:$0xf] %vm2435_vm13, %v2427_v20  ;;  %v2315_v33 = vmax.f32 %v2168_v39, 0.0 }
 0x359   : > { %2477 = vst.msk [vmem:[%s4928_s4 + $0xa4] sm:$0xf] %vm2435_vm13, %v2412_v41  ;;  %v2289_v3 = vpop.f32.mrf.mxu3 }
 0x35a   : > { %v2379_v21 = vpack.c.bf16 %v2315_v33, %v2315_v33  ;;  %v2290_v52 = vadd.f32 %v4903_v35, %v2289_v3 }
 0x35b   : > { %v2207_v49 = vpop.f32.mrf.mxu1 }
 0x35c   : > { %2444 = vst.msk [vmem:[%s4928_s4 + $0x20] sm:$0xf] %vm2435_vm13, %v2379_v21  ;;  %v2364_v29 = vmax.f32 %v2290_v52, 0.0  ;;  %v2208_v34 = vadd.f32 %v4903_v35, %v2207_v49 }
 0x35d   : > { %v2169_v60 = vpop.f32.mrf.mxu0 }
 0x35e   : > { %v2428_v16 = vpack.c.bf16 %v2364_v29, %v2364_v29  ;;  %v2170_v45 = vadd.f32 %v4903_v35, %v2169_v60  ;;  %v2331_v19 = vmax.f32 %v2208_v34, 0.0 }
 0x360   : > { %2493 = vst.msk [vmem:[%s4928_s4 + $0xe4] sm:$0xf] %vm2435_vm13, %v2428_v16  ;;  %v2316_v5 = vmax.f32 %v2170_v45, 0.0  ;;  %v2395_v55 = vpack.c.bf16 %v2331_v19, %v2331_v19 }
 0x362   : > { %v2380_v9 = vpack.c.bf16 %v2316_v5, %v2316_v5  ;;  %2460 = vst.msk [vmem:[%s4928_s4 + $0x60] sm:$0xf] %vm2435_vm13, %v2395_v55 }
 0x363   : > { %v2209_v7 = vpop.f32.mrf.mxu1 }
 0x364   : > { %2445 = vst.msk [vmem:[%s4928_s4 + $0x24] sm:$0xf] %vm2435_vm13, %v2380_v9  ;;  %v2210_v36 = vadd.f32 %v4903_v35, %v2209_v7 }
 0x366   : > { %v2332_v48 = vmax.f32 %v2210_v36, 0.0 }
 0x368   : > { %v2396_v24 = vpack.c.bf16 %v2332_v48, %v2332_v48 }
 0x36a   : > { %2461 = vst.msk [vmem:[%s4928_s4 + $0x64] sm:$0xf] %vm2435_vm13, %v2396_v24 }
 0x370   : > { %v2292_v10 = vpop.f32.mrf.mxu3 }
 0x371   : > { %v2252_v12 = vpop.f32.mrf.mxu2  ;;  %v2293_v2 = vadd.f32 %v4903_v35, %v2292_v10 }
 0x372   : > { %v2253_v42 = vadd.f32 %v4903_v35, %v2252_v12 }
 0x373   : > { %v2365_v26 = vmax.f32 %v2293_v2, 0.0 }
 0x374   : > { %v2349_v32 = vmax.f32 %v2253_v42, 0.0 }
 0x375   : > { %v2429_v22 = vpack.c.bf16 %v2365_v26, %v2365_v26 }
 0x376   : > { %v2413_v6 = vpack.c.bf16 %v2349_v32, %v2349_v32 }
 0x377   : > { %2494 = vst.msk [vmem:[%s4928_s4 + $0xe8] sm:$0xf] %vm2435_vm13, %v2429_v22 }
 0x378   : > { %2478 = vst.msk [vmem:[%s4928_s4 + $0xa8] sm:$0xf] %vm2435_vm13, %v2413_v6  ;;  %v2294_v61 = vpop.f32.mrf.mxu3 }
 0x379   : > { %v2254_v46 = vpop.f32.mrf.mxu2  ;;  %v2295_v30 = vadd.f32 %v4903_v35, %v2294_v61 }
 0x37a   : > { %v2255_v25 = vadd.f32 %v4903_v35, %v2254_v46  ;;  %v2212_v57 = vpop.f32.mrf.mxu1 }
 0x37b   : > { %v2366_v56 = vmax.f32 %v2295_v30, 0.0  ;;  %v2172_v53 = vpop.f32.mrf.mxu0  ;;  %v2213_v63 = vadd.f32 %v4903_v35, %v2212_v57 }
 0x37c   : > { %v2350_v43 = vmax.f32 %v2255_v25, 0.0  ;;  %v2173_v13 = vadd.f32 %v4903_v35, %v2172_v53 }
 0x37d   : > { %v2430_v54 = vpack.c.bf16 %v2366_v56, %v2366_v56  ;;  %v2333_v0 = vmax.f32 %v2213_v63, 0.0 }
 0x37e   : > { %v2414_v58 = vpack.c.bf16 %v2350_v43, %v2350_v43  ;;  %v2317_v14 = vmax.f32 %v2173_v13, 0.0 }
 0x37f   : > { %2495 = vst.msk [vmem:[%s4928_s4 + $0xec] sm:$0xf] %vm2435_vm13, %v2430_v54  ;;  %v2397_v8 = vpack.c.bf16 %v2333_v0, %v2333_v0 }
 0x380   : > { %2479 = vst.msk [vmem:[%s4928_s4 + $0xac] sm:$0xf] %vm2435_vm13, %v2414_v58  ;;  %v2381_v23 = vpack.c.bf16 %v2317_v14, %v2317_v14 }
 0x381   : > { %2462 = vst.msk [vmem:[%s4928_s4 + $0x68] sm:$0xf] %vm2435_vm13, %v2397_v8 }
 0x382   : > { %2446 = vst.msk [vmem:[%s4928_s4 + $0x28] sm:$0xf] %vm2435_vm13, %v2381_v23  ;;  %v2214_v17 = vpop.f32.mrf.mxu1 }
 0x383   : > { %v2174_v4 = vpop.f32.mrf.mxu0  ;;  %v2215_v28 = vadd.f32 %v4903_v35, %v2214_v17 }
 0x384   : > { %v2175_v38 = vadd.f32 %v4903_v35, %v2174_v4 }
 0x385   : > { %v2334_v27 = vmax.f32 %v2215_v28, 0.0 }
 0x386   : > { %v2318_v62 = vmax.f32 %v2175_v38, 0.0 }
 0x387   : > { %v2398_v59 = vpack.c.bf16 %v2334_v27, %v2334_v27 }
 0x388   : > { %v2382_v47 = vpack.c.bf16 %v2318_v62, %v2318_v62 }
 0x389   : > { %2463 = vst.msk [vmem:[%s4928_s4 + $0x6c] sm:$0xf] %vm2435_vm13, %v2398_v59 }
 0x38a   : > { %2447 = vst.msk [vmem:[%s4928_s4 + $0x2c] sm:$0xf] %vm2435_vm13, %v2382_v47 }
 0x390   : > { %v2257_v31 = vpop.f32.mrf.mxu2 }
 0x391   : > { %v2258_v50 = vadd.f32 %v4903_v35, %v2257_v31 }
 0x392   : > { %v2297_v1 = vpop.f32.mrf.mxu3 }
 0x393   : > { %v2351_v44 = vmax.f32 %v2258_v50, 0.0  ;;  %v2298_v37 = vadd.f32 %v4903_v35, %v2297_v1 }
 0x395   : > { %v2415_v11 = vpack.c.bf16 %v2351_v44, %v2351_v44  ;;  %v2367_v40 = vmax.f32 %v2298_v37, 0.0 }
 0x397   : > { %2480 = vst.msk [vmem:[%s4928_s4 + $0xb0] sm:$0xf] %vm2435_vm13, %v2415_v11  ;;  %v2431_v15 = vpack.c.bf16 %v2367_v40, %v2367_v40 }
 0x398   : > { %v2259_v51 = vpop.f32.mrf.mxu2 }
 0x399   : > { %2496 = vst.msk [vmem:[%s4928_s4 + $0xf0] sm:$0xf] %vm2435_vm13, %v2431_v15  ;;  %v2260_v18 = vadd.f32 %v4903_v35, %v2259_v51 }
 0x39a   : > { %v2299_v20 = vpop.f32.mrf.mxu3  ;;  %v2177_v39 = vpop.f32.mrf.mxu0 }
 0x39b   : > { %v2352_v41 = vmax.f32 %v2260_v18, 0.0  ;;  %v2300_v33 = vadd.f32 %v4903_v35, %v2299_v20  ;;  %v2178_v3 = vadd.f32 %v4903_v35, %v2177_v39 }
 0x39c   : > { %v2217_v21 = vpop.f32.mrf.mxu1 }
 0x39d   : > { %v2416_v52 = vpack.c.bf16 %v2352_v41, %v2352_v41  ;;  %v2368_v29 = vmax.f32 %v2300_v33, 0.0  ;;  %v2319_v49 = vmax.f32 %v2178_v3, 0.0  ;;  %v2218_v34 = vadd.f32 %v4903_v35, %v2217_v21 }
 0x39f   : > { %2481 = vst.msk [vmem:[%s4928_s4 + $0xb4] sm:$0xf] %vm2435_vm13, %v2416_v52  ;;  %v2432_v60 = vpack.c.bf16 %v2368_v29, %v2368_v29  ;;  %v2383_v16 = vpack.c.bf16 %v2319_v49, %v2319_v49  ;;  %v2335_v45 = vmax.f32 %v2218_v34, 0.0 }
 0x3a1   : > { %2497 = vst.msk [vmem:[%s4928_s4 + $0xf4] sm:$0xf] %vm2435_vm13, %v2432_v60  ;;  %v2399_v19 = vpack.c.bf16 %v2335_v45, %v2335_v45 }
 0x3a2   : > { %2448 = vst.msk [vmem:[%s4928_s4 + $0x30] sm:$0xf] %vm2435_vm13, %v2383_v16  ;;  %v2179_v5 = vpop.f32.mrf.mxu0 }
 0x3a3   : > { %2464 = vst.msk [vmem:[%s4928_s4 + $0x70] sm:$0xf] %vm2435_vm13, %v2399_v19  ;;  %v2180_v55 = vadd.f32 %v4903_v35, %v2179_v5 }
 0x3a4   : > { %v2219_v9 = vpop.f32.mrf.mxu1 }
 0x3a5   : > { %v2320_v7 = vmax.f32 %v2180_v55, 0.0  ;;  %v2220_v36 = vadd.f32 %v4903_v35, %v2219_v9 }
 0x3a7   : > { %v2384_v48 = vpack.c.bf16 %v2320_v7, %v2320_v7  ;;  %v2336_v24 = vmax.f32 %v2220_v36, 0.0 }
 0x3a9   : > { %2449 = vst.msk [vmem:[%s4928_s4 + $0x34] sm:$0xf] %vm2435_vm13, %v2384_v48  ;;  %v2400_v10 = vpack.c.bf16 %v2336_v24, %v2336_v24 }
 0x3ab   : > { %2465 = vst.msk [vmem:[%s4928_s4 + $0x74] sm:$0xf] %vm2435_vm13, %v2400_v10 }
 0x3b2   : > { %v2262_v12 = vpop.f32.mrf.mxu2 }
 0x3b3   : > { %v2263_v2 = vadd.f32 %v4903_v35, %v2262_v12 }
 0x3b5   : > { %v2353_v42 = vmax.f32 %v2263_v2, 0.0 }
 0x3b7   : > { %v2417_v26 = vpack.c.bf16 %v2353_v42, %v2353_v42 }
 0x3b9   : > { %2482 = vst.msk [vmem:[%s4928_s4 + $0xb8] sm:$0xf] %vm2435_vm13, %v2417_v26 }
 0x3ba   : > { %v2302_v32 = vpop.f32.mrf.mxu3  ;;  %v2264_v6 = vpop.f32.mrf.mxu2 }
 0x3bb   : > { %v2303_v22 = vadd.f32 %v4903_v35, %v2302_v32  ;;  %v2265_v61 = vadd.f32 %v4903_v35, %v2264_v6 }
 0x3bc   : > { %v2182_v30 = vpop.f32.mrf.mxu0 }
 0x3bd   : > { %v2369_v46 = vmax.f32 %v2303_v22, 0.0  ;;  %v2354_v25 = vmax.f32 %v2265_v61, 0.0  ;;  %v2183_v57 = vadd.f32 %v4903_v35, %v2182_v30 }
 0x3bf   : > { %v2433_v56 = vpack.c.bf16 %v2369_v46, %v2369_v46  ;;  %v2418_v53 = vpack.c.bf16 %v2354_v25, %v2354_v25  ;;  %v2321_v63 = vmax.f32 %v2183_v57, 0.0 }
 0x3c1   : > { %2498 = vst.msk [vmem:[%s4928_s4 + $0xf8] sm:$0xf] %vm2435_vm13, %v2433_v56  ;;  %v2385_v43 = vpack.c.bf16 %v2321_v63, %v2321_v63 }
 0x3c2   : > { %2483 = vst.msk [vmem:[%s4928_s4 + $0xbc] sm:$0xf] %vm2435_vm13, %v2418_v53  ;;  %v2304_v13 = vpop.f32.mrf.mxu3 }
 0x3c3   : > { %v2305_v54 = vadd.f32 %v4903_v35, %v2304_v13  ;;  %2450 = vst.msk [vmem:[%s4928_s4 + $0x38] sm:$0xf] %vm2435_vm13, %v2385_v43  ;;  %v2222_v0 = vpop.f32.mrf.mxu1 }
 0x3c4   : > { %v2223_v14 = vadd.f32 %v4903_v35, %v2222_v0  ;;  %v2184_v8 = vpop.f32.mrf.mxu0 }
 0x3c5   : > { %v2370_v58 = vmax.f32 %v2305_v54, 0.0  ;;  %v2185_v23 = vadd.f32 %v4903_v35, %v2184_v8 }
 0x3c6   : > { %v2337_v4 = vmax.f32 %v2223_v14, 0.0 }
 0x3c7   : > { %v2434_v17 = vpack.c.bf16 %v2370_v58, %v2370_v58  ;;  %v2322_v28 = vmax.f32 %v2185_v23, 0.0 }
 0x3c8   : > { %v2401_v38 = vpack.c.bf16 %v2337_v4, %v2337_v4 }
 0x3c9   : > { %2499 = vst.msk [vmem:[%s4928_s4 + $0xfc] sm:$0xf] %vm2435_vm13, %v2434_v17  ;;  %v2386_v27 = vpack.c.bf16 %v2322_v28, %v2322_v28 }
 0x3ca   : > { %2466 = vst.msk [vmem:[%s4928_s4 + $0x78] sm:$0xf] %vm2435_vm13, %v2401_v38 }
 0x3cb   : > { %2451 = vst.msk [vmem:[%s4928_s4 + $0x3c] sm:$0xf] %vm2435_vm13, %v2386_v27  ;;  %v2224_v62 = vpop.f32.mrf.mxu1 }
 0x3cc   : > { %v2225_v59 = vadd.f32 %v4903_v35, %v2224_v62 }
 0x3ce   : > { %v2338_v47 = vmax.f32 %v2225_v59, 0.0 }
 0x3d0   : > { %v2402_v31 = vpack.c.bf16 %v2338_v47, %v2338_v47 }
 0x3d2   : > { %2467 = vst.msk [vmem:[%s4928_s4 + $0x7c] sm:$0xf] %vm2435_vm13, %v2402_v31 }
 0x3d3   : > { %3028 = shalt.err (!%p3025_p7)
}
 0x3d4   : > { %s3106_s28 = smov 64   ;;  %s3107_s4 = smov 4  }
 0x3d5   : > { %2883 = dma.vmem_to_hbm [thread:$0]  (%p3179_p3), %s2518_s9, 4096, %s2520_s10, %s2501_s11, %s3106_s28, %s3106_s28, %s3107_s4  }
 0x3d6 PF: > { %p2889_p9 = scmp.ge.s32.totalorder %s3095_s19, 2  ;;  %s2534_s15 = sand.u32 1, %s3067_s12  }
 0x3d7   : > { %s2535_s16 = scalar_lea.sflag [#allocation3], %s2534_s15 }
 0x3d8   : > { %p2886_p10 = pnand %p2889_p9, %p3188_p8 }
 0x3da   : > { %p2887_p11 = pneg %p2886_p10 }
 0x3dc   : > { %3062 = dma.done.wait (%p2887_p11), %s2535_s16, 4096  }
 0x3dd   : > { %3064 = vsyncadd (%p2887_p11), %s2535_s16, 4294963200  ;;  %s16_s19 = sadd.s32 1, %s3095_s19   ;;  %s5751_s12 = smov %s3071_s13 }
 0x3de   : > { %p13_p12 = scmp.ge.s32.totalorder %s16_s19, 6   ;;  %s5752_s13 = smov %s3075_s14 }
 0x3df   : > { %s5753_s14 = smov %s3197_s30  ;;  %s5754_s15 = smov %s3087_s17 }
 0x3e0   : > { %s5755_s16 = smov %s3091_s18  ;;  %s5756_s17 = smov %s5759_s22 }
 0x3e1   : > { %s5757_s18 = smov %s5763_s23  ;;  %15 = sbr.rel (!%p13_p12) target bundleno = 5 (0x5), region = 73 }
 0x3e6   :  { %2541 = vsyncpa [#allocation3], 1 }
 0x3e7   :  { %2543 = vsyncpa [#allocation3 + $0x1], 1 }

</bundles_post_ra>
